<compile_context>
chip_gen: v6e
topology: v6e:2x2x1
jax: 0.10.0
libtpu: 0.0.40
codegen_flags: <defaults>
</compile_context>

<pallas_src>
import numpy as np
import jax
import jax.numpy as jnp
from jax import lax
from jax.experimental import pallas as pl
from jax.experimental.pallas import tpu as pltpu

# ---------------- model hyper-parameters (small but consistent) -------------
B = 2              # batch
C = 4              # num_channels (EEG electrodes)
T = 960            # signal_length (gives flattened_size == F2*16)
F1 = 8             # conv1 filters
KE = 32            # conv1 temporal kernel
F2 = 16            # sep_conv filters
NC = 4             # num_classes
EPS = 1e-5

PAD1 = KE // 2                 # 16
T1 = T + 2 * PAD1 - KE + 1     # conv1/conv2 time length = 961
W2 = -(-T1 // 8)               # pool2 output width (ceil) = 121
PAD3 = 8                       # sep_conv padding
W2P = W2 + 2 * PAD3            # pooled-and-padded width = 137
T3 = W2P - 16 + 1              # sep_conv output width = 122
W3 = -(-T3 // 8)               # pool3 output width = 16
assert F2 * W3 == F2 * 16, "signal_length inconsistent with flattened_size"

CH2 = 2 * F1                   # 16   conv2 output channels
BCH2 = B * CH2                 # 32   batched conv2 channels (sublane-stacked)
CKE = C * KE                   # 128  fused conv1+conv2 contraction (K)
KO = 16 * CH2                  # 256  fused sep-conv contraction (K)

# lane-padded sizes (multiples of 128 -> full vreg stores, clean MXU tiles)
T1P = 1024
W2PP = 256
T3P = 128
NCP = 128


# ------------------------ host-side constant matrices -----------------------
def _pool_matrix_np(w_in, k=8):
    """(w_in, ceil(w_in/k)) ceil-mode avg-pool matrix with valid-count divisors."""
    w_out = -(-w_in // k)
    P = np.zeros((w_in, w_out), np.float32)
    for w in range(w_out):
        lo, hi = w * k, min((w + 1) * k, w_in)
        P[lo:hi, w] = 1.0 / (hi - lo)
    return P


def _make_p2_np():
    """(T1P, W2PP): pool T1->W2 (ceil) then embed at offset PAD3 (sep-conv zero pad)."""
    P = np.zeros((T1P, W2PP), np.float32)
    P[:T1, PAD3:PAD3 + W2] = _pool_matrix_np(T1)
    return P


P2_NP = _make_p2_np()                              # exact in bf16 (1/8 and 1/1)
P3_NP = _pool_matrix_np(T3)                        # (T3, W3)
ONEHOT_NP = np.eye(NC, NCP, dtype=np.float32)      # (NC, NCP)


# ------------------------------- Pallas kernel ------------------------------
def cnn_kernel(xcol_ref, w12_ref, b12_ref, p2_ref, w3_ref, b3_ref,
               rall_ref, onehot_ref, bfc_ref, out_ref, x2_sc, zcol_sc):
    f32 = jnp.float32
    bf16 = jnp.bfloat16

    def elu(v):                                    # f32 ELU (exp on EUP slot)
        return jnp.where(v > 0, v, jnp.exp(jnp.minimum(v, 0.0)) - 1.0)

    # ---- conv1+bn1+conv2+bn2 fused: one K=128 MXU matmul per batch element,
    #      results stacked along sublanes of x2_sc at offsets b*16 (packed
    #      bf16 vreg aligned).
    for b in range(B):
        x2 = jnp.dot(w12_ref[...], xcol_ref[b],
                     preferred_element_type=f32) + b12_ref[...]      # (16, T1P)
        x2_sc[b * CH2:(b + 1) * CH2, :] = elu(x2).astype(bf16)
    # TODO(synk): dropout2 is inference-mode identity (no RNG in kernel)

    # ---- AvgPool2d((1,8), ceil) + zero pad for sep_conv: ONE MXU matmul over
    #      both batch elements (M=32).  P2 rows >= T1 are zero, so the x2 pad
    #      lanes (which hold elu(bias)) never contribute.
    z2 = jnp.dot(x2_sc[...], p2_ref[...],
                 preferred_element_type=f32).astype(bf16)            # (32, W2PP)

    # ---- 16 sep-conv taps via direct lane slices of z2 (no S matrix, no MXU):
    #      zcol[k*16+o, b*128+t] = z2[b*16+o, k+t].  Sublane offsets k*16 and
    #      lane offsets b*128 keep every store a full packed bf16 vreg.
    for k in range(16):
        for b in range(B):
            zcol_sc[k * CH2:(k + 1) * CH2, b * T3P:(b + 1) * T3P] = \
                z2[b * CH2:(b + 1) * CH2, k:k + T3P]

    # ---- sep_conv + bn3 fused: ONE K=256 matmul over both batch elements.
    x3 = jnp.dot(w3_ref[...], zcol_sc[...],
                 preferred_element_type=f32) + b3_ref[...]           # (F2, B*T3P)
    x3 = elu(x3)
    # NOTE: x3 lanes t >= T3 now hold real pooled data (not elu(b3)); they are
    # masked exclusively by rall's zero padding for t >= T3 (asserted in fold).
    # TODO(synk): dropout3 is inference-mode identity

    # ---- AvgPool2d((1,8), ceil) + flatten + fc folded into rall (VPU + XLU)
    for b in range(B):
        x3b = x3[:, b * T3P:(b + 1) * T3P]                           # (F2, T3P)
        acc = bfc_ref[...]                                           # (1, NCP)
        for n in range(NC):
            red = jnp.sum(x3b * rall_ref[n], axis=1, keepdims=True)  # (F2, 1)
            red = jnp.sum(red, axis=0, keepdims=True)                # (1, 1)
            acc = acc + red * onehot_ref[n:n + 1, :]
        out_ref[b:b + 1, :] = acc                                    # lane-dense store


# --------------------- one-time parameter folding (load time) ----------------
def fold_params(p):
    """Fold eval-mode BatchNorm into the convs and fuse pool3+flatten+fc.

    Runs ONCE at model-load time (outside the per-call jit): the per-call path
    is only build_xcol + pallas_call."""
    prec = lax.Precision.HIGHEST

    s1 = p["g1"] / jnp.sqrt(p["v1"] + EPS)
    w1f = p["w1"][:, 0, 0, :] * s1[:, None]                        # (F1, KE)
    b1f = (p["cb1"] - p["m1"]) * s1 + p["be1"]                     # (F1,)

    s2 = p["g2"] / jnp.sqrt(p["v2"] + EPS)
    w2m = p["w2"][:, 0, :, 0] * s2[:, None]                        # (2F1, C)
    b2f = p["be2"] - p["m2"] * s2                                  # (2F1,)

    grp = jnp.arange(CH2) // 2                                     # grouped-conv map
    # W12[o, c*KE + k] = w2m[o, c] * w1f[o//2, k]
    w12 = (w2m[:, :, None] * w1f[grp][:, None, :]).reshape(CH2, CKE)
    b12 = (jnp.sum(w2m, axis=1) * b1f[grp] + b2f)[:, None]         # (2F1, 1)

    s3 = p["g3"] / jnp.sqrt(p["v3"] + EPS)
    w3f = p["w3"][:, :, 0, :] * s3[:, None, None]                  # (F2, 2F1, 16)
    w3flat = jnp.transpose(w3f, (0, 2, 1)).reshape(F2, KO)         # [f, k*2F1 + o]
    b3f = (p["be3"] - p["m3"] * s3)[:, None]                       # (F2, 1)

    # rall[n, f, t] = sum_w P3[t, w] * wfc[n, f*W3 + w]  (pool3+flatten+fc fold)
    wfc_r = p["wfc"].reshape(NC, F2, W3)
    rall = jnp.einsum("tw,nfw->nft", jnp.asarray(P3_NP), wfc_r, precision=prec)
    rall = jnp.pad(rall, ((0, 0), (0, 0), (0, T3P - T3)))          # (NC, F2, T3P)
    bfc_pad = jnp.zeros((1, NCP), jnp.float32).at[0, :NC].set(p["bfc"])

    folded = dict(
        w12=w12.astype(jnp.bfloat16),
        b12=b12.astype(jnp.float32),
        p2=jnp.asarray(P2_NP, jnp.bfloat16),
        w3=w3flat.astype(jnp.bfloat16),
        b3=b3f.astype(jnp.float32),
        rall=rall.astype(jnp.float32),
        onehot=jnp.asarray(ONEHOT_NP),
        bfc=bfc_pad,
    )
    # The slice-based tap build leaves real data in x3's t >= T3 lanes; the
    # zero padding of rall there is the ONLY thing masking them.  Guard it.
    assert bool(jnp.all(folded["rall"][:, :, T3:] == 0.0)), \
        "rall pad lanes must stay zero (masks x3's t >= T3 lanes)"
    return folded


def build_xcol(x):
    """im2col lag slab for the fused conv1+conv2: (B, C*KE, T1P) bf16."""
    xpad = jnp.pad(x, ((0, 0), (0, 0), (PAD1, PAD1)))              # (B, C, T+32)
    idx = np.arange(T1)[None, :] + np.arange(KE)[:, None]          # (KE, T1)
    xcol = xpad[:, :, idx].reshape(B, CKE, T1)                     # [b, c*KE+k, t]
    xcol = jnp.pad(xcol, ((0, 0), (0, 0), (0, T1P - T1)))
    return xcol.astype(jnp.bfloat16)


@jax.jit
def cnn_forward(x, folded):
    xcol = build_xcol(x)

    # Single grid step, both batch elements handled inside the kernel:
    # constants are DMA'd once, no per-step overhead, no per-TC duplication.
    out = pl.pallas_call(
        cnn_kernel,
        out_shape=jax.ShapeDtypeStruct((B, NCP), jnp.float32),
        grid_spec=pltpu.PrefetchScalarGridSpec(
            num_scalar_prefetch=0,
            grid=(1,),
            in_specs=[
                pl.BlockSpec((B, CKE, T1P),   lambda i: (0, 0, 0)),
                pl.BlockSpec((CH2, CKE),      lambda i: (0, 0)),
                pl.BlockSpec((CH2, 1),        lambda i: (0, 0)),
                pl.BlockSpec((T1P, W2PP),     lambda i: (0, 0)),
                pl.BlockSpec((F2, KO),        lambda i: (0, 0)),
                pl.BlockSpec((F2, 1),         lambda i: (0, 0)),
                pl.BlockSpec((NC, F2, T3P),   lambda i: (0, 0, 0)),
                pl.BlockSpec((NC, NCP),       lambda i: (0, 0)),
                pl.BlockSpec((1, NCP),        lambda i: (0, 0)),
            ],
            out_specs=pl.BlockSpec((B, NCP),  lambda i: (0, 0)),
            scratch_shapes=[
                pltpu.VMEM((BCH2, T1P), jnp.bfloat16),     # x2_sc  (32, 1024)
                pltpu.VMEM((KO, B * T3P), jnp.bfloat16),   # zcol_sc (256, 256)
            ],
        ),
        compiler_params=pltpu.CompilerParams(dimension_semantics=("arbitrary",)),
    )(xcol, folded["w12"], folded["b12"], folded["p2"], folded["w3"],
      folded["b3"], folded["rall"], folded["onehot"], folded["bfc"])
    return out[:, :NC]


# ------------------------ pure-JAX reference (NCHW, f32) ---------------------
def reference_forward(x, p):
    dn = ("NCHW", "OIHW", "NCHW")
    prec = lax.Precision.HIGHEST

    def bn(y, g, b, m, v):
        return ((y - m[None, :, None, None]) / jnp.sqrt(v[None, :, None, None] + EPS)
                * g[None, :, None, None] + b[None, :, None, None])

    def elu(y):
        return jnp.where(y > 0, y, jnp.exp(jnp.minimum(y, 0.0)) - 1.0)

    def avg_pool_ceil_w(y, k=8):
        Bb, Cc, H, W = y.shape
        Wo = -(-W // k)
        yp = jnp.pad(y, ((0, 0), (0, 0), (0, 0), (0, Wo * k - W)))
        s = yp.reshape(Bb, Cc, H, Wo, k).sum(-1)
        cnt = (jnp.minimum((jnp.arange(Wo) + 1) * k, W) - jnp.arange(Wo) * k)
        return s / cnt[None, None, None, :].astype(jnp.float32)

    y = x[:, None, :, :]
    y = lax.conv_general_dilated(y, p["w1"], (1, 1), [(0, 0), (PAD1, PAD1)],
                                 dimension_numbers=dn, precision=prec)
    y = y + p["cb1"][None, :, None, None]
    y = bn(y, p["g1"], p["be1"], p["m1"], p["v1"])
    y = lax.conv_general_dilated(y, p["w2"], (1, 1), [(0, 0), (0, 0)],
                                 dimension_numbers=dn, feature_group_count=F1,
                                 precision=prec)
    y = elu(bn(y, p["g2"], p["be2"], p["m2"], p["v2"]))
    y = avg_pool_ceil_w(y)
    y = lax.conv_general_dilated(y, p["w3"], (1, 1), [(0, 0), (PAD3, PAD3)],
                                 dimension_numbers=dn, precision=prec)
    y = elu(bn(y, p["g3"], p["be3"], p["m3"], p["v3"]))
    y = avg_pool_ceil_w(y)
    y = y.reshape(y.shape[0], -1)
    return jnp.dot(y, p["wfc"].T, precision=prec) + p["bfc"][None, :]


# ------------------------------------ main -----------------------------------
def init_params(key):
    ks = jax.random.split(key, 20)
    f = jnp.float32
    p = {
        "w1": (jax.random.normal(ks[0], (F1, 1, 1, KE)) * 0.1).astype(f),
        "cb1": (jax.random.normal(ks[1], (F1,)) * 0.1).astype(f),
        "g1": (1.0 + 0.1 * jax.random.normal(ks[2], (F1,))).astype(f),
        "be1": (0.1 * jax.random.normal(ks[3], (F1,))).astype(f),
        "m1": (0.1 * jax.random.normal(ks[4], (F1,))).astype(f),
        "v1": (0.5 + jnp.abs(jax.random.normal(ks[5], (F1,))) * 0.5).astype(f),
        "w2": (jax.random.normal(ks[6], (2 * F1, 1, C, 1)) * 0.2).astype(f),
        "g2": (1.0 + 0.1 * jax.random.normal(ks[7], (2 * F1,))).astype(f),
        "be2": (0.1 * jax.random.normal(ks[8], (2 * F1,))).astype(f),
        "m2": (0.1 * jax.random.normal(ks[9], (2 * F1,))).astype(f),
        "v2": (0.5 + jnp.abs(jax.random.normal(ks[10], (2 * F1,))) * 0.5).astype(f),
        "w3": (jax.random.normal(ks[11], (F2, 2 * F1, 1, 16)) * 0.1).astype(f),
        "g3": (1.0 + 0.1 * jax.random.normal(ks[12], (F2,))).astype(f),
        "be3": (0.1 * jax.random.normal(ks[13], (F2,))).astype(f),
        "m3": (0.1 * jax.random.normal(ks[14], (F2,))).astype(f),
        "v3": (0.5 + jnp.abs(jax.random.normal(ks[15], (F2,))) * 0.5).astype(f),
        "wfc": (jax.random.normal(ks[16], (NC, F2 * W3)) * 0.1).astype(f),
        "bfc": (jax.random.normal(ks[17], (NC,)) * 0.1).astype(f),
    }
    x = jax.random.normal(ks[18], (B, C, T), dtype=f)
    return x, p


if __name__ == "__main__":
    x, params = init_params(jax.random.PRNGKey(0))

    folded = fold_params(params)          # once, at model-load time
    out = jax.block_until_ready(cnn_forward(x, folded))
    ref = jax.block_until_ready(reference_forward(x, params))

    assert out.shape == (B, NC), out.shape
    assert bool(jnp.all(jnp.isfinite(out)))
    # bf16 MXU operands / f32 accumulation vs f32-HIGHEST reference
    np.testing.assert_allclose(np.asarray(out), np.asarray(ref),
                               rtol=2e-2, atol=1e-2)
    print("KERNEL_OK")
</pallas_src>

<mosaic_0001>
module attributes {stable_mosaic.version = 11 : i64} {
  func.func @cnn_kernel(%arg0: i32, %arg1: memref<2x128x1024xbf16, #tpu.memory_space<vmem>>, %arg2: memref<16x128xbf16, #tpu.memory_space<vmem>>, %arg3: memref<16x1xf32, #tpu.memory_space<vmem>>, %arg4: memref<1024x256xbf16, #tpu.memory_space<vmem>>, %arg5: memref<16x256xbf16, #tpu.memory_space<vmem>>, %arg6: memref<16x1xf32, #tpu.memory_space<vmem>>, %arg7: memref<4x16x128xf32, #tpu.memory_space<vmem>>, %arg8: memref<4x128xf32, #tpu.memory_space<vmem>>, %arg9: memref<1x128xf32, #tpu.memory_space<vmem>>, %arg10: memref<2x128xf32, #tpu.memory_space<vmem>>, %arg11: memref<32x1024xbf16, #tpu.memory_space<vmem>>, %arg12: memref<256x256xbf16, #tpu.memory_space<vmem>>) attributes {dimension_semantics = [#tpu.dimension_semantics<arbitrary>], iteration_bounds = array<i64: 1>, scalar_prefetch = 0 : i64, scratch_operands = 2 : i64, tpu.core_type = #tpu.core_type<tc>, window_params = [{pipeline_mode = #tpu.pipeline_mode<synchronous>, transform_indices = @transform_0, window_bounds = array<i64: 2, 128, 1024>}, {pipeline_mode = #tpu.pipeline_mode<synchronous>, transform_indices = @transform_1, window_bounds = array<i64: 16, 128>}, {pipeline_mode = #tpu.pipeline_mode<synchronous>, transform_indices = @transform_2, window_bounds = array<i64: 16, 1>}, {pipeline_mode = #tpu.pipeline_mode<synchronous>, transform_indices = @transform_3, window_bounds = array<i64: 1024, 256>}, {pipeline_mode = #tpu.pipeline_mode<synchronous>, transform_indices = @transform_4, window_bounds = array<i64: 16, 256>}, {pipeline_mode = #tpu.pipeline_mode<synchronous>, transform_indices = @transform_5, window_bounds = array<i64: 16, 1>}, {pipeline_mode = #tpu.pipeline_mode<synchronous>, transform_indices = @transform_6, window_bounds = array<i64: 4, 16, 128>}, {pipeline_mode = #tpu.pipeline_mode<synchronous>, transform_indices = @transform_7, window_bounds = array<i64: 4, 128>}, {pipeline_mode = #tpu.pipeline_mode<synchronous>, transform_indices = @transform_8, window_bounds = array<i64: 1, 128>}, {pipeline_mode = #tpu.pipeline_mode<synchronous>, transform_indices = @transform_9, window_bounds = array<i64: 2, 128>}]} {
    %c0 = arith.constant 0 : index
    %c0_0 = arith.constant 0 : index
    %0 = vector.load %arg2[%c0, %c0_0] : memref<16x128xbf16, #tpu.memory_space<vmem>>, vector<16x128xbf16>
    %c0_1 = arith.constant 0 : index
    %c0_2 = arith.constant 0 : index
    %c0_3 = arith.constant 0 : index
    %1 = vector.load %arg1[%c0_1, %c0_2, %c0_3] : memref<2x128x1024xbf16, #tpu.memory_space<vmem>>, vector<1x128x1024xbf16>
    %2 = vector.shape_cast %1 : vector<1x128x1024xbf16> to vector<128x1024xbf16>
    %cst = arith.constant dense<0.000000e+00> : vector<16x1024xf32>
    %3 = tpu.matmul %0, %2, %cst {dimension_numbers = #tpu.dot_dimension_numbers<[1], [0], [0], [1], [0, 0, 1, 1], [], []>} : vector<16x128xbf16>, vector<128x1024xbf16>, vector<16x1024xf32> -> vector<16x1024xf32>
    %c0_4 = arith.constant 0 : index
    %c0_5 = arith.constant 0 : index
    %4 = vector.load %arg3[%c0_4, %c0_5] : memref<16x1xf32, #tpu.memory_space<vmem>>, vector<16x1xf32>
    %5 = vector.broadcast %4 : vector<16x1xf32> to vector<16x1024xf32>
    %6 = arith.addf %3, %5 : vector<16x1024xf32>
    %cst_6 = arith.constant 0.000000e+00 : f32
    %7 = vector.broadcast %cst_6 : f32 to vector<16x1024xf32>
    %8 = arith.cmpf ogt, %6, %7 : vector<16x1024xf32>
    %cst_7 = arith.constant 0.000000e+00 : f32
    %9 = vector.broadcast %cst_7 : f32 to vector<16x1024xf32>
    %10 = arith.minimumf %6, %9 : vector<16x1024xf32>
    %11 = math.exp %10 : vector<16x1024xf32>
    %cst_8 = arith.constant 1.000000e+00 : f32
    %12 = vector.broadcast %cst_8 : f32 to vector<16x1024xf32>
    %13 = arith.subf %11, %12 : vector<16x1024xf32>
    %14 = arith.select %8, %6, %13 : vector<16x1024xi1>, vector<16x1024xf32>
    %15 = arith.truncf %14 : vector<16x1024xf32> to vector<16x1024xbf16>
    %c0_9 = arith.constant 0 : index
    %c0_10 = arith.constant 0 : index
    %16 = vector.load %arg11[%c0_9, %c0_10] : memref<32x1024xbf16, #tpu.memory_space<vmem>>, vector<16x1024xbf16>
    tpu.vector_store %arg11[%c0_9, %c0_10], %15 {strides = array<i32>} : memref<32x1024xbf16, #tpu.memory_space<vmem>>, vector<16x1024xbf16>,
    %c0_11 = arith.constant 0 : index
    %c0_12 = arith.constant 0 : index
    %17 = vector.load %arg2[%c0_11, %c0_12] : memref<16x128xbf16, #tpu.memory_space<vmem>>, vector<16x128xbf16>
    %c1 = arith.constant 1 : index
    %c0_13 = arith.constant 0 : index
    %c0_14 = arith.constant 0 : index
    %18 = vector.load %arg1[%c1, %c0_13, %c0_14] : memref<2x128x1024xbf16, #tpu.memory_space<vmem>>, vector<1x128x1024xbf16>
    %19 = vector.shape_cast %18 : vector<1x128x1024xbf16> to vector<128x1024xbf16>
    %cst_15 = arith.constant dense<0.000000e+00> : vector<16x1024xf32>
    %20 = tpu.matmul %17, %19, %cst_15 {dimension_numbers = #tpu.dot_dimension_numbers<[1], [0], [0], [1], [0, 0, 1, 1], [], []>} : vector<16x128xbf16>, vector<128x1024xbf16>, vector<16x1024xf32> -> vector<16x1024xf32>
    %c0_16 = arith.constant 0 : index
    %c0_17 = arith.constant 0 : index
    %21 = vector.load %arg3[%c0_16, %c0_17] : memref<16x1xf32, #tpu.memory_space<vmem>>, vector<16x1xf32>
    %22 = vector.broadcast %21 : vector<16x1xf32> to vector<16x1024xf32>
    %23 = arith.addf %20, %22 : vector<16x1024xf32>
    %cst_18 = arith.constant 0.000000e+00 : f32
    %24 = vector.broadcast %cst_18 : f32 to vector<16x1024xf32>
    %25 = arith.cmpf ogt, %23, %24 : vector<16x1024xf32>
    %cst_19 = arith.constant 0.000000e+00 : f32
    %26 = vector.broadcast %cst_19 : f32 to vector<16x1024xf32>
    %27 = arith.minimumf %23, %26 : vector<16x1024xf32>
    %28 = math.exp %27 : vector<16x1024xf32>
    %cst_20 = arith.constant 1.000000e+00 : f32
    %29 = vector.broadcast %cst_20 : f32 to vector<16x1024xf32>
    %30 = arith.subf %28, %29 : vector<16x1024xf32>
    %31 = arith.select %25, %23, %30 : vector<16x1024xi1>, vector<16x1024xf32>
    %32 = arith.truncf %31 : vector<16x1024xf32> to vector<16x1024xbf16>
    %c16 = arith.constant 16 : index
    %c0_21 = arith.constant 0 : index
    %33 = vector.load %arg11[%c16, %c0_21] : memref<32x1024xbf16, #tpu.memory_space<vmem>>, vector<16x1024xbf16>
    tpu.vector_store %arg11[%c16, %c0_21], %32 {strides = array<i32>} : memref<32x1024xbf16, #tpu.memory_space<vmem>>, vector<16x1024xbf16>,
    %c0_22 = arith.constant 0 : index
    %c0_23 = arith.constant 0 : index
    %34 = vector.load %arg11[%c0_22, %c0_23] : memref<32x1024xbf16, #tpu.memory_space<vmem>>, vector<32x1024xbf16>
    %c0_24 = arith.constant 0 : index
    %c0_25 = arith.constant 0 : index
    %35 = vector.load %arg4[%c0_24, %c0_25] : memref<1024x256xbf16, #tpu.memory_space<vmem>>, vector<1024x256xbf16>
    %cst_26 = arith.constant dense<0.000000e+00> : vector<32x256xf32>
    %36 = tpu.matmul %34, %35, %cst_26 {dimension_numbers = #tpu.dot_dimension_numbers<[1], [0], [0], [1], [0, 0, 1, 1], [], []>} : vector<32x1024xbf16>, vector<1024x256xbf16>, vector<32x256xf32> -> vector<32x256xf32>
    %37 = arith.truncf %36 : vector<32x256xf32> to vector<32x256xbf16>
    %38 = vector.extract_strided_slice %37 {offsets = [0, 0], sizes = [16, 128], strides = [1, 1]} : vector<32x256xbf16> to vector<16x128xbf16>
    %c0_27 = arith.constant 0 : index
    %c0_28 = arith.constant 0 : index
    %39 = vector.load %arg12[%c0_27, %c0_28] : memref<256x256xbf16, #tpu.memory_space<vmem>>, vector<16x128xbf16>
    tpu.vector_store %arg12[%c0_27, %c0_28], %38 {strides = array<i32>} : memref<256x256xbf16, #tpu.memory_space<vmem>>, vector<16x128xbf16>,
    %40 = vector.extract_strided_slice %37 {offsets = [16, 0], sizes = [16, 128], strides = [1, 1]} : vector<32x256xbf16> to vector<16x128xbf16>
    %c0_29 = arith.constant 0 : index
    %c128 = arith.constant 128 : index
    %41 = vector.load %arg12[%c0_29, %c128] : memref<256x256xbf16, #tpu.memory_space<vmem>>, vector<16x128xbf16>
    tpu.vector_store %arg12[%c0_29, %c128], %40 {strides = array<i32>} : memref<256x256xbf16, #tpu.memory_space<vmem>>, vector<16x128xbf16>,
    %42 = vector.extract_strided_slice %37 {offsets = [0, 1], sizes = [16, 128], strides = [1, 1]} : vector<32x256xbf16> to vector<16x128xbf16>
    %c16_30 = arith.constant 16 : index
    %c0_31 = arith.constant 0 : index
    %43 = vector.load %arg12[%c16_30, %c0_31] : memref<256x256xbf16, #tpu.memory_space<vmem>>, vector<16x128xbf16>
    tpu.vector_store %arg12[%c16_30, %c0_31], %42 {strides = array<i32>} : memref<256x256xbf16, #tpu.memory_space<vmem>>, vector<16x128xbf16>,
    %44 = vector.extract_strided_slice %37 {offsets = [16, 1], sizes = [16, 128], strides = [1, 1]} : vector<32x256xbf16> to vector<16x128xbf16>
    %c16_32 = arith.constant 16 : index
    %c128_33 = arith.constant 128 : index
    %45 = vector.load %arg12[%c16_32, %c128_33] : memref<256x256xbf16, #tpu.memory_space<vmem>>, vector<16x128xbf16>
    tpu.vector_store %arg12[%c16_32, %c128_33], %44 {strides = array<i32>} : memref<256x256xbf16, #tpu.memory_space<vmem>>, vector<16x128xbf16>,
    %46 = vector.extract_strided_slice %37 {offsets = [0, 2], sizes = [16, 128], strides = [1, 1]} : vector<32x256xbf16> to vector<16x128xbf16>
    %c32 = arith.constant 32 : index
    %c0_34 = arith.constant 0 : index
    %47 = vector.load %arg12[%c32, %c0_34] : memref<256x256xbf16, #tpu.memory_space<vmem>>, vector<16x128xbf16>
    tpu.vector_store %arg12[%c32, %c0_34], %46 {strides = array<i32>} : memref<256x256xbf16, #tpu.memory_space<vmem>>, vector<16x128xbf16>,
    %48 = vector.extract_strided_slice %37 {offsets = [16, 2], sizes = [16, 128], strides = [1, 1]} : vector<32x256xbf16> to vector<16x128xbf16>
    %c32_35 = arith.constant 32 : index
    %c128_36 = arith.constant 128 : index
    %49 = vector.load %arg12[%c32_35, %c128_36] : memref<256x256xbf16, #tpu.memory_space<vmem>>, vector<16x128xbf16>
    tpu.vector_store %arg12[%c32_35, %c128_36], %48 {strides = array<i32>} : memref<256x256xbf16, #tpu.memory_space<vmem>>, vector<16x128xbf16>,
    %50 = vector.extract_strided_slice %37 {offsets = [0, 3], sizes = [16, 128], strides = [1, 1]} : vector<32x256xbf16> to vector<16x128xbf16>
    %c48 = arith.constant 48 : index
    %c0_37 = arith.constant 0 : index
    %51 = vector.load %arg12[%c48, %c0_37] : memref<256x256xbf16, #tpu.memory_space<vmem>>, vector<16x128xbf16>
    tpu.vector_store %arg12[%c48, %c0_37], %50 {strides = array<i32>} : memref<256x256xbf16, #tpu.memory_space<vmem>>, vector<16x128xbf16>,
    %52 = vector.extract_strided_slice %37 {offsets = [16, 3], sizes = [16, 128], strides = [1, 1]} : vector<32x256xbf16> to vector<16x128xbf16>
    %c48_38 = arith.constant 48 : index
    %c128_39 = arith.constant 128 : index
    %53 = vector.load %arg12[%c48_38, %c128_39] : memref<256x256xbf16, #tpu.memory_space<vmem>>, vector<16x128xbf16>
    tpu.vector_store %arg12[%c48_38, %c128_39], %52 {strides = array<i32>} : memref<256x256xbf16, #tpu.memory_space<vmem>>, vector<16x128xbf16>,
    %54 = vector.extract_strided_slice %37 {offsets = [0, 4], sizes = [16, 128], strides = [1, 1]} : vector<32x256xbf16> to vector<16x128xbf16>
    %c64 = arith.constant 64 : index
    %c0_40 = arith.constant 0 : index
    %55 = vector.load %arg12[%c64, %c0_40] : memref<256x256xbf16, #tpu.memory_space<vmem>>, vector<16x128xbf16>
    tpu.vector_store %arg12[%c64, %c0_40], %54 {strides = array<i32>} : memref<256x256xbf16, #tpu.memory_space<vmem>>, vector<16x128xbf16>,
    %56 = vector.extract_strided_slice %37 {offsets = [16, 4], sizes = [16, 128], strides = [1, 1]} : vector<32x256xbf16> to vector<16x128xbf16>
    %c64_41 = arith.constant 64 : index
    %c128_42 = arith.constant 128 : index
    %57 = vector.load %arg12[%c64_41, %c128_42] : memref<256x256xbf16, #tpu.memory_space<vmem>>, vector<16x128xbf16>
    tpu.vector_store %arg12[%c64_41, %c128_42], %56 {strides = array<i32>} : memref<256x256xbf16, #tpu.memory_space<vmem>>, vector<16x128xbf16>,
    %58 = vector.extract_strided_slice %37 {offsets = [0, 5], sizes = [16, 128], strides = [1, 1]} : vector<32x256xbf16> to vector<16x128xbf16>
    %c80 = arith.constant 80 : index
    %c0_43 = arith.constant 0 : index
    %59 = vector.load %arg12[%c80, %c0_43] : memref<256x256xbf16, #tpu.memory_space<vmem>>, vector<16x128xbf16>
    tpu.vector_store %arg12[%c80, %c0_43], %58 {strides = array<i32>} : memref<256x256xbf16, #tpu.memory_space<vmem>>, vector<16x128xbf16>,
    %60 = vector.extract_strided_slice %37 {offsets = [16, 5], sizes = [16, 128], strides = [1, 1]} : vector<32x256xbf16> to vector<16x128xbf16>
    %c80_44 = arith.constant 80 : index
    %c128_45 = arith.constant 128 : index
    %61 = vector.load %arg12[%c80_44, %c128_45] : memref<256x256xbf16, #tpu.memory_space<vmem>>, vector<16x128xbf16>
    tpu.vector_store %arg12[%c80_44, %c128_45], %60 {strides = array<i32>} : memref<256x256xbf16, #tpu.memory_space<vmem>>, vector<16x128xbf16>,
    %62 = vector.extract_strided_slice %37 {offsets = [0, 6], sizes = [16, 128], strides = [1, 1]} : vector<32x256xbf16> to vector<16x128xbf16>
    %c96 = arith.constant 96 : index
    %c0_46 = arith.constant 0 : index
    %63 = vector.load %arg12[%c96, %c0_46] : memref<256x256xbf16, #tpu.memory_space<vmem>>, vector<16x128xbf16>
    tpu.vector_store %arg12[%c96, %c0_46], %62 {strides = array<i32>} : memref<256x256xbf16, #tpu.memory_space<vmem>>, vector<16x128xbf16>,
    %64 = vector.extract_strided_slice %37 {offsets = [16, 6], sizes = [16, 128], strides = [1, 1]} : vector<32x256xbf16> to vector<16x128xbf16>
    %c96_47 = arith.constant 96 : index
    %c128_48 = arith.constant 128 : index
    %65 = vector.load %arg12[%c96_47, %c128_48] : memref<256x256xbf16, #tpu.memory_space<vmem>>, vector<16x128xbf16>
    tpu.vector_store %arg12[%c96_47, %c128_48], %64 {strides = array<i32>} : memref<256x256xbf16, #tpu.memory_space<vmem>>, vector<16x128xbf16>,
    %66 = vector.extract_strided_slice %37 {offsets = [0, 7], sizes = [16, 128], strides = [1, 1]} : vector<32x256xbf16> to vector<16x128xbf16>
    %c112 = arith.constant 112 : index
    %c0_49 = arith.constant 0 : index
    %67 = vector.load %arg12[%c112, %c0_49] : memref<256x256xbf16, #tpu.memory_space<vmem>>, vector<16x128xbf16>
    tpu.vector_store %arg12[%c112, %c0_49], %66 {strides = array<i32>} : memref<256x256xbf16, #tpu.memory_space<vmem>>, vector<16x128xbf16>,
    %68 = vector.extract_strided_slice %37 {offsets = [16, 7], sizes = [16, 128], strides = [1, 1]} : vector<32x256xbf16> to vector<16x128xbf16>
    %c112_50 = arith.constant 112 : index
    %c128_51 = arith.constant 128 : index
    %69 = vector.load %arg12[%c112_50, %c128_51] : memref<256x256xbf16, #tpu.memory_space<vmem>>, vector<16x128xbf16>
    tpu.vector_store %arg12[%c112_50, %c128_51], %68 {strides = array<i32>} : memref<256x256xbf16, #tpu.memory_space<vmem>>, vector<16x128xbf16>,
    %70 = vector.extract_strided_slice %37 {offsets = [0, 8], sizes = [16, 128], strides = [1, 1]} : vector<32x256xbf16> to vector<16x128xbf16>
    %c128_52 = arith.constant 128 : index
    %c0_53 = arith.constant 0 : index
    %71 = vector.load %arg12[%c128_52, %c0_53] : memref<256x256xbf16, #tpu.memory_space<vmem>>, vector<16x128xbf16>
    tpu.vector_store %arg12[%c128_52, %c0_53], %70 {strides = array<i32>} : memref<256x256xbf16, #tpu.memory_space<vmem>>, vector<16x128xbf16>,
    %72 = vector.extract_strided_slice %37 {offsets = [16, 8], sizes = [16, 128], strides = [1, 1]} : vector<32x256xbf16> to vector<16x128xbf16>
    %c128_54 = arith.constant 128 : index
    %c128_55 = arith.constant 128 : index
    %73 = vector.load %arg12[%c128_54, %c128_55] : memref<256x256xbf16, #tpu.memory_space<vmem>>, vector<16x128xbf16>
    tpu.vector_store %arg12[%c128_54, %c128_55], %72 {strides = array<i32>} : memref<256x256xbf16, #tpu.memory_space<vmem>>, vector<16x128xbf16>,
    %74 = vector.extract_strided_slice %37 {offsets = [0, 9], sizes = [16, 128], strides = [1, 1]} : vector<32x256xbf16> to vector<16x128xbf16>
    %c144 = arith.constant 144 : index
    %c0_56 = arith.constant 0 : index
    %75 = vector.load %arg12[%c144, %c0_56] : memref<256x256xbf16, #tpu.memory_space<vmem>>, vector<16x128xbf16>
    tpu.vector_store %arg12[%c144, %c0_56], %74 {strides = array<i32>} : memref<256x256xbf16, #tpu.memory_space<vmem>>, vector<16x128xbf16>,
    %76 = vector.extract_strided_slice %37 {offsets = [16, 9], sizes = [16, 128], strides = [1, 1]} : vector<32x256xbf16> to vector<16x128xbf16>
    %c144_57 = arith.constant 144 : index
    %c128_58 = arith.constant 128 : index
    %77 = vector.load %arg12[%c144_57, %c128_58] : memref<256x256xbf16, #tpu.memory_space<vmem>>, vector<16x128xbf16>
    tpu.vector_store %arg12[%c144_57, %c128_58], %76 {strides = array<i32>} : memref<256x256xbf16, #tpu.memory_space<vmem>>, vector<16x128xbf16>,
    %78 = vector.extract_strided_slice %37 {offsets = [0, 10], sizes = [16, 128], strides = [1, 1]} : vector<32x256xbf16> to vector<16x128xbf16>
    %c160 = arith.constant 160 : index
    %c0_59 = arith.constant 0 : index
    %79 = vector.load %arg12[%c160, %c0_59] : memref<256x256xbf16, #tpu.memory_space<vmem>>, vector<16x128xbf16>
    tpu.vector_store %arg12[%c160, %c0_59], %78 {strides = array<i32>} : memref<256x256xbf16, #tpu.memory_space<vmem>>, vector<16x128xbf16>,
    %80 = vector.extract_strided_slice %37 {offsets = [16, 10], sizes = [16, 128], strides = [1, 1]} : vector<32x256xbf16> to vector<16x128xbf16>
    %c160_60 = arith.constant 160 : index
    %c128_61 = arith.constant 128 : index
    %81 = vector.load %arg12[%c160_60, %c128_61] : memref<256x256xbf16, #tpu.memory_space<vmem>>, vector<16x128xbf16>
    tpu.vector_store %arg12[%c160_60, %c128_61], %80 {strides = array<i32>} : memref<256x256xbf16, #tpu.memory_space<vmem>>, vector<16x128xbf16>,
    %82 = vector.extract_strided_slice %37 {offsets = [0, 11], sizes = [16, 128], strides = [1, 1]} : vector<32x256xbf16> to vector<16x128xbf16>
    %c176 = arith.constant 176 : index
    %c0_62 = arith.constant 0 : index
    %83 = vector.load %arg12[%c176, %c0_62] : memref<256x256xbf16, #tpu.memory_space<vmem>>, vector<16x128xbf16>
    tpu.vector_store %arg12[%c176, %c0_62], %82 {strides = array<i32>} : memref<256x256xbf16, #tpu.memory_space<vmem>>, vector<16x128xbf16>,
    %84 = vector.extract_strided_slice %37 {offsets = [16, 11], sizes = [16, 128], strides = [1, 1]} : vector<32x256xbf16> to vector<16x128xbf16>
    %c176_63 = arith.constant 176 : index
    %c128_64 = arith.constant 128 : index
    %85 = vector.load %arg12[%c176_63, %c128_64] : memref<256x256xbf16, #tpu.memory_space<vmem>>, vector<16x128xbf16>
    tpu.vector_store %arg12[%c176_63, %c128_64], %84 {strides = array<i32>} : memref<256x256xbf16, #tpu.memory_space<vmem>>, vector<16x128xbf16>,
    %86 = vector.extract_strided_slice %37 {offsets = [0, 12], sizes = [16, 128], strides = [1, 1]} : vector<32x256xbf16> to vector<16x128xbf16>
    %c192 = arith.constant 192 : index
    %c0_65 = arith.constant 0 : index
    %87 = vector.load %arg12[%c192, %c0_65] : memref<256x256xbf16, #tpu.memory_space<vmem>>, vector<16x128xbf16>
    tpu.vector_store %arg12[%c192, %c0_65], %86 {strides = array<i32>} : memref<256x256xbf16, #tpu.memory_space<vmem>>, vector<16x128xbf16>,
    %88 = vector.extract_strided_slice %37 {offsets = [16, 12], sizes = [16, 128], strides = [1, 1]} : vector<32x256xbf16> to vector<16x128xbf16>
    %c192_66 = arith.constant 192 : index
    %c128_67 = arith.constant 128 : index
    %89 = vector.load %arg12[%c192_66, %c128_67] : memref<256x256xbf16, #tpu.memory_space<vmem>>, vector<16x128xbf16>
    tpu.vector_store %arg12[%c192_66, %c128_67], %88 {strides = array<i32>} : memref<256x256xbf16, #tpu.memory_space<vmem>>, vector<16x128xbf16>,
    %90 = vector.extract_strided_slice %37 {offsets = [0, 13], sizes = [16, 128], strides = [1, 1]} : vector<32x256xbf16> to vector<16x128xbf16>
    %c208 = arith.constant 208 : index
    %c0_68 = arith.constant 0 : index
    %91 = vector.load %arg12[%c208, %c0_68] : memref<256x256xbf16, #tpu.memory_space<vmem>>, vector<16x128xbf16>
    tpu.vector_store %arg12[%c208, %c0_68], %90 {strides = array<i32>} : memref<256x256xbf16, #tpu.memory_space<vmem>>, vector<16x128xbf16>,
    %92 = vector.extract_strided_slice %37 {offsets = [16, 13], sizes = [16, 128], strides = [1, 1]} : vector<32x256xbf16> to vector<16x128xbf16>
    %c208_69 = arith.constant 208 : index
    %c128_70 = arith.constant 128 : index
    %93 = vector.load %arg12[%c208_69, %c128_70] : memref<256x256xbf16, #tpu.memory_space<vmem>>, vector<16x128xbf16>
    tpu.vector_store %arg12[%c208_69, %c128_70], %92 {strides = array<i32>} : memref<256x256xbf16, #tpu.memory_space<vmem>>, vector<16x128xbf16>,
    %94 = vector.extract_strided_slice %37 {offsets = [0, 14], sizes = [16, 128], strides = [1, 1]} : vector<32x256xbf16> to vector<16x128xbf16>
    %c224 = arith.constant 224 : index
    %c0_71 = arith.constant 0 : index
    %95 = vector.load %arg12[%c224, %c0_71] : memref<256x256xbf16, #tpu.memory_space<vmem>>, vector<16x128xbf16>
    tpu.vector_store %arg12[%c224, %c0_71], %94 {strides = array<i32>} : memref<256x256xbf16, #tpu.memory_space<vmem>>, vector<16x128xbf16>,
    %96 = vector.extract_strided_slice %37 {offsets = [16, 14], sizes = [16, 128], strides = [1, 1]} : vector<32x256xbf16> to vector<16x128xbf16>
    %c224_72 = arith.constant 224 : index
    %c128_73 = arith.constant 128 : index
    %97 = vector.load %arg12[%c224_72, %c128_73] : memref<256x256xbf16, #tpu.memory_space<vmem>>, vector<16x128xbf16>
    tpu.vector_store %arg12[%c224_72, %c128_73], %96 {strides = array<i32>} : memref<256x256xbf16, #tpu.memory_space<vmem>>, vector<16x128xbf16>,
    %98 = vector.extract_strided_slice %37 {offsets = [0, 15], sizes = [16, 128], strides = [1, 1]} : vector<32x256xbf16> to vector<16x128xbf16>
    %c240 = arith.constant 240 : index
    %c0_74 = arith.constant 0 : index
    %99 = vector.load %arg12[%c240, %c0_74] : memref<256x256xbf16, #tpu.memory_space<vmem>>, vector<16x128xbf16>
    tpu.vector_store %arg12[%c240, %c0_74], %98 {strides = array<i32>} : memref<256x256xbf16, #tpu.memory_space<vmem>>, vector<16x128xbf16>,
    %100 = vector.extract_strided_slice %37 {offsets = [16, 15], sizes = [16, 128], strides = [1, 1]} : vector<32x256xbf16> to vector<16x128xbf16>
    %c240_75 = arith.constant 240 : index
    %c128_76 = arith.constant 128 : index
    %101 = vector.load %arg12[%c240_75, %c128_76] : memref<256x256xbf16, #tpu.memory_space<vmem>>, vector<16x128xbf16>
    tpu.vector_store %arg12[%c240_75, %c128_76], %100 {strides = array<i32>} : memref<256x256xbf16, #tpu.memory_space<vmem>>, vector<16x128xbf16>,
    %c0_77 = arith.constant 0 : index
    %c0_78 = arith.constant 0 : index
    %102 = vector.load %arg5[%c0_77, %c0_78] : memref<16x256xbf16, #tpu.memory_space<vmem>>, vector<16x256xbf16>
    %c0_79 = arith.constant 0 : index
    %c0_80 = arith.constant 0 : index
    %103 = vector.load %arg12[%c0_79, %c0_80] : memref<256x256xbf16, #tpu.memory_space<vmem>>, vector<256x256xbf16>
    %cst_81 = arith.constant dense<0.000000e+00> : vector<16x256xf32>
    %104 = tpu.matmul %102, %103, %cst_81 {dimension_numbers = #tpu.dot_dimension_numbers<[1], [0], [0], [1], [0, 0, 1, 1], [], []>} : vector<16x256xbf16>, vector<256x256xbf16>, vector<16x256xf32> -> vector<16x256xf32>
    %c0_82 = arith.constant 0 : index
    %c0_83 = arith.constant 0 : index
    %105 = vector.load %arg6[%c0_82, %c0_83] : memref<16x1xf32, #tpu.memory_space<vmem>>, vector<16x1xf32>
    %106 = vector.broadcast %105 : vector<16x1xf32> to vector<16x256xf32>
    %107 = arith.addf %104, %106 : vector<16x256xf32>
    %cst_84 = arith.constant 0.000000e+00 : f32
    %108 = vector.broadcast %cst_84 : f32 to vector<16x256xf32>
    %109 = arith.cmpf ogt, %107, %108 : vector<16x256xf32>
    %cst_85 = arith.constant 0.000000e+00 : f32
    %110 = vector.broadcast %cst_85 : f32 to vector<16x256xf32>
    %111 = arith.minimumf %107, %110 : vector<16x256xf32>
    %112 = math.exp %111 : vector<16x256xf32>
    %cst_86 = arith.constant 1.000000e+00 : f32
    %113 = vector.broadcast %cst_86 : f32 to vector<16x256xf32>
    %114 = arith.subf %112, %113 : vector<16x256xf32>
    %115 = arith.select %109, %107, %114 : vector<16x256xi1>, vector<16x256xf32>
    %116 = vector.extract_strided_slice %115 {offsets = [0, 0], sizes = [16, 128], strides = [1, 1]} : vector<16x256xf32> to vector<16x128xf32>
    %c0_87 = arith.constant 0 : index
    %c0_88 = arith.constant 0 : index
    %117 = vector.load %arg9[%c0_87, %c0_88] : memref<1x128xf32, #tpu.memory_space<vmem>>, vector<1x128xf32>
    %c0_89 = arith.constant 0 : index
    %c0_90 = arith.constant 0 : index
    %c0_91 = arith.constant 0 : index
    %118 = vector.load %arg7[%c0_89, %c0_90, %c0_91] : memref<4x16x128xf32, #tpu.memory_space<vmem>>, vector<1x16x128xf32>
    %119 = vector.shape_cast %118 : vector<1x16x128xf32> to vector<16x128xf32>
    %120 = arith.mulf %116, %119 : vector<16x128xf32>
    %cst_92 = arith.constant dense<0.000000e+00> : vector<16xf32>
    %121 = vector.multi_reduction <add>, %120, %cst_92 [1] : vector<16x128xf32> to vector<16xf32>
    %122 = vector.shape_cast %121 : vector<16xf32> to vector<16x1xf32>
    %cst_93 = arith.constant dense<0.000000e+00> : vector<1xf32>
    %123 = vector.multi_reduction <add>, %122, %cst_93 [0] : vector<16x1xf32> to vector<1xf32>
    %124 = vector.shape_cast %123 : vector<1xf32> to vector<1x1xf32>
    %c0_94 = arith.constant 0 : index
    %c0_95 = arith.constant 0 : index
    %125 = vector.load %arg8[%c0_94, %c0_95] : memref<4x128xf32, #tpu.memory_space<vmem>>, vector<1x128xf32>
    %126 = vector.broadcast %124 : vector<1x1xf32> to vector<1x128xf32>
    %127 = arith.mulf %126, %125 : vector<1x128xf32>
    %128 = arith.addf %117, %127 : vector<1x128xf32>
    %c1_96 = arith.constant 1 : index
    %c0_97 = arith.constant 0 : index
    %c0_98 = arith.constant 0 : index
    %129 = vector.load %arg7[%c1_96, %c0_97, %c0_98] : memref<4x16x128xf32, #tpu.memory_space<vmem>>, vector<1x16x128xf32>
    %130 = vector.shape_cast %129 : vector<1x16x128xf32> to vector<16x128xf32>
    %131 = arith.mulf %116, %130 : vector<16x128xf32>
    %cst_99 = arith.constant dense<0.000000e+00> : vector<16xf32>
    %132 = vector.multi_reduction <add>, %131, %cst_99 [1] : vector<16x128xf32> to vector<16xf32>
    %133 = vector.shape_cast %132 : vector<16xf32> to vector<16x1xf32>
    %cst_100 = arith.constant dense<0.000000e+00> : vector<1xf32>
    %134 = vector.multi_reduction <add>, %133, %cst_100 [0] : vector<16x1xf32> to vector<1xf32>
    %135 = vector.shape_cast %134 : vector<1xf32> to vector<1x1xf32>
    %c1_101 = arith.constant 1 : index
    %c0_102 = arith.constant 0 : index
    %136 = vector.load %arg8[%c1_101, %c0_102] : memref<4x128xf32, #tpu.memory_space<vmem>>, vector<1x128xf32>
    %137 = vector.broadcast %135 : vector<1x1xf32> to vector<1x128xf32>
    %138 = arith.mulf %137, %136 : vector<1x128xf32>
    %139 = arith.addf %128, %138 : vector<1x128xf32>
    %c2 = arith.constant 2 : index
    %c0_103 = arith.constant 0 : index
    %c0_104 = arith.constant 0 : index
    %140 = vector.load %arg7[%c2, %c0_103, %c0_104] : memref<4x16x128xf32, #tpu.memory_space<vmem>>, vector<1x16x128xf32>
    %141 = vector.shape_cast %140 : vector<1x16x128xf32> to vector<16x128xf32>
    %142 = arith.mulf %116, %141 : vector<16x128xf32>
    %cst_105 = arith.constant dense<0.000000e+00> : vector<16xf32>
    %143 = vector.multi_reduction <add>, %142, %cst_105 [1] : vector<16x128xf32> to vector<16xf32>
    %144 = vector.shape_cast %143 : vector<16xf32> to vector<16x1xf32>
    %cst_106 = arith.constant dense<0.000000e+00> : vector<1xf32>
    %145 = vector.multi_reduction <add>, %144, %cst_106 [0] : vector<16x1xf32> to vector<1xf32>
    %146 = vector.shape_cast %145 : vector<1xf32> to vector<1x1xf32>
    %c2_107 = arith.constant 2 : index
    %c0_108 = arith.constant 0 : index
    %147 = vector.load %arg8[%c2_107, %c0_108] : memref<4x128xf32, #tpu.memory_space<vmem>>, vector<1x128xf32>
    %148 = vector.broadcast %146 : vector<1x1xf32> to vector<1x128xf32>
    %149 = arith.mulf %148, %147 : vector<1x128xf32>
    %150 = arith.addf %139, %149 : vector<1x128xf32>
    %c3 = arith.constant 3 : index
    %c0_109 = arith.constant 0 : index
    %c0_110 = arith.constant 0 : index
    %151 = vector.load %arg7[%c3, %c0_109, %c0_110] : memref<4x16x128xf32, #tpu.memory_space<vmem>>, vector<1x16x128xf32>
    %152 = vector.shape_cast %151 : vector<1x16x128xf32> to vector<16x128xf32>
    %153 = arith.mulf %116, %152 : vector<16x128xf32>
    %cst_111 = arith.constant dense<0.000000e+00> : vector<16xf32>
    %154 = vector.multi_reduction <add>, %153, %cst_111 [1] : vector<16x128xf32> to vector<16xf32>
    %155 = vector.shape_cast %154 : vector<16xf32> to vector<16x1xf32>
    %cst_112 = arith.constant dense<0.000000e+00> : vector<1xf32>
    %156 = vector.multi_reduction <add>, %155, %cst_112 [0] : vector<16x1xf32> to vector<1xf32>
    %157 = vector.shape_cast %156 : vector<1xf32> to vector<1x1xf32>
    %c3_113 = arith.constant 3 : index
    %c0_114 = arith.constant 0 : index
    %158 = vector.load %arg8[%c3_113, %c0_114] : memref<4x128xf32, #tpu.memory_space<vmem>>, vector<1x128xf32>
    %159 = vector.broadcast %157 : vector<1x1xf32> to vector<1x128xf32>
    %160 = arith.mulf %159, %158 : vector<1x128xf32>
    %161 = arith.addf %150, %160 : vector<1x128xf32>
    %c0_115 = arith.constant 0 : index
    %c0_116 = arith.constant 0 : index
    %162 = vector.load %arg10[%c0_115, %c0_116] : memref<2x128xf32, #tpu.memory_space<vmem>>, vector<1x128xf32>
    tpu.vector_store %arg10[%c0_115, %c0_116], %161 {strides = array<i32>} : memref<2x128xf32, #tpu.memory_space<vmem>>, vector<1x128xf32>,
    %163 = vector.extract_strided_slice %115 {offsets = [0, 128], sizes = [16, 128], strides = [1, 1]} : vector<16x256xf32> to vector<16x128xf32>
    %c0_117 = arith.constant 0 : index
    %c0_118 = arith.constant 0 : index
    %164 = vector.load %arg9[%c0_117, %c0_118] : memref<1x128xf32, #tpu.memory_space<vmem>>, vector<1x128xf32>
    %c0_119 = arith.constant 0 : index
    %c0_120 = arith.constant 0 : index
    %c0_121 = arith.constant 0 : index
    %165 = vector.load %arg7[%c0_119, %c0_120, %c0_121] : memref<4x16x128xf32, #tpu.memory_space<vmem>>, vector<1x16x128xf32>
    %166 = vector.shape_cast %165 : vector<1x16x128xf32> to vector<16x128xf32>
    %167 = arith.mulf %163, %166 : vector<16x128xf32>
    %cst_122 = arith.constant dense<0.000000e+00> : vector<16xf32>
    %168 = vector.multi_reduction <add>, %167, %cst_122 [1] : vector<16x128xf32> to vector<16xf32>
    %169 = vector.shape_cast %168 : vector<16xf32> to vector<16x1xf32>
    %cst_123 = arith.constant dense<0.000000e+00> : vector<1xf32>
    %170 = vector.multi_reduction <add>, %169, %cst_123 [0] : vector<16x1xf32> to vector<1xf32>
    %171 = vector.shape_cast %170 : vector<1xf32> to vector<1x1xf32>
    %c0_124 = arith.constant 0 : index
    %c0_125 = arith.constant 0 : index
    %172 = vector.load %arg8[%c0_124, %c0_125] : memref<4x128xf32, #tpu.memory_space<vmem>>, vector<1x128xf32>
    %173 = vector.broadcast %171 : vector<1x1xf32> to vector<1x128xf32>
    %174 = arith.mulf %173, %172 : vector<1x128xf32>
    %175 = arith.addf %164, %174 : vector<1x128xf32>
    %c1_126 = arith.constant 1 : index
    %c0_127 = arith.constant 0 : index
    %c0_128 = arith.constant 0 : index
    %176 = vector.load %arg7[%c1_126, %c0_127, %c0_128] : memref<4x16x128xf32, #tpu.memory_space<vmem>>, vector<1x16x128xf32>
    %177 = vector.shape_cast %176 : vector<1x16x128xf32> to vector<16x128xf32>
    %178 = arith.mulf %163, %177 : vector<16x128xf32>
    %cst_129 = arith.constant dense<0.000000e+00> : vector<16xf32>
    %179 = vector.multi_reduction <add>, %178, %cst_129 [1] : vector<16x128xf32> to vector<16xf32>
    %180 = vector.shape_cast %179 : vector<16xf32> to vector<16x1xf32>
    %cst_130 = arith.constant dense<0.000000e+00> : vector<1xf32>
    %181 = vector.multi_reduction <add>, %180, %cst_130 [0] : vector<16x1xf32> to vector<1xf32>
    %182 = vector.shape_cast %181 : vector<1xf32> to vector<1x1xf32>
    %c1_131 = arith.constant 1 : index
    %c0_132 = arith.constant 0 : index
    %183 = vector.load %arg8[%c1_131, %c0_132] : memref<4x128xf32, #tpu.memory_space<vmem>>, vector<1x128xf32>
    %184 = vector.broadcast %182 : vector<1x1xf32> to vector<1x128xf32>
    %185 = arith.mulf %184, %183 : vector<1x128xf32>
    %186 = arith.addf %175, %185 : vector<1x128xf32>
    %c2_133 = arith.constant 2 : index
    %c0_134 = arith.constant 0 : index
    %c0_135 = arith.constant 0 : index
    %187 = vector.load %arg7[%c2_133, %c0_134, %c0_135] : memref<4x16x128xf32, #tpu.memory_space<vmem>>, vector<1x16x128xf32>
    %188 = vector.shape_cast %187 : vector<1x16x128xf32> to vector<16x128xf32>
    %189 = arith.mulf %163, %188 : vector<16x128xf32>
    %cst_136 = arith.constant dense<0.000000e+00> : vector<16xf32>
    %190 = vector.multi_reduction <add>, %189, %cst_136 [1] : vector<16x128xf32> to vector<16xf32>
    %191 = vector.shape_cast %190 : vector<16xf32> to vector<16x1xf32>
    %cst_137 = arith.constant dense<0.000000e+00> : vector<1xf32>
    %192 = vector.multi_reduction <add>, %191, %cst_137 [0] : vector<16x1xf32> to vector<1xf32>
    %193 = vector.shape_cast %192 : vector<1xf32> to vector<1x1xf32>
    %c2_138 = arith.constant 2 : index
    %c0_139 = arith.constant 0 : index
    %194 = vector.load %arg8[%c2_138, %c0_139] : memref<4x128xf32, #tpu.memory_space<vmem>>, vector<1x128xf32>
    %195 = vector.broadcast %193 : vector<1x1xf32> to vector<1x128xf32>
    %196 = arith.mulf %195, %194 : vector<1x128xf32>
    %197 = arith.addf %186, %196 : vector<1x128xf32>
    %c3_140 = arith.constant 3 : index
    %c0_141 = arith.constant 0 : index
    %c0_142 = arith.constant 0 : index
    %198 = vector.load %arg7[%c3_140, %c0_141, %c0_142] : memref<4x16x128xf32, #tpu.memory_space<vmem>>, vector<1x16x128xf32>
    %199 = vector.shape_cast %198 : vector<1x16x128xf32> to vector<16x128xf32>
    %200 = arith.mulf %163, %199 : vector<16x128xf32>
    %cst_143 = arith.constant dense<0.000000e+00> : vector<16xf32>
    %201 = vector.multi_reduction <add>, %200, %cst_143 [1] : vector<16x128xf32> to vector<16xf32>
    %202 = vector.shape_cast %201 : vector<16xf32> to vector<16x1xf32>
    %cst_144 = arith.constant dense<0.000000e+00> : vector<1xf32>
    %203 = vector.multi_reduction <add>, %202, %cst_144 [0] : vector<16x1xf32> to vector<1xf32>
    %204 = vector.shape_cast %203 : vector<1xf32> to vector<1x1xf32>
    %c3_145 = arith.constant 3 : index
    %c0_146 = arith.constant 0 : index
    %205 = vector.load %arg8[%c3_145, %c0_146] : memref<4x128xf32, #tpu.memory_space<vmem>>, vector<1x128xf32>
    %206 = vector.broadcast %204 : vector<1x1xf32> to vector<1x128xf32>
    %207 = arith.mulf %206, %205 : vector<1x128xf32>
    %208 = arith.addf %197, %207 : vector<1x128xf32>
    %c1_147 = arith.constant 1 : index
    %c0_148 = arith.constant 0 : index
    %209 = vector.load %arg10[%c1_147, %c0_148] : memref<2x128xf32, #tpu.memory_space<vmem>>, vector<1x128xf32>
    tpu.vector_store %arg10[%c1_147, %c0_148], %208 {strides = array<i32>} : memref<2x128xf32, #tpu.memory_space<vmem>>, vector<1x128xf32>,
    return
  }
  func.func @transform_0(%arg0: i32) -> (i32, i32, i32) {
    %c0_i32 = arith.constant 0 : i32
    %c0_i32_0 = arith.constant 0 : i32
    %c0_i32_1 = arith.constant 0 : i32
    %c0_i32_2 = arith.constant 0 : i32
    return %c0_i32, %c0_i32_0, %c0_i32_1 : i32, i32, i32
  }
  func.func @transform_1(%arg0: i32) -> (i32, i32) {
    %c0_i32 = arith.constant 0 : i32
    %c0_i32_0 = arith.constant 0 : i32
    %c0_i32_1 = arith.constant 0 : i32
    return %c0_i32, %c0_i32_0 : i32, i32
  }
  func.func @transform_2(%arg0: i32) -> (i32, i32) {
    %c0_i32 = arith.constant 0 : i32
    %c0_i32_0 = arith.constant 0 : i32
    %c0_i32_1 = arith.constant 0 : i32
    return %c0_i32, %c0_i32_0 : i32, i32
  }
  func.func @transform_3(%arg0: i32) -> (i32, i32) {
    %c0_i32 = arith.constant 0 : i32
    %c0_i32_0 = arith.constant 0 : i32
    %c0_i32_1 = arith.constant 0 : i32
    return %c0_i32, %c0_i32_0 : i32, i32
  }
  func.func @transform_4(%arg0: i32) -> (i32, i32) {
    %c0_i32 = arith.constant 0 : i32
    %c0_i32_0 = arith.constant 0 : i32
    %c0_i32_1 = arith.constant 0 : i32
    return %c0_i32, %c0_i32_0 : i32, i32
  }
  func.func @transform_5(%arg0: i32) -> (i32, i32) {
    %c0_i32 = arith.constant 0 : i32
    %c0_i32_0 = arith.constant 0 : i32
    %c0_i32_1 = arith.constant 0 : i32
    return %c0_i32, %c0_i32_0 : i32, i32
  }
  func.func @transform_6(%arg0: i32) -> (i32, i32, i32) {
    %c0_i32 = arith.constant 0 : i32
    %c0_i32_0 = arith.constant 0 : i32
    %c0_i32_1 = arith.constant 0 : i32
    %c0_i32_2 = arith.constant 0 : i32
    return %c0_i32, %c0_i32_0, %c0_i32_1 : i32, i32, i32
  }
  func.func @transform_7(%arg0: i32) -> (i32, i32) {
    %c0_i32 = arith.constant 0 : i32
    %c0_i32_0 = arith.constant 0 : i32
    %c0_i32_1 = arith.constant 0 : i32
    return %c0_i32, %c0_i32_0 : i32, i32
  }
  func.func @transform_8(%arg0: i32) -> (i32, i32) {
    %c0_i32 = arith.constant 0 : i32
    %c0_i32_0 = arith.constant 0 : i32
    %c0_i32_1 = arith.constant 0 : i32
    return %c0_i32, %c0_i32_0 : i32, i32
  }
  func.func @transform_9(%arg0: i32) -> (i32, i32) {
    %c0_i32 = arith.constant 0 : i32
    %c0_i32_0 = arith.constant 0 : i32
    %c0_i32_1 = arith.constant 0 : i32
    return %c0_i32, %c0_i32_0 : i32, i32
  }
}

</mosaic_0001>

<bundles_post_ra>
// kernel: cnn_forward.1
= control target key start
LH: loop header
LB: loop body
LE: loop exit
PB: predicated region body
PF: predicated region fallthrough
CT: control target
= control target key end

     0   :  { %v4274_v8 = vmov 0   ;;  %s5581_s0 = inlined_call_operand.vmem [shape: bf16[2,128,1024], index: 0, kind: input, shape index: {}]   ;;  %s5582_s1 = inlined_call_operand.vmem [shape: bf16[16,128], index: 1, kind: input, shape index: {}]   ;;  %s5583_s2 = inlined_call_operand.vmem [shape: f32[16,1], index: 2, kind: input, shape index: {}]   ;;  %s5584_s3 = inlined_call_operand.vmem [shape: bf16[1024,256], index: 3, kind: input, shape index: {}]   ;;  %s5585_s4 = inlined_call_operand.vmem [shape: bf16[16,256], index: 4, kind: input, shape index: {}]   ;;  %s5586_s5 = inlined_call_operand.vmem [shape: f32[16,1], index: 5, kind: input, shape index: {}]   ;;  %s5587_s6 = inlined_call_operand.vmem [shape: f32[4,16,128], index: 6, kind: input, shape index: {}]   ;;  %s5588_s7 = inlined_call_operand.vmem [shape: f32[4,128], index: 7, kind: input, shape index: {}]   ;;  %s5589_s8 = inlined_call_operand.vmem [shape: f32[1,128], index: 8, kind: input, shape index: {}]   ;;  %s5590_s9 = inlined_call_operand.hbm [shape: f32[2,128], index: 9, kind: output, shape index: {}]  }
   0x1   :  { %v92_v0 = vld [vmem:[%s5581_s0 + $0x1c0] sm:$0xff]  ;;  %v94_v2 = vld [vmem:[%s5581_s0 + $0x1d0] sm:$0xff]  ;;  %470 = vmatprep.mubr.bf16.mxu1 %v4274_v8  ;;  %556 = vmatprep.mubr.bf16.mxu0 %v4274_v8  ;;  %v93_v63 = vld [vmem:[%s5581_s0 + $0x1c8] sm:$0xff] }
   0x2   :  { %v96_v1 = vld [vmem:[%s5581_s0 + $0x1e0] sm:$0xff]  ;;  %v98_v4 = vld [vmem:[%s5581_s0 + $0x1f0] sm:$0xff]  ;;  %3934 = vset.pattern.permute.xlu0 %v4274_v8  ;;  %3935 = vset.pattern.permute.xlu1 %v4274_v8 }
   0x3   :  { %v3480_v3 = vcombine.high %v92_v0, %v96_v1  ;;  %v3479_v5 = vcombine.low %v92_v0, %v96_v1  ;;  %v84_v6 = vld [vmem:[%s5581_s0 + $0x180] sm:$0xff]  ;;  %v3484_v9 = vcombine.high %v94_v2, %v98_v4  ;;  %v3483_v10 = vcombine.low %v94_v2, %v98_v4  ;;  %v86_v12 = vld [vmem:[%s5581_s0 + $0x190] sm:$0xff]  ;;  %v97_v0 = vld [vmem:[%s5581_s0 + $0x1e8] sm:$0xff] }
   0x4   :  { %v88_v7 = vld [vmem:[%s5581_s0 + $0x1a0] sm:$0xff]  ;;  %v90_v13 = vld [vmem:[%s5581_s0 + $0x1b0] sm:$0xff] }
   0x5   :  { %v3472_v11 = vcombine.high %v84_v6, %v88_v7  ;;  %v76_v14 = vld [vmem:[%s5581_s0 + $0x140] sm:$0xff]  ;;  %438 = vmatprep.subr.bf16.mxu1 %v3480_v3  ;;  %v3476_v15 = vcombine.high %v86_v12, %v90_v13  ;;  %v78_v17 = vld [vmem:[%s5581_s0 + $0x150] sm:$0xff]  ;;  %524 = vmatprep.subr.bf16.mxu0 %v3484_v9  ;;  %v3471_v19 = vcombine.low %v84_v6, %v88_v7  ;;  %v85_v7 = vld [vmem:[%s5581_s0 + $0x188] sm:$0xff] }
   0x6   :  { %v80_v16 = vld [vmem:[%s5581_s0 + $0x160] sm:$0xff]  ;;  %v82_v18 = vld [vmem:[%s5581_s0 + $0x170] sm:$0xff]  ;;  %439 = vmatpush1.bf16.msra.mxu1 %v3479_v5  ;;  %525 = vmatpush1.bf16.msra.mxu0 %v3483_v10  ;;  %v3475_v20 = vcombine.low %v86_v12, %v90_v13  ;;  %v3482_v5 = vcombine.high %v93_v63, %v97_v0  ;;  %v89_v9 = vld [vmem:[%s5581_s0 + $0x1a8] sm:$0xff]  ;;  %v3481_v13 = vcombine.low %v93_v63, %v97_v0 }
   0x7   :  { %440 = vmatprep.subr.bf16.mxu1 %v3472_v11  ;;  %v3464_v21 = vcombine.high %v76_v14, %v80_v16  ;;  %526 = vmatprep.subr.bf16.mxu0 %v3476_v15  ;;  %v3468_v22 = vcombine.high %v78_v17, %v82_v18  ;;  %v68_v23 = vld [vmem:[%s5581_s0 + $0x100] sm:$0xff]  ;;  %v70_v25 = vld [vmem:[%s5581_s0 + $0x110] sm:$0xff]  ;;  %v3463_v27 = vcombine.low %v76_v14, %v80_v16  ;;  %v95_v0 = vld [vmem:[%s5581_s0 + $0x1d8] sm:$0xff] }
   0x8   :  { %v72_v24 = vld [vmem:[%s5581_s0 + $0x120] sm:$0xff]  ;;  %v74_v26 = vld [vmem:[%s5581_s0 + $0x130] sm:$0xff]  ;;  %v3467_v28 = vcombine.low %v78_v17, %v82_v18  ;;  %v3474_v15 = vcombine.high %v85_v7, %v89_v9  ;;  %v77_v17 = vld [vmem:[%s5581_s0 + $0x148] sm:$0xff] }
   0x9   :  { %v3456_v29 = vcombine.high %v68_v23, %v72_v24  ;;  %v3460_v30 = vcombine.high %v70_v25, %v74_v26  ;;  %v60_v31 = vld [vmem:[%s5581_s0 + $0xc0] sm:$0xff]  ;;  %v62_v33 = vld [vmem:[%s5581_s0 + $0xd0] sm:$0xff]  ;;  %v3455_v35 = vcombine.low %v68_v23, %v72_v24  ;;  %v3459_v36 = vcombine.low %v70_v25, %v74_v26  ;;  %v81_v18 = vld [vmem:[%s5581_s0 + $0x168] sm:$0xff] }
   0xa   :  { %441 = vmatpush1.bf16.msra.mxu1 %v3471_v19  ;;  %527 = vmatpush1.bf16.msra.mxu0 %v3475_v20  ;;  %v64_v32 = vld [vmem:[%s5581_s0 + $0xe0] sm:$0xff]  ;;  %v66_v34 = vld [vmem:[%s5581_s0 + $0xf0] sm:$0xff]  ;;  %v3466_v24 = vcombine.high %v77_v17, %v81_v18  ;;  %v69_v26 = vld [vmem:[%s5581_s0 + $0x108] sm:$0xff] }
   0xb   :  { %442 = vmatprep.subr.bf16.mxu1 %v3464_v21  ;;  %528 = vmatprep.subr.bf16.mxu0 %v3468_v22  ;;  %v3448_v37 = vcombine.high %v60_v31, %v64_v32  ;;  %v3452_v38 = vcombine.high %v62_v33, %v66_v34  ;;  %v52_v39 = vld [vmem:[%s5581_s0 + $0x80] sm:$0xff]  ;;  %v54_v41 = vld [vmem:[%s5581_s0 + $0x90] sm:$0xff]  ;;  %v3447_v43 = vcombine.low %v60_v31, %v64_v32  ;;  %v101_v31 = vld [vmem:[%s5583_s2 + $0x8] sm:$0xff] }
   0xc   :  { %v56_v40 = vld [vmem:[%s5581_s0 + $0xa0] sm:$0xff]  ;;  %v58_v42 = vld [vmem:[%s5581_s0 + $0xb0] sm:$0xff]  ;;  %v3451_v44 = vcombine.low %v62_v33, %v66_v34  ;;  %v3473_v21 = vcombine.low %v85_v7, %v89_v9  ;;  %v87_v9 = vld [vmem:[%s5581_s0 + $0x198] sm:$0xff] }
   0xd   :  { %v3440_v45 = vcombine.high %v52_v39, %v56_v40  ;;  %v3444_v46 = vcombine.high %v54_v41, %v58_v42  ;;  %v44_v47 = vld [vmem:[%s5581_s0 + $0x40] sm:$0xff]  ;;  %v46_v49 = vld [vmem:[%s5581_s0 + $0x50] sm:$0xff]  ;;  %v3439_v51 = vcombine.low %v52_v39, %v56_v40  ;;  %v3443_v52 = vcombine.low %v54_v41, %v58_v42 }
   0xe   :  { %443 = vmatpush1.bf16.msra.mxu1 %v3463_v27  ;;  %529 = vmatpush1.bf16.msra.mxu0 %v3467_v28  ;;  %v48_v48 = vld [vmem:[%s5581_s0 + $0x60] sm:$0xff]  ;;  %v50_v50 = vld [vmem:[%s5581_s0 + $0x70] sm:$0xff]  ;;  %v73_v27 = vld [vmem:[%s5581_s0 + $0x128] sm:$0xff] }
   0xf   :  { %444 = vmatprep.subr.bf16.mxu1 %v3456_v29  ;;  %530 = vmatprep.subr.bf16.mxu0 %v3460_v30  ;;  %v3432_v53 = vcombine.high %v44_v47, %v48_v48  ;;  %v3436_v54 = vcombine.high %v46_v49, %v50_v50  ;;  %v36_v55 = vld [vmem:[%s5581_s0] sm:$0xff]  ;;  %v38_v57 = vld [vmem:[%s5581_s0 + $0x10] sm:$0xff]  ;;  %v3431_v59 = vcombine.low %v44_v47, %v48_v48 }
  0x10   :  { %v40_v56 = vld [vmem:[%s5581_s0 + $0x20] sm:$0xff]  ;;  %v42_v58 = vld [vmem:[%s5581_s0 + $0x30] sm:$0xff]  ;;  %v3435_v60 = vcombine.low %v46_v49, %v50_v50  ;;  %v3465_v30 = vcombine.low %v77_v17, %v81_v18  ;;  %v3458_v33 = vcombine.high %v69_v26, %v73_v27  ;;  %v3457_v39 = vcombine.low %v69_v26, %v73_v27  ;;  %v71_v27 = vld [vmem:[%s5581_s0 + $0x118] sm:$0xff] }
  0x11   :  { %v3424_v61 = vcombine.high %v36_v55, %v40_v56  ;;  %v3428_v62 = vcombine.high %v38_v57, %v42_v58  ;;  %v3567_v1 = vld [vmem:[%s5581_s0 + $0x3c0] sm:$0xff]  ;;  %v3423_v3 = vcombine.low %v36_v55, %v40_v56  ;;  %v3427_v4 = vcombine.low %v38_v57, %v42_v58 }
  0x12   :  { %445 = vmatpush1.bf16.msra.mxu1 %v3455_v35  ;;  %531 = vmatpush1.bf16.msra.mxu0 %v3459_v36  ;;  %v3571_v2 = vld [vmem:[%s5581_s0 + $0x3e0] sm:$0xff]  ;;  %v61_v35 = vld [vmem:[%s5581_s0 + $0xc8] sm:$0xff] }
  0x13   :  { %446 = vmatprep.subr.bf16.mxu1 %v3448_v37  ;;  %532 = vmatprep.subr.bf16.mxu0 %v3452_v38  ;;  %v3633_v6 = vcombine.high %v3567_v1, %v3571_v2  ;;  %v4462_v10 = vld [vmem:[%s5582_s1] sm:$0xff]   ;;  %v3632_v14 = vcombine.low %v3567_v1, %v3571_v2  ;;  %v65_v36 = vld [vmem:[%s5581_s0 + $0xe8] sm:$0xff]  ;;  %v99_v1 = vld [vmem:[%s5581_s0 + $0x1f8] sm:$0xff] }
  0x14   :  { %v3559_v11 = vld [vmem:[%s5581_s0 + $0x380] sm:$0xff]  ;;  %v3450_v41 = vcombine.high %v61_v35, %v65_v36  ;;  %v3449_v47 = vcombine.low %v61_v35, %v65_v36  ;;  %v3485_v18 = vcombine.low %v95_v0, %v99_v1  ;;  %v63_v35 = vld [vmem:[%s5581_s0 + $0xd8] sm:$0xff] }
  0x15   :  { %v3563_v12 = vld [vmem:[%s5581_s0 + $0x3a0] sm:$0xff]  ;;  %v67_v36 = vld [vmem:[%s5581_s0 + $0xf8] sm:$0xff] }
  0x16   :  { %447 = vmatpush1.bf16.msra.mxu1 %v3447_v43  ;;  %533 = vmatpush1.bf16.msra.mxu0 %v3451_v44  ;;  %v3625_v16 = vcombine.high %v3559_v11, %v3563_v12  ;;  %v3551_v19 = vld [vmem:[%s5581_s0 + $0x340] sm:$0xff]  ;;  %v3624_v23 = vcombine.low %v3559_v11, %v3563_v12  ;;  %v53_v43 = vld [vmem:[%s5581_s0 + $0x88] sm:$0xff]  ;;  %v91_v11 = vld [vmem:[%s5581_s0 + $0x1b8] sm:$0xff] }
  0x17   :  { %448 = vmatprep.subr.bf16.mxu1 %v3440_v45  ;;  %534 = vmatprep.subr.bf16.mxu0 %v3444_v46  ;;  %v3555_v20 = vld [vmem:[%s5581_s0 + $0x360] sm:$0xff]  ;;  %v57_v44 = vld [vmem:[%s5581_s0 + $0xa8] sm:$0xff]  ;;  %v3477_v26 = vcombine.low %v87_v9, %v91_v11 }
  0x18   :  { %v100_v22 = vld [vmem:[%s5583_s2] sm:$0xff]  ;;  %v3617_v25 = vcombine.high %v3551_v19, %v3555_v20  ;;  %v3616_v32 = vcombine.low %v3551_v19, %v3555_v20  ;;  %v3442_v49 = vcombine.high %v53_v43, %v57_v44  ;;  %v3441_v55 = vcombine.low %v53_v43, %v57_v44  ;;  %v79_v19 = vld [vmem:[%s5581_s0 + $0x158] sm:$0xff] }
  0x19   :  { %v3543_v28 = vld [vmem:[%s5581_s0 + $0x300] sm:$0xff]  ;;  %104 = vperm.xlu0 %3934, %v100_v22   ;;  %833 = vperm.xlu1 %3935, %v100_v22   ;;  %v83_v20 = vld [vmem:[%s5581_s0 + $0x178] sm:$0xff] }
  0x1a   :  { %449 = vmatpush1.bf16.msra.mxu1 %v3439_v51  ;;  %535 = vmatpush1.bf16.msra.mxu0 %v3443_v52  ;;  %v3547_v29 = vld [vmem:[%s5581_s0 + $0x320] sm:$0xff]  ;;  %v45_v51 = vld [vmem:[%s5581_s0 + $0x48] sm:$0xff]  ;;  %v55_v43 = vld [vmem:[%s5581_s0 + $0x98] sm:$0xff] }
  0x1b   :  { %450 = vmatprep.subr.bf16.mxu1 %v3432_v53  ;;  %536 = vmatprep.subr.bf16.mxu0 %v3436_v54  ;;  %v3609_v34 = vcombine.high %v3543_v28, %v3547_v29  ;;  %v3535_v37 = vld [vmem:[%s5581_s0 + $0x2c0] sm:$0xff]  ;;  %v3608_v40 = vcombine.low %v3543_v28, %v3547_v29  ;;  %v49_v52 = vld [vmem:[%s5581_s0 + $0x68] sm:$0xff]  ;;  %v75_v28 = vld [vmem:[%s5581_s0 + $0x138] sm:$0xff]  ;;  %v3470_v29 = vcombine.high %v79_v19, %v83_v20 }
  0x1c   :  { %v3539_v38 = vld [vmem:[%s5581_s0 + $0x2e0] sm:$0xff]  ;;  %v3434_v57 = vcombine.high %v45_v51, %v49_v52  ;;  %v3433_v63 = vcombine.low %v45_v51, %v49_v52  ;;  %v59_v44 = vld [vmem:[%s5581_s0 + $0xb8] sm:$0xff] }
  0x1d   :  { %109 = vperm.xlu0 %3934, %v101_v31   ;;  %v3601_v42 = vcombine.high %v3535_v37, %v3539_v38  ;;  %838 = vperm.xlu1 %3935, %v101_v31   ;;  %v3527_v45 = vld [vmem:[%s5581_s0 + $0x280] sm:$0xff]  ;;  %v3600_v48 = vcombine.low %v3535_v37, %v3539_v38  ;;  %v3545_v31 = vld [vmem:[%s5581_s0 + $0x310] sm:$0xff]  ;;  %v3462_v37 = vcombine.high %v71_v27, %v75_v28  ;;  %v47_v51 = vld [vmem:[%s5581_s0 + $0x58] sm:$0xff] }
  0x1e   :  { %451 = vmatpush1.bf16.msra.mxu1 %v3431_v59  ;;  %537 = vmatpush1.bf16.msra.mxu0 %v3435_v60  ;;  %v3531_v46 = vld [vmem:[%s5581_s0 + $0x2a0] sm:$0xff]  ;;  %v37_v59 = vld [vmem:[%s5581_s0 + $0x8] sm:$0xff]  ;;  %v51_v52 = vld [vmem:[%s5581_s0 + $0x78] sm:$0xff] }
  0x1f   :  { %452 = vmatprep.subr.bf16.mxu1 %v3424_v61  ;;  %538 = vmatprep.subr.bf16.mxu0 %v3428_v62  ;;  %v3593_v50 = vcombine.high %v3527_v45, %v3531_v46  ;;  %v3519_v53 = vld [vmem:[%s5581_s0 + $0x240] sm:$0xff]  ;;  %v3592_v56 = vcombine.low %v3527_v45, %v3531_v46  ;;  %v41_v60 = vld [vmem:[%s5581_s0 + $0x28] sm:$0xff]  ;;  %v3454_v45 = vcombine.high %v63_v35, %v67_v36 }
  0x20   :  { %v3523_v54 = vld [vmem:[%s5581_s0 + $0x260] sm:$0xff]  ;;  %v3425_v7 = vcombine.low %v37_v59, %v41_v60 }
  0x21   :  { %v3585_v58 = vcombine.high %v3519_v53, %v3523_v54  ;;  %v3511_v61 = vld [vmem:[%s5581_s0 + $0x200] sm:$0xff]  ;;  %v3584_v2 = vcombine.low %v3519_v53, %v3523_v54  ;;  %v3446_v53 = vcombine.high %v55_v43, %v59_v44 }
  0x22   :  { %453 = vmatpush1.bf16.msra.mxu1 %v3423_v3  ;;  %539 = vmatpush1.bf16.msra.mxu0 %v3427_v4  ;;  %v3515_v62 = vld [vmem:[%s5581_s0 + $0x220] sm:$0xff]  ;;  %v3426_v3 = vcombine.high %v37_v59, %v41_v60  ;;  %v3569_v4 = vld [vmem:[%s5581_s0 + $0x3d0] sm:$0xff]  ;;  %v39_v59 = vld [vmem:[%s5581_s0 + $0x18] sm:$0xff] }
  0x23   :  { %481 = vmatprep.subr.bf16.mxu1 %v3482_v5  ;;  %1167 = vmatprep.subr.bf16.mxu0 %v3633_v6  ;;  %v3573_v5 = vld [vmem:[%s5581_s0 + $0x3f0] sm:$0xff]  ;;  %v3577_v6 = vcombine.high %v3511_v61, %v3515_v62  ;;  %v3576_v12 = vcombine.low %v3511_v61, %v3515_v62  ;;  %v43_v60 = vld [vmem:[%s5581_s0 + $0x38] sm:$0xff]  ;;  %v3438_v61 = vcombine.high %v47_v51, %v51_v52 }
  0x24   :  { %v3637_v17 = vcombine.high %v3569_v4, %v3573_v5  ;;  %v3636_v22 = vcombine.low %v3569_v4, %v3573_v5  ;;  %v3572_v4 = vld [vmem:[%s5581_s0 + $0x3e8] sm:$0xff]  ;;  %v3430_v5 = vcombine.high %v39_v59, %v43_v60 }
  0x25   :  { %471 = vmatmul.mubr.bf16.vlgmr.msra.gmra.mxu1 %v4462_v10  ;;  %557 = vmatmul.mubr.bf16.vlgmr.msra.gmra.mxu0 %v4462_v10 }
  0x26   :  { %482 = vmatpush1.bf16.msra.mxu1 %v3481_v13  ;;  %1168 = vmatpush1.bf16.msra.mxu0 %v3632_v14  ;;  %v3486_v13 = vcombine.high %v95_v0, %v99_v1  ;;  %v3561_v14 = vld [vmem:[%s5581_s0 + $0x390] sm:$0xff] }
  0x27   :  { %483 = vmatprep.subr.bf16.mxu1 %v3474_v15  ;;  %1169 = vmatprep.subr.bf16.mxu0 %v3625_v16  ;;  %v3565_v15 = vld [vmem:[%s5581_s0 + $0x3b0] sm:$0xff]  ;;  %v4579_v16 = vld [vmem:[%s5582_s1] sm:$0xff]  }
  0x28   :  { %513 = vmatprep.mubr.bf16.mxu1 %v4274_v8  ;;  %1199 = vmatprep.mubr.bf16.mxu0 %v4274_v8  ;;  %v3517_v0 = vld [vmem:[%s5581_s0 + $0x230] sm:$0xff] }
  0x2a   :  { %484 = vmatpush1.bf16.msra.mxu1 %v3473_v21  ;;  %1170 = vmatpush1.bf16.msra.mxu0 %v3624_v23  ;;  %v3478_v21 = vcombine.high %v87_v9, %v91_v11  ;;  %v3553_v23 = vld [vmem:[%s5581_s0 + $0x350] sm:$0xff]  ;;  %v3429_v9 = vcombine.low %v39_v59, %v43_v60  ;;  %v3560_v11 = vld [vmem:[%s5581_s0 + $0x388] sm:$0xff] }
  0x2b   :  { %485 = vmatprep.subr.bf16.mxu1 %v3466_v24  ;;  %1171 = vmatprep.subr.bf16.mxu0 %v3617_v25  ;;  %v3557_v24 = vld [vmem:[%s5581_s0 + $0x370] sm:$0xff]  ;;  %v3629_v25 = vcombine.high %v3561_v14, %v3565_v15 }
  0x2c   :  { %v3620_v38 = vcombine.low %v3553_v23, %v3557_v24 }
  0x2e   :  { %486 = vmatpush1.bf16.msra.mxu1 %v3465_v30  ;;  %1172 = vmatpush1.bf16.msra.mxu0 %v3616_v32  ;;  %v3628_v30 = vcombine.low %v3561_v14, %v3565_v15  ;;  %v3549_v32 = vld [vmem:[%s5581_s0 + $0x330] sm:$0xff]  ;;  %v3564_v14 = vld [vmem:[%s5581_s0 + $0x3a8] sm:$0xff] }
  0x2f   :  { %487 = vmatprep.subr.bf16.mxu1 %v3458_v33  ;;  %1173 = vmatprep.subr.bf16.mxu0 %v3609_v34  ;;  %v3621_v33 = vcombine.high %v3553_v23, %v3557_v24  ;;  %v3469_v34 = vcombine.low %v79_v19, %v83_v20  ;;  %v3612_v46 = vcombine.low %v3545_v31, %v3549_v32  ;;  %v3940_v15 = vld [vmem:[%s5584_s3 + $0x74] ss:$8 sps:$4 sm:$0xff]  }
  0x32   :  { %488 = vmatpush1.bf16.msra.mxu1 %v3457_v39  ;;  %1174 = vmatpush1.bf16.msra.mxu0 %v3608_v40  ;;  %v3537_v39 = vld [vmem:[%s5581_s0 + $0x2d0] sm:$0xff] }
  0x33   :  { %489 = vmatprep.subr.bf16.mxu1 %v3450_v41  ;;  %1175 = vmatprep.subr.bf16.mxu0 %v3601_v42  ;;  %v3541_v40 = vld [vmem:[%s5581_s0 + $0x2f0] sm:$0xff]  ;;  %v3613_v41 = vcombine.high %v3545_v31, %v3549_v32  ;;  %v3461_v42 = vcombine.low %v71_v27, %v75_v28 }
  0x34   :  { %v3604_v54 = vcombine.low %v3537_v39, %v3541_v40 }
  0x36   :  { %490 = vmatpush1.bf16.msra.mxu1 %v3449_v47  ;;  %1176 = vmatpush1.bf16.msra.mxu0 %v3600_v48  ;;  %v3529_v47 = vld [vmem:[%s5581_s0 + $0x290] sm:$0xff] }
  0x37   :  { %491 = vmatprep.subr.bf16.mxu1 %v3442_v49  ;;  %1177 = vmatprep.subr.bf16.mxu0 %v3593_v50  ;;  %v3533_v48 = vld [vmem:[%s5581_s0 + $0x2b0] sm:$0xff]  ;;  %v3605_v49 = vcombine.high %v3537_v39, %v3541_v40  ;;  %v3453_v50 = vcombine.low %v63_v35, %v67_v36 }
  0x38   :  { %v3596_v62 = vcombine.low %v3529_v47, %v3533_v48 }
  0x3a   :  { %492 = vmatpush1.bf16.msra.mxu1 %v3441_v55  ;;  %1178 = vmatpush1.bf16.msra.mxu0 %v3592_v56  ;;  %v3521_v55 = vld [vmem:[%s5581_s0 + $0x250] sm:$0xff] }
  0x3b   :  { %493 = vmatprep.subr.bf16.mxu1 %v3434_v57  ;;  %1179 = vmatprep.subr.bf16.mxu0 %v3585_v58  ;;  %v3525_v56 = vld [vmem:[%s5581_s0 + $0x270] sm:$0xff]  ;;  %v3597_v57 = vcombine.high %v3529_v47, %v3533_v48  ;;  %v3445_v58 = vcombine.low %v55_v43, %v59_v44 }
  0x3c   :  { %v3589_v1 = vcombine.high %v3521_v55, %v3525_v56 }
  0x3e   :  { %494 = vmatpush1.bf16.msra.mxu1 %v3433_v63  ;;  %1180 = vmatpush1.bf16.msra.mxu0 %v3584_v2  ;;  %v3513_v63 = vld [vmem:[%s5581_s0 + $0x210] sm:$0xff]  ;;  %v3437_v2 = vcombine.low %v47_v51, %v51_v52 }
  0x3f   :  { %495 = vmatprep.subr.bf16.mxu1 %v3426_v3  ;;  %1181 = vmatprep.subr.bf16.mxu0 %v3577_v6  ;;  %v3568_v3 = vld [vmem:[%s5581_s0 + $0x3c8] sm:$0xff]  ;;  %v3588_v6 = vcombine.low %v3521_v55, %v3525_v56 }
  0x42   :  { %496 = vmatpush1.bf16.msra.mxu1 %v3425_v7  ;;  %1182 = vmatpush1.bf16.msra.mxu0 %v3576_v12  ;;  %v3581_v7 = vcombine.high %v3513_v63, %v3517_v0  ;;  %v3635_v12 = vcombine.high %v3568_v3, %v3572_v4 }
  0x43   :  { %567 = vmatprep.subr.bf16.mxu1 %v3486_v13  ;;  %1253 = vmatprep.subr.bf16.mxu0 %v3637_v17  ;;  %v3580_v13 = vcombine.low %v3513_v63, %v3517_v0 }
  0x45   :  { %514 = vmatmul.mubr.bf16.vlgmr.msra.gmra.mxu1 %v4462_v10  ;;  %1200 = vmatmul.mubr.bf16.vlgmr.msra.gmra.mxu0 %v4579_v16 }
  0x46   :  { %568 = vmatpush1.bf16.msra.mxu1 %v3485_v18  ;;  %1254 = vmatpush1.bf16.msra.mxu0 %v3636_v22 }
  0x47   :  { %569 = vmatprep.subr.bf16.mxu1 %v3478_v21  ;;  %1255 = vmatprep.subr.bf16.mxu0 %v3629_v25 }
  0x48   :  { %599 = vmatprep.mubr.bf16.mxu1 %v4274_v8  ;;  %1285 = vmatprep.mubr.bf16.mxu0 %v4274_v8 }
  0x4a   :  { %570 = vmatpush1.bf16.msra.mxu1 %v3477_v26  ;;  %1256 = vmatpush1.bf16.msra.mxu0 %v3628_v30 }
  0x4b   :  { %571 = vmatprep.subr.bf16.mxu1 %v3470_v29  ;;  %1257 = vmatprep.subr.bf16.mxu0 %v3621_v33 }
  0x4e   :  { %572 = vmatpush1.bf16.msra.mxu1 %v3469_v34  ;;  %1258 = vmatpush1.bf16.msra.mxu0 %v3620_v38 }
  0x4f   :  { %573 = vmatprep.subr.bf16.mxu1 %v3462_v37  ;;  %1259 = vmatprep.subr.bf16.mxu0 %v3613_v41 }
  0x52   :  { %574 = vmatpush1.bf16.msra.mxu1 %v3461_v42  ;;  %1260 = vmatpush1.bf16.msra.mxu0 %v3612_v46 }
  0x53   :  { %575 = vmatprep.subr.bf16.mxu1 %v3454_v45  ;;  %1261 = vmatprep.subr.bf16.mxu0 %v3605_v49 }
  0x56   :  { %576 = vmatpush1.bf16.msra.mxu1 %v3453_v50  ;;  %1262 = vmatpush1.bf16.msra.mxu0 %v3604_v54 }
  0x57   :  { %577 = vmatprep.subr.bf16.mxu1 %v3446_v53  ;;  %1263 = vmatprep.subr.bf16.mxu0 %v3597_v57 }
  0x5a   :  { %578 = vmatpush1.bf16.msra.mxu1 %v3445_v58  ;;  %1264 = vmatpush1.bf16.msra.mxu0 %v3596_v62 }
  0x5b   :  { %579 = vmatprep.subr.bf16.mxu1 %v3438_v61  ;;  %1265 = vmatprep.subr.bf16.mxu0 %v3589_v1 }
  0x5e   :  { %580 = vmatpush1.bf16.msra.mxu1 %v3437_v2  ;;  %1266 = vmatpush1.bf16.msra.mxu0 %v3588_v6 }
  0x5f   :  { %581 = vmatprep.subr.bf16.mxu1 %v3430_v5  ;;  %1267 = vmatprep.subr.bf16.mxu0 %v3581_v7 }
  0x60   :  { %14 = vsyncpa [#allocation5], 0  ;;  %v3634_v17 = vcombine.low %v3568_v3, %v3572_v4  ;;  %v3627_v18 = vcombine.high %v3560_v11, %v3564_v14  ;;  %v3552_v19 = vld [vmem:[%s5581_s0 + $0x348] sm:$0xff]  ;;  %v3938_v21 = vld [vmem:[%s5584_s3 + $0x70] ss:$8 sps:$4 sm:$0xff]   ;;  %v3626_v23 = vcombine.low %v3560_v11, %v3564_v14  ;;  %s4276_s24 = smov 122  }
  0x61   :  { %v3556_v20 = vld [vmem:[%s5581_s0 + $0x368] sm:$0xff]  ;;  %v3946_v27 = vld [vmem:[%s5584_s3 + $0x54] ss:$8 sps:$4 sm:$0xff]   ;;  %v3944_v32 = vld [vmem:[%s5584_s3 + $0x50] ss:$8 sps:$4 sm:$0xff]   ;;  %s4277_s25 = smov 123  }
  0x62   :  { %582 = vmatpush1.bf16.msra.mxu1 %v3429_v9  ;;  %1268 = vmatpush1.bf16.msra.mxu0 %v3580_v13  ;;  %v3943_v22 = vld [vmem:[%s5584_s3 + $0x64] ss:$8 sps:$4 sm:$0xff]   ;;  %v3619_v24 = vcombine.high %v3552_v19, %v3556_v20  ;;  %v3941_v26 = vld [vmem:[%s5584_s3 + $0x60] ss:$8 sps:$4 sm:$0xff]   ;;  %v3618_v28 = vcombine.low %v3552_v19, %v3556_v20  ;;  %v3952_v39 = vld [vmem:[%s5584_s3 + $0x34] ss:$8 sps:$4 sm:$0xff]  }
  0x63   :  { %1210 = vmatprep.subr.bf16.mxu1 %v3635_v12  ;;  %2355 = vmatprep.subr.bf16.mxu0 %v3940_v15  ;;  %v3544_v25 = vld [vmem:[%s5581_s0 + $0x308] sm:$0xff]  ;;  %v3950_v44 = vld [vmem:[%s5584_s3 + $0x30] ss:$8 sps:$4 sm:$0xff]   ;;  %v3958_v51 = vld [vmem:[%s5584_s3 + $0x14] ss:$8 sps:$4 sm:$0xff]   ;;  %s4278_s26 = smov 124  }
  0x64   :  { %v3536_v30 = vld [vmem:[%s5581_s0 + $0x2c8] sm:$0xff]  ;;  %v3570_v54 = vld [vmem:[%s5581_s0 + $0x3d8] sm:$0xff]  ;;  %s4279_s27 = smov 125   ;;  %s4280_s28 = smov 126  }
  0x65   :  { %600 = vmatmul.mubr.bf16.vlgmr.msra.gmra.mxu1 %v4462_v10  ;;  %1286 = vmatmul.mubr.bf16.vlgmr.msra.gmra.mxu0 %v4579_v16  ;;  %v3548_v10 = vld [vmem:[%s5581_s0 + $0x328] sm:$0xff]  ;;  %v3574_v55 = vld [vmem:[%s5581_s0 + $0x3f8] sm:$0xff]  ;;  %s4281_s29 = smov 127   ;;  %s4282_s30 = smov 113  }
  0x66   :  { %1211 = vmatpush1.bf16.msra.mxu1 %v3634_v17  ;;  %1242 = vmatprep.mubr.bf16.mxu1 %v4274_v8  ;;  %v3611_v29 = vcombine.high %v3544_v25, %v3548_v10  ;;  %v3540_v31 = vld [vmem:[%s5581_s0 + $0x2e8] sm:$0xff]  ;;  %v3610_v34 = vcombine.low %v3544_v25, %v3548_v10  ;;  %v3956_v56 = vld [vmem:[%s5584_s3 + $0x10] ss:$8 sps:$4 sm:$0xff]   ;;  %v3639_v59 = vcombine.high %v3570_v54, %v3574_v55  ;;  %v3964_v63 = vld [vmem:[%s5584_s3 + $0xf4] ss:$8 sps:$4 sm:$0xff]   ;;  %s4283_s10 = smov 114  }
  0x67   :  { %1212 = vmatprep.subr.bf16.mxu1 %v3627_v18  ;;  %2356 = vmatpush1.bf16.msra.mxu0 %v3938_v21  ;;  %v3949_v33 = vld [vmem:[%s5584_s3 + $0x44] ss:$8 sps:$4 sm:$0xff]   ;;  %v3603_v35 = vcombine.high %v3536_v30, %v3540_v31  ;;  %v3947_v38 = vld [vmem:[%s5584_s3 + $0x40] ss:$8 sps:$4 sm:$0xff]   ;;  %v3602_v40 = vcombine.low %v3536_v30, %v3540_v31  ;;  %v3562_v60 = vld [vmem:[%s5581_s0 + $0x398] sm:$0xff]  ;;  %v3638_v0 = vcombine.low %v3570_v54, %v3574_v55  ;;  %s4284_s11 = smov 115  }
  0x68   :  { %2357 = vmatprep.subr.bf16.mxu0 %v3943_v22  ;;  %v3528_v36 = vld [vmem:[%s5581_s0 + $0x288] sm:$0xff]  ;;  %v3566_v61 = vld [vmem:[%s5581_s0 + $0x3b8] sm:$0xff]  ;;  %s4285_s2 = smov 116   ;;  %s4286_s12 = smov 117  }
  0x69   :  { %v3532_v37 = vld [vmem:[%s5581_s0 + $0x2a8] sm:$0xff]  ;;  %v3631_v1 = vcombine.high %v3562_v60, %v3566_v61  ;;  %v3554_v2 = vld [vmem:[%s5581_s0 + $0x358] sm:$0xff]  ;;  %v3630_v6 = vcombine.low %v3562_v60, %v3566_v61  ;;  %s4287_s13 = smov 118   ;;  %s4288_s14 = smov 119  }
  0x6a   :  { %1213 = vmatpush1.bf16.msra.mxu1 %v3626_v23  ;;  %v3595_v41 = vcombine.high %v3528_v36, %v3532_v37  ;;  %v3520_v42 = vld [vmem:[%s5581_s0 + $0x248] sm:$0xff]  ;;  %v3594_v46 = vcombine.low %v3528_v36, %v3532_v37  ;;  %v3558_v3 = vld [vmem:[%s5581_s0 + $0x378] sm:$0xff]  ;;  %s4289_s15 = smov 120  }
  0x6b   :  { %1214 = vmatprep.subr.bf16.mxu1 %v3619_v24  ;;  %2358 = vmatpush1.bf16.msra.mxu0 %v3941_v26  ;;  %v3524_v43 = vld [vmem:[%s5581_s0 + $0x268] sm:$0xff]  ;;  %v3962_v4 = vld [vmem:[%s5584_s3 + $0xf0] ss:$8 sps:$4 sm:$0xff]   ;;  %v3623_v7 = vcombine.high %v3554_v2, %v3558_v3  ;;  %v3622_v13 = vcombine.low %v3554_v2, %v3558_v3  ;;  %v3988_v25 = vld [vmem:[%s5584_s3 + $0xb4] ss:$8 sps:$4 sm:$0xff]  }
  0x6c   :  { %2359 = vmatprep.subr.bf16.mxu0 %v3946_v27  ;;  %v3955_v45 = vld [vmem:[%s5584_s3 + $0x24] ss:$8 sps:$4 sm:$0xff]   ;;  %v3587_v47 = vcombine.high %v3520_v42, %v3524_v43  ;;  %v3953_v50 = vld [vmem:[%s5584_s3 + $0x20] ss:$8 sps:$4 sm:$0xff]   ;;  %v3586_v52 = vcombine.low %v3520_v42, %v3524_v43  ;;  %v3546_v9 = vld [vmem:[%s5581_s0 + $0x318] sm:$0xff] }
  0x6d   :  { %v3512_v48 = vld [vmem:[%s5581_s0 + $0x208] sm:$0xff]  ;;  %v3550_v11 = vld [vmem:[%s5581_s0 + $0x338] sm:$0xff] }
  0x6e   :  { %1215 = vmatpush1.bf16.msra.mxu1 %v3618_v28  ;;  %v3516_v49 = vld [vmem:[%s5581_s0 + $0x228] sm:$0xff]  ;;  %v3615_v14 = vcombine.high %v3546_v9, %v3550_v11  ;;  %v3538_v15 = vld [vmem:[%s5581_s0 + $0x2d8] sm:$0xff]  ;;  %v3614_v20 = vcombine.low %v3546_v9, %v3550_v11 }
  0x6f   :  { %1216 = vmatprep.subr.bf16.mxu1 %v3611_v29  ;;  %2360 = vmatpush1.bf16.msra.mxu0 %v3944_v32  ;;  %v3579_v53 = vcombine.high %v3512_v48, %v3516_v49  ;;  %v3961_v57 = vld [vmem:[%s5584_s3 + $0x4] ss:$8 sps:$4 sm:$0xff]   ;;  %v3578_v58 = vcombine.low %v3512_v48, %v3516_v49  ;;  %v3959_v62 = vld [vmem:[%s5584_s3] ss:$8 sps:$4 sm:$0xff]   ;;  %v3542_v17 = vld [vmem:[%s5581_s0 + $0x2f8] sm:$0xff] }
  0x70   :  { %2361 = vmatprep.subr.bf16.mxu0 %v3949_v33  ;;  %v3970_v5 = vld [vmem:[%s5584_s3 + $0xe4] ss:$8 sps:$4 sm:$0xff]   ;;  %v3968_v12 = vld [vmem:[%s5584_s3 + $0xe0] ss:$8 sps:$4 sm:$0xff]   ;;  %v3974_v18 = vld [vmem:[%s5584_s3 + $0xd0] ss:$8 sps:$4 sm:$0xff]   ;;  %v3607_v21 = vcombine.high %v3538_v15, %v3542_v17  ;;  %v3606_v10 = vcombine.low %v3538_v15, %v3542_v17 }
  0x71   :  { %v3982_v19 = vld [vmem:[%s5584_s3 + $0xc4] ss:$8 sps:$4 sm:$0xff]   ;;  %v3530_v22 = vld [vmem:[%s5581_s0 + $0x298] sm:$0xff]  ;;  %v3980_v24 = vld [vmem:[%s5584_s3 + $0xc0] ss:$8 sps:$4 sm:$0xff]  }
  0x72   :  { %1217 = vmatpush1.bf16.msra.mxu1 %v3610_v34  ;;  %v3534_v23 = vld [vmem:[%s5581_s0 + $0x2b8] sm:$0xff]  ;;  %v3994_v30 = vld [vmem:[%s5584_s3 + $0xa4] ss:$8 sps:$4 sm:$0xff]   ;;  %v4004_v43 = vld [vmem:[%s5584_s3 + $0x80] ss:$8 sps:$4 sm:$0xff]  }
  0x73   :  { %1218 = vmatprep.subr.bf16.mxu1 %v3603_v35  ;;  %2362 = vmatpush1.bf16.msra.mxu0 %v3947_v38  ;;  %v3599_v26 = vcombine.high %v3530_v22, %v3534_v23  ;;  %v3522_v27 = vld [vmem:[%s5581_s0 + $0x258] sm:$0xff]  ;;  %v3598_v31 = vcombine.low %v3530_v22, %v3534_v23  ;;  %v3992_v35 = vld [vmem:[%s5584_s3 + $0xa0] ss:$8 sps:$4 sm:$0xff]   ;;  %v4021_v61 = vld [vmem:[%s5584_s3 + $0x1e4] ss:$8 sps:$4 sm:$0xff]  }
  0x74   :  { %2363 = vmatprep.subr.bf16.mxu0 %v3952_v39  ;;  %v3526_v28 = vld [vmem:[%s5581_s0 + $0x278] sm:$0xff]  ;;  %v3995_v54 = vld [vmem:[%s5584_s3 + $0x120] ss:$8 sps:$4 sm:$0xff]   ;;  %v4057_v11 = vld [vmem:[%s5584_s3 + $0x184] ss:$8 sps:$4 sm:$0xff]  }
  0x75   :  { %v3986_v29 = vld [vmem:[%s5584_s3 + $0xb0] ss:$8 sps:$4 sm:$0xff]   ;;  %v3591_v32 = vcombine.high %v3522_v27, %v3526_v28  ;;  %v4000_v36 = vld [vmem:[%s5584_s3 + $0x94] ss:$8 sps:$4 sm:$0xff]   ;;  %v3590_v37 = vcombine.low %v3522_v27, %v3526_v28  ;;  %v4031_v2 = vld [vmem:[%s5584_s3 + $0x1c0] ss:$8 sps:$4 sm:$0xff]  }
  0x76   :  { %1219 = vmatpush1.bf16.msra.mxu1 %v3602_v40  ;;  %v3514_v33 = vld [vmem:[%s5581_s0 + $0x218] sm:$0xff]  ;;  %v4006_v40 = vld [vmem:[%s5584_s3 + $0x84] ss:$8 sps:$4 sm:$0xff]  }
  0x77   :  { %1220 = vmatprep.subr.bf16.mxu1 %v3595_v41  ;;  %2364 = vmatpush1.bf16.msra.mxu0 %v3950_v44  ;;  %v3518_v34 = vld [vmem:[%s5581_s0 + $0x238] sm:$0xff] }
  0x78   :  { %2365 = vmatprep.subr.bf16.mxu0 %v3955_v45  ;;  %v3583_v38 = vcombine.high %v3514_v33, %v3518_v34  ;;  %v3998_v39 = vld [vmem:[%s5584_s3 + $0x90] ss:$8 sps:$4 sm:$0xff]   ;;  %v3582_v41 = vcombine.low %v3514_v33, %v3518_v34  ;;  %v3967_v42 = vld [vmem:[%s5584_s3 + $0x174] ss:$8 sps:$4 sm:$0xff]  }
  0x79   :  { %v4012_v44 = vld [vmem:[%s5584_s3 + $0x274] ss:$8 sps:$4 sm:$0xff]   ;;  %v3965_v45 = vld [vmem:[%s5584_s3 + $0x170] ss:$8 sps:$4 sm:$0xff]  }
  0x7a   :  { %1221 = vmatpush1.bf16.msra.mxu1 %v3594_v46  ;;  %v3973_v46 = vld [vmem:[%s5584_s3 + $0x164] ss:$8 sps:$4 sm:$0xff]   ;;  %v3979_v48 = vld [vmem:[%s5584_s3 + $0x154] ss:$8 sps:$4 sm:$0xff]   ;;  %v3977_v49 = vld [vmem:[%s5584_s3 + $0x150] ss:$8 sps:$4 sm:$0xff]  }
  0x7b   :  { %1222 = vmatprep.subr.bf16.mxu1 %v3587_v47  ;;  %2366 = vmatpush1.bf16.msra.mxu0 %v3953_v50  ;;  %v3971_v47 = vld [vmem:[%s5584_s3 + $0x160] ss:$8 sps:$4 sm:$0xff]   ;;  %v4003_v55 = vld [vmem:[%s5584_s3 + $0x114] ss:$8 sps:$4 sm:$0xff]   ;;  %v4013_v60 = vld [vmem:[%s5584_s3 + $0x1f0] ss:$8 sps:$4 sm:$0xff]  }
  0x7c   :  { %2367 = vmatprep.subr.bf16.mxu0 %v3958_v51  ;;  %v3983_v50 = vld [vmem:[%s5584_s3 + $0x140] ss:$8 sps:$4 sm:$0xff]   ;;  %v3991_v51 = vld [vmem:[%s5584_s3 + $0x134] ss:$8 sps:$4 sm:$0xff]   ;;  %v4049_v9 = vld [vmem:[%s5584_s3 + $0x190] ss:$8 sps:$4 sm:$0xff]  }
  0x7d   :  { %v4039_v3 = vld [vmem:[%s5584_s3 + $0x1b4] ss:$8 sps:$4 sm:$0xff]  }
  0x7e   :  { %1223 = vmatpush1.bf16.msra.mxu1 %v3586_v52  ;;  %v3989_v52 = vld [vmem:[%s5584_s3 + $0x130] ss:$8 sps:$4 sm:$0xff]  }
  0x7f   :  { %1224 = vmatprep.subr.bf16.mxu1 %v3579_v53  ;;  %2368 = vmatpush1.bf16.msra.mxu0 %v3956_v56  ;;  %v3997_v53 = vld [vmem:[%s5584_s3 + $0x124] ss:$8 sps:$4 sm:$0xff]   ;;  %v4001_v56 = vld [vmem:[%s5584_s3 + $0x110] ss:$8 sps:$4 sm:$0xff]  }
  0x80   :  { %2369 = vmatprep.subr.bf16.mxu0 %v3961_v57  ;;  %v4009_v57 = vld [vmem:[%s5584_s3 + $0x104] ss:$8 sps:$4 sm:$0xff]  }
  0x82   :  { %1225 = vmatpush1.bf16.msra.mxu1 %v3578_v58  ;;  %v4007_v58 = vld [vmem:[%s5584_s3 + $0x100] ss:$8 sps:$4 sm:$0xff]  }
  0x83   :  { %1296 = vmatprep.subr.bf16.mxu1 %v3639_v59  ;;  %2370 = vmatpush1.bf16.msra.mxu0 %v3959_v62  ;;  %v4015_v59 = vld [vmem:[%s5584_s3 + $0x1f4] ss:$8 sps:$4 sm:$0xff]   ;;  %v4019_v62 = vld [vmem:[%s5584_s3 + $0x1e0] ss:$8 sps:$4 sm:$0xff]  }
  0x84   :  { %2371 = vmatprep.subr.bf16.mxu0 %v3964_v63  ;;  %v4027_v63 = vld [vmem:[%s5584_s3 + $0x1d4] ss:$8 sps:$4 sm:$0xff]  }
  0x85   :  { %1243 = vmatmul.mubr.bf16.vlgmr.msra.gmra.mxu1 %v4579_v16 }
  0x86   :  { %1297 = vmatpush1.bf16.msra.mxu1 %v3638_v0  ;;  %1328 = vmatprep.mubr.bf16.mxu1 %v4274_v8  ;;  %v3976_v8 = vld [vmem:[%s5584_s3 + $0xd4] ss:$8 sps:$4 sm:$0xff]   ;;  %v4025_v0 = vld [vmem:[%s5584_s3 + $0x1d0] ss:$8 sps:$4 sm:$0xff]  }
  0x87   :  { %1298 = vmatprep.subr.bf16.mxu1 %v3631_v1  ;;  %2372 = vmatpush2.bf16.msra.mxu0 %v3962_v4  ;;  %v4033_v1 = vld [vmem:[%s5584_s3 + $0x1c4] ss:$8 sps:$4 sm:$0xff]   ;;  %v4037_v4 = vld [vmem:[%s5584_s3 + $0x1b0] ss:$8 sps:$4 sm:$0xff]  }
  0x88   :  { %2373 = vmatprep.subr.bf16.mxu0 %v3970_v5  ;;  %v4045_v5 = vld [vmem:[%s5584_s3 + $0x1a4] ss:$8 sps:$4 sm:$0xff]  }
  0x8a   :  { %1299 = vmatpush1.bf16.msra.mxu1 %v3630_v6  ;;  %v4043_v6 = vld [vmem:[%s5584_s3 + $0x1a0] ss:$8 sps:$4 sm:$0xff]  }
  0x8b   :  { %1300 = vmatprep.subr.bf16.mxu1 %v3623_v7  ;;  %2374 = vmatpush2.bf16.msra.mxu0 %v3968_v12  ;;  %v4051_v7 = vld [vmem:[%s5584_s3 + $0x194] ss:$8 sps:$4 sm:$0xff]   ;;  %v4055_v12 = vld [vmem:[%s5584_s3 + $0x180] ss:$8 sps:$4 sm:$0xff]  }
  0x8c   :  { %2375 = vmatprep.subr.bf16.mxu0 %v3976_v8  ;;  %v4069_v8 = vld [vmem:[%s5584_s3 + $0x374] ss:$8 sps:$4 sm:$0xff]  }
  0x8e   :  { %1301 = vmatpush1.bf16.msra.mxu1 %v3622_v13 }
  0x8f   :  { %1302 = vmatprep.subr.bf16.mxu1 %v3615_v14  ;;  %2376 = vmatpush2.bf16.msra.mxu0 %v3974_v18 }
  0x90   :  { %2377 = vmatprep.subr.bf16.mxu0 %v3982_v19 }
  0x92   :  { %1303 = vmatpush1.bf16.msra.mxu1 %v3614_v20 }
  0x93   :  { %1304 = vmatprep.subr.bf16.mxu1 %v3607_v21  ;;  %2378 = vmatpush2.bf16.msra.mxu0 %v3980_v24 }
  0x94   :  { %2379 = vmatprep.subr.bf16.mxu0 %v3988_v25  ;;  %v4957_v13 = vpop.permute.xlu0 %104 }
  0x96   :  { %1305 = vmatpush1.bf16.msra.mxu1 %v3606_v10 }
  0x97   :  { %1306 = vmatprep.subr.bf16.mxu1 %v3599_v26  ;;  %2380 = vmatpush2.bf16.msra.mxu0 %v3986_v29 }
  0x98   :  { %2381 = vmatprep.subr.bf16.mxu0 %v3994_v30  ;;  %v4960_v18 = vpop.permute.xlu0 %109 }
  0x9a   :  { %1307 = vmatpush1.bf16.msra.mxu1 %v3598_v31 }
  0x9b   :  { %1308 = vmatprep.subr.bf16.mxu1 %v3591_v32  ;;  %2382 = vmatpush2.bf16.msra.mxu0 %v3992_v35 }
  0x9c   :  { %2383 = vmatprep.subr.bf16.mxu0 %v4000_v36 }
  0x9e   :  { %1309 = vmatpush1.bf16.msra.mxu1 %v3590_v37 }
  0x9f   :  { %1310 = vmatprep.subr.bf16.mxu1 %v3583_v38  ;;  %2384 = vmatpush2.bf16.msra.mxu0 %v3998_v39 }
  0xa0   :  { %2385 = vmatprep.subr.bf16.mxu0 %v4006_v40 }
  0xa2   :  { %1311 = vmatpush1.bf16.msra.mxu1 %v3582_v41 }
  0xa3   :  { %2408 = vmatprep.subr.bf16.mxu1 %v3967_v42  ;;  %2386 = vmatpush2.bf16.msra.mxu0 %v4004_v43 }
  0xa4   :  { %2461 = vmatprep.subr.bf16.mxu0 %v4012_v44 }
  0xa5   :  { %1329 = vmatmul.mubr.bf16.vlgmr.msra.gmra.mxu1 %v4579_v16  ;;  %v3985_v16 = vld [vmem:[%s5584_s3 + $0x144] ss:$8 sps:$4 sm:$0xff]  }
  0xa6   :  { %2409 = vmatpush1.bf16.msra.mxu1 %v3965_v45 }
  0xa7   :  { %2410 = vmatprep.subr.bf16.mxu1 %v3973_v46 }
  0xaa   :  { %2411 = vmatpush1.bf16.msra.mxu1 %v3971_v47  ;;  %v4976_v47 = vpop.permute.xlu1 %833 }
  0xab   :  { %2412 = vmatprep.subr.bf16.mxu1 %v3979_v48 }
  0xae   :  { %2413 = vmatpush1.bf16.msra.mxu1 %v3977_v49 }
  0xaf   :  { %2414 = vmatprep.subr.bf16.mxu1 %v3985_v16 }
  0xb2   :  { %2415 = vmatpush1.bf16.msra.mxu1 %v3983_v50 }
  0xb3   :  { %2416 = vmatprep.subr.bf16.mxu1 %v3991_v51 }
  0xb6   :  { %2417 = vmatpush1.bf16.msra.mxu1 %v3989_v52  ;;  %v4010_v52 = vld [vmem:[%s5584_s3 + $0x270] ss:$8 sps:$4 sm:$0xff]  }
  0xb7   :  { %2418 = vmatprep.subr.bf16.mxu1 %v3997_v53 }
  0xba   :  { %2419 = vmatpush1.bf16.msra.mxu1 %v3995_v54 }
  0xbb   :  { %2420 = vmatprep.subr.bf16.mxu1 %v4003_v55 }
  0xbe   :  { %2421 = vmatpush1.bf16.msra.mxu1 %v4001_v56  ;;  %v4018_v56 = vld [vmem:[%s5584_s3 + $0x264] ss:$8 sps:$4 sm:$0xff]  }
  0xbf   :  { %2422 = vmatprep.subr.bf16.mxu1 %v4009_v57 }
  0xc2   :  { %2423 = vmatpush1.bf16.msra.mxu1 %v4007_v58 }
  0xc3   :  { %2424 = vmatprep.subr.bf16.mxu1 %v4015_v59 }
  0xc6   :  { %2425 = vmatpush2.bf16.msra.mxu1 %v4013_v60 }
  0xc7   :  { %2426 = vmatprep.subr.bf16.mxu1 %v4021_v61 }
  0xca   :  { %2427 = vmatpush2.bf16.msra.mxu1 %v4019_v62 }
  0xcb   :  { %2428 = vmatprep.subr.bf16.mxu1 %v4027_v63 }
  0xce   :  { %2429 = vmatpush2.bf16.msra.mxu1 %v4025_v0 }
  0xcf   :  { %2430 = vmatprep.subr.bf16.mxu1 %v4033_v1  ;;  %v4016_v1 = vld [vmem:[%s5584_s3 + $0x260] ss:$8 sps:$4 sm:$0xff]  }
  0xd2   :  { %2431 = vmatpush2.bf16.msra.mxu1 %v4031_v2  ;;  %v4998_v2 = vpop.permute.xlu1 %838 }
  0xd3   :  { %2432 = vmatprep.subr.bf16.mxu1 %v4039_v3 }
  0xd6   :  { %2433 = vmatpush2.bf16.msra.mxu1 %v4037_v4 }
  0xd7   :  { %2434 = vmatprep.subr.bf16.mxu1 %v4045_v5  ;;  %v4024_v5 = vld [vmem:[%s5584_s3 + $0x254] ss:$8 sps:$4 sm:$0xff]  }
  0xda   :  { %2435 = vmatpush2.bf16.msra.mxu1 %v4043_v6 }
  0xdb   :  { %2436 = vmatprep.subr.bf16.mxu1 %v4051_v7 }
  0xde   :  { %2437 = vmatpush2.bf16.msra.mxu1 %v4049_v9 }
  0xdf   :  { %2438 = vmatprep.subr.bf16.mxu1 %v4057_v11 }
  0xe2   :  { %2439 = vmatpush2.bf16.msra.mxu1 %v4055_v12 }
  0xe3   :  { %2514 = vmatprep.subr.bf16.mxu1 %v4069_v8 }
  0xe5   :  { %v472_v14 = vpop.f32.mrf.mxu1  ;;  %v4965_v31 = vpop.f32.mrf.mxu0 }
  0xe6   :  { %v473_v15 = vadd.f32 %v472_v14, %v4957_v13 }
  0xe7   :  { %v474_v17 = vpop.f32.mrf.mxu1  ;;  %v560_v32 = vpop.f32.mrf.mxu0 }
  0xe8   :  { %v626_v19 = vmin.f32 %v473_v15, 0.0  ;;  %v475_v20 = vadd.f32 %v474_v17, %v4957_v13  ;;  %v4970_v37 = vadd.f32 %v560_v32, %v4957_v13  ;;  %vm610_vm3 = vcmp.gt.f32.partialorder %v473_v15, 0.0 }
  0xe9   :  { %v476_v21 = vpop.f32.mrf.mxu1  ;;  %v4967_v33 = vpop.f32.mrf.mxu0 }
  0xea   :  { %v642_v22 = vmul.f32 1.442695, %v626_v19  ;;  %v627_v23 = vmin.f32 %v475_v20, 0.0  ;;  %v477_v24 = vadd.f32 %v476_v21, %v4960_v18  ;;  %v631_v44 = vmin.f32 %v4970_v37, 0.0 }
  0xeb   :  { %v478_v25 = vpop.f32.mrf.mxu1  ;;  %v564_v38 = vpop.f32.mrf.mxu0  ;;  %vm611_vm1 = vcmp.gt.f32.partialorder %v475_v20, 0.0  ;;  %vm615_vm4 = vcmp.gt.f32.partialorder %v4970_v37, 0.0 }
  0xec   :  { %v644_v10 = vmul.f32 1.442695, %v627_v23  ;;  %v634_v26 = vmin.f32 %v477_v24, 0.0  ;;  %v479_v27 = vadd.f32 %v478_v25, %v4960_v18  ;;  %4178 = vpow2.f32 %v642_v22 }
  0xed   :  { %v4973_v43 = vadd.f32 %v564_v38, %v4960_v18  ;;  %vm618_vm0 = vcmp.gt.f32.partialorder %v477_v24, 0.0  ;;  %v652_v54 = vmul.f32 1.442695, %v631_v44  ;;  %v4034_v38 = vld [vmem:[%s5584_s3 + $0x230] ss:$8 sps:$4 sm:$0xff]  }
  0xee   :  { %v658_v28 = vmul.f32 1.442695, %v634_v26  ;;  %4180 = vpow2.f32 %v644_v10  ;;  %v635_v29 = vmin.f32 %v479_v27, 0.0  ;;  %vm619_vm2 = vcmp.gt.f32.partialorder %v479_v27, 0.0  ;;  %v4030_v10 = vld [vmem:[%s5584_s3 + $0x244] ss:$8 sps:$4 sm:$0xff]  }
  0xef   :  { %v639_v50 = vmin.f32 %v4973_v43, 0.0  ;;  %v4048_v44 = vld [vmem:[%s5584_s3 + $0x214] ss:$8 sps:$4 sm:$0xff]   ;;  %vm623_vm5 = vcmp.gt.f32.partialorder %v4973_v43, 0.0 }
  0xf0   :  { %4182 = vpow2.f32 %v658_v28  ;;  %v660_v30 = vmul.f32 1.442695, %v635_v29 }
  0xf1   :  { %v668_v61 = vmul.f32 1.442695, %v639_v50 }
  0xf2   :  { %4184 = vpow2.f32 %v660_v30  ;;  %v4028_v30 = vld [vmem:[%s5584_s3 + $0x240] ss:$8 sps:$4 sm:$0xff]  }
  0xf3   :  { %4186 = vpow2.f32 %v652_v54 }
  0xf4   :  { %4188 = vpow2.f32 %v668_v61 }
  0xf9   :  { %v4179_v34 = vpop.eup %4178 }
  0xfa   :  { %v3487_v42 = vadd.f32 -1.0, %v4179_v34 }
  0xfb   :  { %v4181_v35 = vpop.eup %4180 }
  0xfc   :  { %v3488_v40 = vadd.f32 -1.0, %v4181_v35  ;;  %v690_v16 = vsel %vm610_vm3, %v473_v15, %v3487_v42  ;;  %v4022_v15 = vld [vmem:[%s5584_s3 + $0x250] ss:$8 sps:$4 sm:$0xff]   ;;  %v4036_v35 = vld [vmem:[%s5584_s3 + $0x234] ss:$8 sps:$4 sm:$0xff]  }
  0xfd   :  { %v4183_v36 = vpop.eup %4182 }
  0xfe   :  { %v3495_v39 = vadd.f32 -1.0, %v4183_v36  ;;  %v691_v48 = vsel %vm611_vm1, %v475_v20, %v3488_v40 }
  0xff   :  { %v4185_v41 = vpop.eup %4184 }
 0x100   :  { %v3496_v45 = vadd.f32 -1.0, %v4185_v41  ;;  %v698_v46 = vsel %vm618_vm0, %v477_v24, %v3495_v39  ;;  %v4042_v39 = vld [vmem:[%s5584_s3 + $0x224] ss:$8 sps:$4 sm:$0xff]   ;;  %v4187_v40 = vpop.eup %4186  ;;  %v4040_v41 = vld [vmem:[%s5584_s3 + $0x220] ss:$8 sps:$4 sm:$0xff]  }
 0x101   :  { %v3901_v53 = vpack.c.bf16 %v698_v46, %v690_v16  ;;  %v4189_v42 = vpop.eup %4188  ;;  %v4046_v16 = vld [vmem:[%s5584_s3 + $0x210] ss:$8 sps:$4 sm:$0xff]  }
 0x102   :  { %v699_v49 = vsel %vm619_vm2, %v479_v27, %v3496_v45  ;;  %v3492_v45 = vadd.f32 -1.0, %v4187_v40 }
 0x103   :  { %v3902_v51 = vpack.c.bf16 %v699_v49, %v691_v48 }
 0x104   :  { %v695_v54 = vsel %vm615_vm4, %v4970_v37, %v3492_v45  ;;  %v4052_v37 = vld [vmem:[%s5584_s3 + $0x200] ss:$8 sps:$4 sm:$0xff]  }
 0x105   :  { %v515_v55 = vpop.f32.mrf.mxu1  ;;  %v1201_v58 = vpop.f32.mrf.mxu0  ;;  %2387 = vmatprep.mubr.bf16.mxu0 %v3902_v51  ;;  %v5055_v51 = vadd.f32 %v4965_v31, %v4957_v13  ;;  %v3500_v31 = vadd.f32 -1.0, %v4189_v42 }
 0x106   :  { %v4986_v57 = vadd.f32 %v515_v55, %v4957_v13  ;;  %2388 = vmatmul.mubr.bf16.vlgmr.msra.gmra.mxu0 %v3901_v53  ;;  %v4989_v60 = vadd.f32 %v1201_v58, %v4976_v47  ;;  %v4054_v53 = vld [vmem:[%s5584_s3 + $0x204] ss:$8 sps:$4 sm:$0xff]  }
 0x107   :  { %v517_v59 = vpop.f32.mrf.mxu1  ;;  %2462 = vmatpush1.bf16.msra.mxu0 %v4010_v52  ;;  %v1203_v0 = vpop.f32.mrf.mxu0  ;;  %v5059_v52 = vadd.f32 %v4967_v33, %v4960_v18  ;;  %vm614_vm15 = vcmp.gt.f32.partialorder %v5055_v51, 0.0 }
 0x108   :  { %v628_v62 = vmin.f32 %v4986_v57, 0.0  ;;  %v4993_v63 = vadd.f32 %v517_v59, %v4957_v13  ;;  %v5001_v3 = vadd.f32 %v1203_v0, %v4976_v47  ;;  %2463 = vmatprep.subr.bf16.mxu0 %v4018_v56  ;;  %v1355_v6 = vmin.f32 %v4989_v60, 0.0 }
 0x109   :  { %v519_v4 = vpop.f32.mrf.mxu1  ;;  %v1205_v12 = vpop.f32.mrf.mxu0  ;;  %vm1339_vm6 = vcmp.gt.f32.partialorder %v4989_v60, 0.0  ;;  %vm612_vm13 = vcmp.gt.f32.partialorder %v4986_v57, 0.0  ;;  %vm622_vm0 = vcmp.gt.f32.partialorder %v5059_v52, 0.0 }
 0x10a   :  { %v646_v7 = vmul.f32 1.442695, %v628_v62  ;;  %v629_v9 = vmin.f32 %v4993_v63, 0.0  ;;  %v5009_v11 = vadd.f32 %v519_v4, %v4960_v18  ;;  %v1356_v8 = vmin.f32 %v5001_v3, 0.0 }
 0x10b   :  { %v521_v14 = vpop.f32.mrf.mxu1  ;;  %v5016_v17 = vadd.f32 %v1205_v12, %v4998_v2  ;;  %2464 = vmatpush1.bf16.msra.mxu0 %v4016_v1  ;;  %v1207_v21 = vpop.f32.mrf.mxu0  ;;  %v1371_v22 = vmul.f32 1.442695, %v1355_v6  ;;  %vm1340_vm7 = vcmp.gt.f32.partialorder %v5001_v3, 0.0  ;;  %vm613_vm9 = vcmp.gt.f32.partialorder %v4993_v63, 0.0  ;;  %v4060_v6 = vld [vmem:[%s5584_s3 + $0x2f4] ss:$8 sps:$4 sm:$0xff]  }
 0x10c   :  { %v648_v19 = vmul.f32 1.442695, %v629_v9  ;;  %v636_v20 = vmin.f32 %v5009_v11, 0.0  ;;  %4190 = vpow2.f32 %v646_v7  ;;  %v1373_v23 = vmul.f32 1.442695, %v1356_v8  ;;  %2465 = vmatprep.subr.bf16.mxu0 %v4024_v5 }
 0x10d   :  { %v5020_v24 = vadd.f32 %v521_v14, %v4960_v18  ;;  %v5023_v25 = vadd.f32 %v1207_v21, %v4998_v2  ;;  %v1363_v27 = vmin.f32 %v5016_v17, 0.0  ;;  %vm1347_vm8 = vcmp.gt.f32.partialorder %v5016_v17, 0.0 }
 0x10e   :  { %4192 = vpow2.f32 %v648_v19  ;;  %v662_v26 = vmul.f32 1.442695, %v636_v20  ;;  %vm620_vm10 = vcmp.gt.f32.partialorder %v5009_v11, 0.0 }
 0x10f   :  { %4194 = vpow2.f32 %v1373_v23  ;;  %v637_v28 = vmin.f32 %v5020_v24, 0.0  ;;  %v1364_v29 = vmin.f32 %v5023_v25, 0.0  ;;  %2466 = vmatpush1.bf16.msra.mxu0 %v4022_v15  ;;  %v1387_v32 = vmul.f32 1.442695, %v1363_v27 }
 0x110   :  { %4196 = vpow2.f32 %v662_v26  ;;  %2467 = vmatprep.subr.bf16.mxu0 %v4030_v10  ;;  %vm621_vm11 = vcmp.gt.f32.partialorder %v5020_v24, 0.0  ;;  %vm1348_vm12 = vcmp.gt.f32.partialorder %v5023_v25, 0.0  ;;  %v4075_v10 = vld [vmem:[%s5584_s3 + $0x364] ss:$8 sps:$4 sm:$0xff]  }
 0x111   :  { %v664_v34 = vmul.f32 1.442695, %v637_v28  ;;  %4198 = vpow2.f32 %v1371_v22  ;;  %v1389_v36 = vmul.f32 1.442695, %v1364_v29  ;;  %v630_v22 = vmin.f32 %v5055_v51, 0.0 }
 0x112   :  { %4200 = vpow2.f32 %v1387_v32  ;;  %v4073_v28 = vld [vmem:[%s5584_s3 + $0x360] ss:$8 sps:$4 sm:$0xff]  }
 0x113   :  { %4202 = vpow2.f32 %v664_v34  ;;  %2468 = vmatpush1.bf16.msra.mxu0 %v4028_v30  ;;  %v650_v29 = vmul.f32 1.442695, %v630_v22  ;;  %v4061_v30 = vld [vmem:[%s5584_s3 + $0x2e0] ss:$8 sps:$4 sm:$0xff]   ;;  %v4081_v34 = vld [vmem:[%s5584_s3 + $0x354] ss:$8 sps:$4 sm:$0xff]  }
 0x114   :  { %4204 = vpow2.f32 %v1389_v36  ;;  %2469 = vmatprep.subr.bf16.mxu0 %v4036_v35 }
 0x115   :  { %4206 = vpow2.f32 %v650_v29 }
 0x117   :  { %2470 = vmatpush1.bf16.msra.mxu0 %v4034_v38  ;;  %v4066_v38 = vld [vmem:[%s5584_s3 + $0x2d4] ss:$8 sps:$4 sm:$0xff]  }
 0x118   :  { %2471 = vmatprep.subr.bf16.mxu0 %v4042_v39 }
 0x119   :  { %v4191_v46 = vpop.eup %4190 }
 0x11a   :  { %v3489_v0 = vadd.f32 -1.0, %v4191_v46  ;;  %v4064_v46 = vld [vmem:[%s5584_s3 + $0x2d0] ss:$8 sps:$4 sm:$0xff]  }
 0x11b   :  { %v4193_v48 = vpop.eup %4192  ;;  %2472 = vmatpush1.bf16.msra.mxu0 %v4040_v41 }
 0x11c   :  { %v4195_v49 = vpop.eup %4194  ;;  %2473 = vmatprep.subr.bf16.mxu0 %v4048_v44  ;;  %v3490_v33 = vadd.f32 -1.0, %v4193_v48  ;;  %v4079_v44 = vld [vmem:[%s5584_s3 + $0x350] ss:$8 sps:$4 sm:$0xff]   ;;  %v4087_v48 = vld [vmem:[%s5584_s3 + $0x344] ss:$8 sps:$4 sm:$0xff]  }
 0x11d   :  { %v4197_v50 = vpop.eup %4196  ;;  %v3641_v58 = vadd.f32 -1.0, %v4195_v49 }
 0x11e   :  { %v4199_v55 = vpop.eup %4198  ;;  %v3497_v56 = vadd.f32 -1.0, %v4197_v50  ;;  %v693_v15 = vsel %vm613_vm9, %v4993_v63, %v3490_v33  ;;  %v4072_v50 = vld [vmem:[%s5584_s3 + $0x2c4] ss:$8 sps:$4 sm:$0xff]  }
 0x11f   :  { %v4201_v59 = vpop.eup %4200  ;;  %v3640_v61 = vadd.f32 -1.0, %v4199_v55  ;;  %2474 = vmatpush1.bf16.msra.mxu0 %v4046_v16  ;;  %v1420_v8 = vsel %vm1340_vm7, %v5001_v3, %v3641_v58  ;;  %v4085_v55 = vld [vmem:[%s5584_s3 + $0x340] ss:$8 sps:$4 sm:$0xff]   ;;  %v4093_v58 = vld [vmem:[%s5584_s3 + $0x334] ss:$8 sps:$4 sm:$0xff]  }
 0x120   :  { %v4203_v62 = vpop.eup %4202  ;;  %v3648_v1 = vadd.f32 -1.0, %v4201_v59  ;;  %2475 = vmatprep.subr.bf16.mxu0 %v4054_v53  ;;  %v700_v9 = vsel %vm620_vm10, %v5009_v11, %v3497_v56  ;;  %v692_v11 = vsel %vm612_vm13, %v4986_v57, %v3489_v0  ;;  %v4063_v57 = vld [vmem:[%s5584_s3 + $0x2e4] ss:$8 sps:$4 sm:$0xff]   ;;  %v4070_v56 = vld [vmem:[%s5584_s3 + $0x2c0] ss:$8 sps:$4 sm:$0xff]  }
 0x121   :  { %v4205_v4 = vpop.eup %4204  ;;  %v3498_v5 = vadd.f32 -1.0, %v4203_v62  ;;  %v1419_v7 = vsel %vm1339_vm6, %v4989_v60, %v3640_v61  ;;  %v703_v60 = vsel %vm623_vm5, %v4973_v43, %v3500_v31  ;;  %v3903_v63 = vpack.c.bf16 %v700_v9, %v692_v11  ;;  %v4078_v61 = vld [vmem:[%s5584_s3 + $0x2b4] ss:$8 sps:$4 sm:$0xff]   ;;  %v4091_v0 = vld [vmem:[%s5584_s3 + $0x330] ss:$8 sps:$4 sm:$0xff]  }
 0x122   :  { %v3649_v12 = vadd.f32 -1.0, %v4205_v4  ;;  %v1427_v14 = vsel %vm1347_vm8, %v5016_v17, %v3648_v1  ;;  %v4067_v17 = vld [vmem:[%s5584_s3 + $0x370] ss:$8 sps:$4 sm:$0xff]   ;;  %v638_v43 = vmin.f32 %v5059_v52, 0.0  ;;  %v3906_v26 = vpack.c.bf16 %v703_v60, %v695_v54  ;;  %v4099_v1 = vld [vmem:[%s5584_s3 + $0x324] ss:$8 sps:$4 sm:$0xff]  }
 0x123   :  { %v701_v19 = vsel %vm621_vm11, %v5020_v24, %v3498_v5  ;;  %2476 = vmatpush1.bf16.msra.mxu0 %v4052_v37  ;;  %v3909_v21 = vpack.c.bf16 %v1427_v14, %v1419_v7  ;;  %v4058_v24 = vld [vmem:[%s5584_s3 + $0x2f0] ss:$8 sps:$4 sm:$0xff]   ;;  %v4084_v5 = vld [vmem:[%s5584_s3 + $0x2a4] ss:$8 sps:$4 sm:$0xff]   ;;  %v4082_v7 = vld [vmem:[%s5584_s3 + $0x2a0] ss:$8 sps:$4 sm:$0xff]  }
 0x124   :  { %v1428_v3 = vsel %vm1348_vm12, %v5023_v25, %v3649_v12  ;;  %v3904_v20 = vpack.c.bf16 %v701_v19, %v693_v15  ;;  %2477 = vmatprep.subr.bf16.mxu0 %v4060_v6  ;;  %v666_v35 = vmul.f32 1.442695, %v638_v43  ;;  %v4076_v37 = vld [vmem:[%s5584_s3 + $0x2b0] ss:$8 sps:$4 sm:$0xff]   ;;  %v4097_v6 = vld [vmem:[%s5584_s3 + $0x320] ss:$8 sps:$4 sm:$0xff]   ;;  %v4207_v12 = vpop.eup %4206 }
 0x125   :  { %v3910_v23 = vpack.c.bf16 %v1428_v3, %v1420_v8  ;;  %v1287_v25 = vpop.f32.mrf.mxu0  ;;  %v5162_v31 = vpop.f32.mrf.mxu1  ;;  %v4102_v9 = vld [vmem:[%s5584_s3 + $0x314] ss:$8 sps:$4 sm:$0xff]   ;;  %v4100_v60 = vld [vmem:[%s5584_s3 + $0x310] ss:$8 sps:$4 sm:$0xff]   ;;  %v4105_v3 = vld [vmem:[%s5584_s3 + $0x304] ss:$8 sps:$4 sm:$0xff]  }
 0x126   :  { %2440 = vmatprep.mubr.bf16.mxu1 %v3904_v20  ;;  %v5126_v36 = vadd.f32 %v1287_v25, %v4976_v47  ;;  %4208 = vpow2.f32 %v666_v35  ;;  %v4090_v14 = vld [vmem:[%s5584_s3 + $0x294] ss:$8 sps:$4 sm:$0xff]   ;;  %v4088_v11 = vld [vmem:[%s5584_s3 + $0x290] ss:$8 sps:$4 sm:$0xff]   ;;  %v3491_v22 = vadd.f32 -1.0, %v4207_v12 }
 0x127   :  { %2397 = vmatprep.mubr.bf16.mxu0 %v3910_v23  ;;  %2441 = vmatmul.mubr.bf16.vlgmr.msra.gmra.mxu1 %v3903_v63  ;;  %v1289_v27 = vpop.f32.mrf.mxu0  ;;  %v603_v4 = vpop.f32.mrf.mxu1  ;;  %v4103_v23 = vld [vmem:[%s5584_s3 + $0x300] ss:$8 sps:$4 sm:$0xff]   ;;  %v4108_v25 = vld [vmem:[%s5584_s3 + $0x3f4] ss:$8 sps:$4 sm:$0xff]   ;;  %v4106_v35 = vld [vmem:[%s5584_s3 + $0x3f0] ss:$8 sps:$4 sm:$0xff]  }
 0x128   :  { %2398 = vmatmul.mubr.bf16.gmra.mxu0 %v3909_v21  ;;  %2515 = vmatpush1.bf16.msra.mxu1 %v4067_v17  ;;  %v5120_v32 = vadd.f32 %v1289_v27, %v4976_v47  ;;  %v1359_v49 = vmin.f32 %v5126_v36, 0.0  ;;  %v4096_v21 = vld [vmem:[%s5584_s3 + $0x284] ss:$8 sps:$4 sm:$0xff]   ;;  %vm1343_vm2 = vcmp.gt.f32.partialorder %v5126_v36, 0.0  ;;  %v4115_v12 = vld [vmem:[%s5584_s3 + $0x3c0] ss:$8 sps:$4 sm:$0xff]  }
 0x129   :  { %2478 = vmatpush2.bf16.msra.mxu0 %v4058_v24  ;;  %2493 = vmatprep.mubr.bf16.mxu0 %v3906_v26  ;;  %v1291_v39 = vpop.f32.mrf.mxu0  ;;  %v5188_v8 = vpop.f32.mrf.mxu1 }
 0x12a   :  { %2479 = vmatprep.subr.bf16.mxu0 %v4063_v57  ;;  %2516 = vmatprep.subr.bf16.mxu1 %v4075_v10  ;;  %v1360_v40 = vmin.f32 %v5120_v32, 0.0  ;;  %v5133_v41 = vadd.f32 %v1291_v39, %v4998_v2  ;;  %v1379_v59 = vmul.f32 1.442695, %v1359_v49  ;;  %vm1344_vm14 = vcmp.gt.f32.partialorder %v5120_v32, 0.0  ;;  %v4094_v57 = vld [vmem:[%s5584_s3 + $0x280] ss:$8 sps:$4 sm:$0xff]  }
 0x12b   :  { %v1293_v42 = vpop.f32.mrf.mxu0  ;;  %v607_v20 = vpop.f32.mrf.mxu1 }
 0x12c   :  { %2517 = vmatpush1.bf16.msra.mxu1 %v4073_v28  ;;  %v1381_v45 = vmul.f32 1.442695, %v1360_v40  ;;  %v5146_v16 = vadd.f32 %v1293_v42, %v4998_v2  ;;  %v1367_v53 = vmin.f32 %v5133_v41, 0.0  ;;  %v5212_v43 = vadd.f32 %v607_v20, %v4960_v18  ;;  %v4126_v20 = vld [vmem:[%s5584_s3 + $0x394] ss:$8 sps:$4 sm:$0xff]  }
 0x12d   :  { %2480 = vmatpush2.bf16.msra.mxu0 %v4061_v30  ;;  %2518 = vmatprep.subr.bf16.mxu1 %v4081_v34  ;;  %v694_v28 = vsel %vm614_vm15, %v5055_v51, %v3491_v22  ;;  %v4111_v51 = vld [vmem:[%s5584_s3 + $0x3e4] ss:$8 sps:$4 sm:$0xff]   ;;  %vm1351_vm3 = vcmp.gt.f32.partialorder %v5133_v41, 0.0 }
 0x12e   :  { %2481 = vmatprep.subr.bf16.mxu0 %v4066_v38  ;;  %4210 = vpow2.f32 %v1381_v45  ;;  %v1368_v54 = vmin.f32 %v5146_v16, 0.0  ;;  %v1395_v62 = vmul.f32 1.442695, %v1367_v53  ;;  %vm1352_vm1 = vcmp.gt.f32.partialorder %v5146_v16, 0.0 }
 0x12f   :  { %v5229_v38 = vadd.f32 %v603_v4, %v4957_v13  ;;  %v641_v39 = vmin.f32 %v5212_v43, 0.0  ;;  %v4112_v4 = vld [vmem:[%s5584_s3 + $0x3d0] ss:$8 sps:$4 sm:$0xff]   ;;  %vm625_vm5 = vcmp.gt.f32.partialorder %v5212_v43, 0.0 }
 0x130   :  { %2519 = vmatpush1.bf16.msra.mxu1 %v4079_v44  ;;  %v1397_v33 = vmul.f32 1.442695, %v1368_v54 }
 0x131   :  { %2482 = vmatpush2.bf16.msra.mxu0 %v4064_v46  ;;  %2520 = vmatprep.subr.bf16.mxu1 %v4087_v48  ;;  %v672_v53 = vmul.f32 1.442695, %v641_v39  ;;  %vm617_vm9 = vcmp.gt.f32.partialorder %v5229_v38, 0.0 }
 0x132   :  { %2483 = vmatprep.subr.bf16.mxu0 %v4072_v50  ;;  %4212 = vpow2.f32 %v1397_v33  ;;  %v633_v50 = vmin.f32 %v5229_v38, 0.0 }
 0x133   :  { %4214 = vpow2.f32 %v1379_v59  ;;  %v4209_v15 = vpop.eup %4208 }
 0x134   :  { %2521 = vmatpush1.bf16.msra.mxu1 %v4085_v55  ;;  %4216 = vpow2.f32 %v1395_v62  ;;  %v3499_v63 = vadd.f32 -1.0, %v4209_v15  ;;  %v4114_v55 = vld [vmem:[%s5584_s3 + $0x3d4] ss:$8 sps:$4 sm:$0xff]  }
 0x135   :  { %2484 = vmatpush2.bf16.msra.mxu0 %v4070_v56  ;;  %2522 = vmatprep.subr.bf16.mxu1 %v4093_v58  ;;  %v5253_v56 = vadd.f32 %v5188_v8, %v4960_v18  ;;  %4218 = vpow2.f32 %v672_v53 }
 0x136   :  { %2485 = vmatprep.subr.bf16.mxu0 %v4078_v61  ;;  %v702_v29 = vsel %vm622_vm0, %v5059_v52, %v3499_v63  ;;  %v4124_v63 = vld [vmem:[%s5584_s3 + $0x390] ss:$8 sps:$4 sm:$0xff]   ;;  %vm2755_vm0 = vcmask 990208  }
 0x137   :  { %v3905_v52 = vpack.c.bf16 %v702_v29, %v694_v28  ;;  %v4127_v29 = vld [vmem:[%s5584_s3 + $0x380] ss:$8 sps:$4 sm:$0xff]   ;;  %vm624_vm10 = vcmp.gt.f32.partialorder %v5253_v56, 0.0 }
 0x138   :  { %2523 = vmatpush1.bf16.msra.mxu1 %v4091_v0 }
 0x139   :  { %2486 = vmatpush2.bf16.msra.mxu0 %v4076_v37  ;;  %2524 = vmatprep.subr.bf16.mxu1 %v4099_v1  ;;  %v5267_v37 = vadd.f32 %v5162_v31, %v4957_v13  ;;  %v640_v13 = vmin.f32 %v5253_v56, 0.0 }
 0x13a   :  { %2487 = vmatprep.subr.bf16.mxu0 %v4084_v5  ;;  %v656_v5 = vmul.f32 1.442695, %v633_v50 }
 0x13b   :  { %v4211_v19 = vpop.eup %4210  ;;  %v670_v15 = vmul.f32 1.442695, %v640_v13  ;;  %vm616_vm11 = vcmp.gt.f32.partialorder %v5267_v37, 0.0 }
 0x13c   :  { %2525 = vmatpush1.bf16.msra.mxu1 %v4097_v6  ;;  %v3645_v17 = vadd.f32 -1.0, %v4211_v19 }
 0x13d   :  { %2488 = vmatpush2.bf16.msra.mxu0 %v4082_v7  ;;  %2526 = vmatprep.subr.bf16.mxu1 %v4102_v9  ;;  %v632_v9 = vmin.f32 %v5267_v37, 0.0 }
 0x13e   :  { %2489 = vmatprep.subr.bf16.mxu0 %v4090_v14  ;;  %v1424_v26 = vsel %vm1344_vm14, %v5120_v32, %v3645_v17  ;;  %v4120_v14 = vld [vmem:[%s5584_s3 + $0x3b4] ss:$8 sps:$4 sm:$0xff]  }
 0x13f   :  { %v4213_v24 = vpop.eup %4212  ;;  %v654_v19 = vmul.f32 1.442695, %v632_v9 }
 0x140   :  { %2527 = vmatpush1.bf16.msra.mxu1 %v4100_v60  ;;  %v3653_v10 = vadd.f32 -1.0, %v4213_v24  ;;  %v4215_v27 = vpop.eup %4214  ;;  %v4118_v60 = vld [vmem:[%s5584_s3 + $0x3b0] ss:$8 sps:$4 sm:$0xff]   ;;  %v4129_v24 = vld [vmem:[%s5584_s3 + $0x384] ss:$8 sps:$4 sm:$0xff]  }
 0x141   :  { %2490 = vmatpush2.bf16.msra.mxu0 %v4088_v11  ;;  %2528 = vmatprep.subr.bf16.mxu1 %v4105_v3  ;;  %v4217_v30 = vpop.eup %4216  ;;  %v3644_v45 = vadd.f32 -1.0, %v4215_v27  ;;  %v4123_v11 = vld [vmem:[%s5584_s3 + $0x3a4] ss:$8 sps:$4 sm:$0xff]   ;;  %v4121_v3 = vld [vmem:[%s5584_s3 + $0x3a0] ss:$8 sps:$4 sm:$0xff]  }
 0x142   :  { %2491 = vmatprep.subr.bf16.mxu0 %v4096_v21  ;;  %v1432_v34 = vsel %vm1352_vm1, %v5146_v16, %v3653_v10  ;;  %v3652_v46 = vadd.f32 -1.0, %v4217_v30  ;;  %v4109_v16 = vld [vmem:[%s5584_s3 + $0x3e0] ss:$8 sps:$4 sm:$0xff]   ;;  %v4219_v21 = vpop.eup %4218  ;;  %vm2730_vm1 = vcmask 998400  }
 0x143   :  { %v3914_v40 = vpack.c.bf16 %v1432_v34, %v1424_v26  ;;  %v1423_v62 = vsel %vm1343_vm2, %v5126_v36, %v3644_v45  ;;  %v3502_v26 = vadd.f32 -1.0, %v4219_v21  ;;  %vm2705_vm2 = vcmask 1006592  }
 0x144   :  { %2529 = vmatpush1.bf16.msra.mxu1 %v4103_v23  ;;  %v1431_v0 = vsel %vm1351_vm3, %v5133_v41, %v3652_v46  ;;  %v4117_v41 = vld [vmem:[%s5584_s3 + $0x3c4] ss:$8 sps:$4 sm:$0xff]   ;;  %s4275_s3 = smov 121   ;;  %vm2680_vm3 = vcmask 1014784  }
 0x145   :  { %2492 = vmatpush2.bf16.msra.mxu0 %v4094_v57  ;;  %v1244_v32 = vpop.f32.mrf.mxu1  ;;  %2530 = vmatprep.subr.bf16.mxu1 %v4108_v25  ;;  %v3913_v6 = vpack.c.bf16 %v1431_v0, %v1423_v62 }
 0x146   :  { %v5236_v42 = vadd.f32 %v1244_v32, %v4976_v47 }
 0x147   :  { %v1246_v44 = vpop.f32.mrf.mxu1 }
 0x148   :  { %v1357_v48 = vmin.f32 %v5236_v42, 0.0  ;;  %2494 = vmatmul.mubr.bf16.vlgmr.msra.gmra.mxu0 %v3905_v52  ;;  %v5242_v49 = vadd.f32 %v1246_v44, %v4976_v47  ;;  %2531 = vmatpush2.bf16.msra.mxu1 %v4106_v35  ;;  %vm1341_vm8 = vcmp.gt.f32.partialorder %v5236_v42, 0.0 }
 0x149   :  { %v1248_v54 = vpop.f32.mrf.mxu1  ;;  %2503 = vmatprep.mubr.bf16.mxu0 %v3914_v40  ;;  %2532 = vmatprep.subr.bf16.mxu1 %v4111_v51  ;;  %v705_v51 = vsel %vm625_vm5, %v5212_v43, %v3502_v26  ;;  %vm2630_vm5 = vcmask 1031168  }
 0x14a   :  { %v1375_v58 = vmul.f32 1.442695, %v1357_v48  ;;  %v1358_v59 = vmin.f32 %v5242_v49, 0.0  ;;  %v5257_v33 = vadd.f32 %v1248_v54, %v4998_v2  ;;  %vm1342_vm6 = vcmp.gt.f32.partialorder %v5242_v49, 0.0 }
 0x14b   :  { %v1250_v61 = vpop.f32.mrf.mxu1 }
 0x14c   :  { %v1377_v18 = vmul.f32 1.442695, %v1358_v59  ;;  %v1365_v1 = vmin.f32 %v5257_v33, 0.0  ;;  %2533 = vmatpush2.bf16.msra.mxu1 %v4109_v16  ;;  %v1251_v36 = vadd.f32 %v1250_v61, %v4998_v2  ;;  %4220 = vpow2.f32 %v1375_v58 }
 0x14d   :  { %2534 = vmatprep.subr.bf16.mxu1 %v4114_v55  ;;  %vm1349_vm4 = vcmp.gt.f32.partialorder %v5257_v33, 0.0 }
 0x14e   :  { %v1391_v31 = vmul.f32 1.442695, %v1365_v1  ;;  %4222 = vpow2.f32 %v1377_v18  ;;  %v1366_v7 = vmin.f32 %v1251_v36, 0.0  ;;  %vm1350_vm7 = vcmp.gt.f32.partialorder %v1251_v36, 0.0 }
 0x150   :  { %4224 = vpow2.f32 %v1391_v31  ;;  %2504 = vmatmul.mubr.bf16.gmra.mxu0 %v3913_v6  ;;  %2535 = vmatpush2.bf16.msra.mxu1 %v4112_v4  ;;  %v1393_v8 = vmul.f32 1.442695, %v1366_v7 }
 0x151   :  { %4226 = vpow2.f32 %v656_v5  ;;  %2536 = vmatprep.subr.bf16.mxu1 %v4117_v41 }
 0x152   :  { %4228 = vpow2.f32 %v1393_v8 }
 0x153   :  { %4230 = vpow2.f32 %v670_v15 }
 0x154   :  { %2537 = vmatpush2.bf16.msra.mxu1 %v4115_v12  ;;  %4232 = vpow2.f32 %v654_v19 }
 0x155   :  { %2538 = vmatprep.subr.bf16.mxu1 %v4120_v14 }
 0x158   :  { %2539 = vmatpush2.bf16.msra.mxu1 %v4118_v60 }
 0x159   :  { %2540 = vmatprep.subr.bf16.mxu1 %v4123_v11  ;;  %v4221_v17 = vpop.eup %4220 }
 0x15a   :  { %v3642_v28 = vadd.f32 -1.0, %v4221_v17 }
 0x15b   :  { %v4223_v22 = vpop.eup %4222 }
 0x15c   :  { %2541 = vmatpush2.bf16.msra.mxu1 %v4121_v3  ;;  %v3643_v10 = vadd.f32 -1.0, %v4223_v22  ;;  %v1421_v44 = vsel %vm1341_vm8, %v5236_v42, %v3642_v28  ;;  %vm2930_vm8 = vcmask 932864  }
 0x15d   :  { %v4225_v23 = vpop.eup %4224  ;;  %2542 = vmatprep.subr.bf16.mxu1 %v4126_v20 }
 0x15e   :  { %v4227_v57 = vpop.eup %4226  ;;  %v3650_v25 = vadd.f32 -1.0, %v4225_v23  ;;  %v1422_v32 = vsel %vm1342_vm6, %v5242_v49, %v3643_v10  ;;  %vm2600_vm6 = vcmask 1039360  }
 0x15f   :  { %v4229_v27 = vpop.eup %4228  ;;  %v3494_v34 = vadd.f32 -1.0, %v4227_v57 }
 0x160   :  { %2543 = vmatpush2.bf16.msra.mxu1 %v4124_v63  ;;  %v3651_v30 = vadd.f32 -1.0, %v4229_v27  ;;  %v1429_v35 = vsel %vm1349_vm4, %v5257_v33, %v3650_v25  ;;  %v4231_v39 = vpop.eup %4230  ;;  %vm2655_vm4 = vcmask 1022976  }
 0x161   :  { %2544 = vmatprep.subr.bf16.mxu1 %v4129_v24  ;;  %v4233_v45 = vpop.eup %4232  ;;  %v3911_v48 = vpack.c.bf16 %v1429_v35, %v1421_v44  ;;  %v697_v16 = vsel %vm617_vm9, %v5229_v38, %v3494_v34  ;;  %v3501_v50 = vadd.f32 -1.0, %v4231_v39  ;;  %vm2905_vm9 = vcmask 941056  }
 0x162   :  { %v1430_v40 = vsel %vm1350_vm7, %v1251_v36, %v3651_v30  ;;  %v3908_v54 = vpack.c.bf16 %v705_v51, %v697_v16  ;;  %v3493_v55 = vadd.f32 -1.0, %v4233_v45  ;;  %vm2955_vm7 = vcmask 924672  }
 0x163   :  { %v3912_v52 = vpack.c.bf16 %v1430_v40, %v1422_v32  ;;  %v704_v59 = vsel %vm624_vm10, %v5253_v56, %v3501_v50  ;;  %vm2880_vm10 = vcmask 949248  }
 0x164   :  { %2545 = vmatpush2.bf16.msra.mxu1 %v4127_v29  ;;  %v696_v0 = vsel %vm616_vm11, %v5267_v37, %v3493_v55  ;;  %vm2855_vm11 = vcmask 957440  }
 0x165   :  { %v1330_v46 = vpop.f32.mrf.mxu1  ;;  %2450 = vmatprep.mubr.bf16.mxu1 %v3912_v52  ;;  %v3907_v4 = vpack.c.bf16 %v704_v59, %v696_v0 }
 0x166   :  { %v1331_v53 = vadd.f32 %v1330_v46, %v4976_v47  ;;  %2451 = vmatmul.mubr.bf16.gmra.mxu1 %v3911_v48 }
 0x167   :  { %v1332_v49 = vpop.f32.mrf.mxu1  ;;  %2546 = vmatprep.mubr.bf16.mxu1 %v3908_v54 }
 0x168   :  { %v1361_v43 = vmin.f32 %v1331_v53, 0.0  ;;  %v1333_v58 = vadd.f32 %v1332_v49, %v4976_v47  ;;  %vm1345_vm15 = vcmp.gt.f32.partialorder %v1331_v53, 0.0 }
 0x169   :  { %v1334_v42 = vpop.f32.mrf.mxu1 }
 0x16a   :  { %v1383_v33 = vmul.f32 1.442695, %v1361_v43  ;;  %v1362_v61 = vmin.f32 %v1333_v58, 0.0  ;;  %v1335_v38 = vadd.f32 %v1334_v42, %v4998_v2  ;;  %vm1346_vm13 = vcmp.gt.f32.partialorder %v1333_v58, 0.0 }
 0x16b   :  { %v1336_v62 = vpop.f32.mrf.mxu1 }
 0x16c   :  { %v1385_v18 = vmul.f32 1.442695, %v1362_v61  ;;  %v1369_v1 = vmin.f32 %v1335_v38, 0.0  ;;  %v1337_v47 = vadd.f32 %v1336_v62, %v4998_v2  ;;  %4234 = vpow2.f32 %v1383_v33 }
 0x16d   :  { %vm1353_vm12 = vcmp.gt.f32.partialorder %v1335_v38, 0.0 }
 0x16e   :  { %v1399_v5 = vmul.f32 1.442695, %v1369_v1  ;;  %4236 = vpow2.f32 %v1385_v18  ;;  %v1370_v36 = vmin.f32 %v1337_v47, 0.0  ;;  %2547 = vmatmul.mubr.bf16.vlgmr.msra.gmra.mxu1 %v3907_v4  ;;  %vm1354_vm14 = vcmp.gt.f32.partialorder %v1337_v47, 0.0 }
 0x170   :  { %4238 = vpow2.f32 %v1399_v5  ;;  %v1401_v56 = vmul.f32 1.442695, %v1370_v36 }
 0x172   :  { %4240 = vpow2.f32 %v1401_v56 }
 0x179   :  { %v4235_v41 = vpop.eup %4234 }
 0x17a   :  { %v3646_v37 = vadd.f32 -1.0, %v4235_v41 }
 0x17b   :  { %v4237_v13 = vpop.eup %4236 }
 0x17c   :  { %v3647_v7 = vadd.f32 -1.0, %v4237_v13  ;;  %v1425_v19 = vsel %vm1345_vm15, %v1331_v53, %v3646_v37 }
 0x17d   :  { %v4239_v31 = vpop.eup %4238 }
 0x17e   :  { %v3654_v6 = vadd.f32 -1.0, %v4239_v31  ;;  %v1426_v8 = vsel %vm1346_vm13, %v1333_v58, %v3647_v7  ;;  %vm2805_vm13 = vcmask 973824  }
 0x17f   :  { %v4241_v9 = vpop.eup %4240 }
 0x180   :  { %v3655_v12 = vadd.f32 -1.0, %v4241_v9  ;;  %v1433_v2 = vsel %vm1353_vm12, %v1335_v38, %v3654_v6  ;;  %vm2830_vm12 = vcmask 965632  }
 0x181   :  { %v3915_v60 = vpack.c.bf16 %v1433_v2, %v1425_v19 }
 0x182   :  { %v1434_v14 = vsel %vm1354_vm14, %v1337_v47, %v3655_v12  ;;  %vm2780_vm14 = vcmask 982016  }
 0x183   :  { %v3916_v15 = vpack.c.bf16 %v1434_v14, %v1426_v8 }
 0x185   :  { %2556 = vmatprep.mubr.bf16.mxu1 %v3916_v15 }
 0x186   :  { %2557 = vmatmul.mubr.bf16.gmra.mxu1 %v3915_v60 }
 0x1c6   :  { %v2389_v11 = vpop.f32.mrf.mxu0 }
 0x1c8   :  { %v2391_v3 = vpop.f32.mrf.mxu0 }
 0x1ca   :  { %v2393_v20 = vpop.f32.mrf.mxu0 }
 0x1cc   :  { %v2395_v21 = vpop.f32.mrf.mxu0 }
 0x1e7   :  { %v2442_v22 = vpop.f32.mrf.mxu1 }
 0x1e8   :  { %v2399_v17 = vpop.f32.mrf.mxu0  ;;  %v2443_v39 = vadd.f32 %v2442_v22, %v2389_v11 }
 0x1e9   :  { %v2444_v23 = vpop.f32.mrf.mxu1 }
 0x1ea   :  { %v5324_v63 = vpop.f32.mrf.mxu0  ;;  %v2445_v32 = vadd.f32 %v2444_v23, %v2391_v3  ;;  %v3008_v3 = vld [vmem:[%s5586_s5] sm:$0xff] }
 0x1eb   :  { %v2446_v57 = vpop.f32.mrf.mxu1 }
 0x1ec   :  { %v2403_v24 = vpop.f32.mrf.mxu0  ;;  %v2447_v46 = vadd.f32 %v2446_v57, %v2393_v20  ;;  %v3009_v57 = vld [vmem:[%s5586_s5 + $0x8] sm:$0xff] }
 0x1ed   :  { %v2448_v10 = vpop.f32.mrf.mxu1 }
 0x1ee   :  { %v5326_v25 = vpop.f32.mrf.mxu0  ;;  %v2449_v48 = vadd.f32 %v2448_v10, %v2395_v21 }
 0x208   :  { %v2495_v26 = vpop.f32.mrf.mxu0 }
 0x209   :  { %v2496_v51 = vadd.f32 %v2495_v26, %v2443_v39 }
 0x20a   :  { %v2497_v28 = vpop.f32.mrf.mxu0 }
 0x20b   :  { %v2498_v52 = vadd.f32 %v2497_v28, %v2445_v32 }
 0x20c   :  { %v2499_v34 = vpop.f32.mrf.mxu0 }
 0x20d   :  { %v2500_v54 = vadd.f32 %v2499_v34, %v2447_v46 }
 0x20e   :  { %v2501_v44 = vpop.f32.mrf.mxu0 }
 0x20f   :  { %v2502_v49 = vadd.f32 %v2501_v44, %v2449_v48 }
 0x210   :  { %v2505_v33 = vpop.f32.mrf.mxu0 }
 0x212   :  { %v2507_v38 = vpop.f32.mrf.mxu0 }
 0x214   :  { %v2509_v4 = vpop.f32.mrf.mxu0 }
 0x216   :  { %v2511_v37 = vpop.f32.mrf.mxu0 }
 0x226   :  { %v2452_v27 = vpop.f32.mrf.mxu1 }
 0x227   :  { %v2453_v61 = vadd.f32 %v2452_v27, %v2399_v17 }
 0x228   :  { %v5328_v29 = vpop.f32.mrf.mxu1 }
 0x229   :  { %v2506_v0 = vadd.f32 %v2505_v33, %v2453_v61  ;;  %v2455_v31 = vadd.f32 %v5328_v29, %v5324_v63  ;;  %v4177_v63 = vld [vmem:[%s5585_s4 + $0x4] ss:$8 sps:$4 sm:$0xff]  }
 0x22a   :  { %v2456_v30 = vpop.f32.mrf.mxu1  ;;  %3222 = vmatprep.mubr.bf16.mxu0 %v4177_v63 }
 0x22b   :  { %v2457_v62 = vadd.f32 %v2456_v30, %v2403_v24  ;;  %v2508_v7 = vadd.f32 %v2507_v38, %v2455_v31 }
 0x22c   :  { %v5330_v35 = vpop.f32.mrf.mxu1 }
 0x22d   :  { %v2510_v5 = vadd.f32 %v2509_v4, %v2457_v62  ;;  %v2459_v6 = vadd.f32 %v5330_v35, %v5326_v25 }
 0x22e   :  { %v2548_v40 = vpop.f32.mrf.mxu1 }
 0x22f   :  { %v5332_v16 = vadd.f32 %v2548_v40, %v2496_v51  ;;  %v2512_v2 = vadd.f32 %v2511_v37, %v2459_v6 }
 0x230   :  { %v2550_v45 = vpop.f32.mrf.mxu1 }
 0x231   :  { %v2551_v50 = vadd.f32 %v2550_v45, %v2498_v52 }
 0x232   :  { %v2552_v53 = vpop.f32.mrf.mxu1 }
 0x233   :  { %v5335_v55 = vpack.c.bf16 %v2551_v50, %v5332_v16  ;;  %v5337_v58 = vadd.f32 %v2552_v53, %v2500_v54 }
 0x234   :  { %v2554_v43 = vpop.f32.mrf.mxu1 }
 0x235   :  { %v2555_v42 = vadd.f32 %v2554_v43, %v2502_v49  ;;  %2749 = vrot.lane.b32.xlu0 %v5335_v55, %s4275_s3  ;;  %v4250_v41 = vpack.c.bf16 %v5337_v58, %v5332_v16 }
 0x237   :  { %v5342_v59 = vpack.c.bf16 %v2555_v42, %v5337_v58 }
 0x239   :  { %2751 = vrot.lane.b32.xlu1 %v5342_v59, %s4275_s3  ;;  %2724 = vrot.lane.b32.xlu0 %v5335_v55, %s4276_s24 }
 0x23d   :  { %2726 = vrot.lane.b32.xlu1 %v5342_v59, %s4276_s24  ;;  %2699 = vrot.lane.b32.xlu0 %v5335_v55, %s4277_s25 }
 0x241   :  { %2701 = vrot.lane.b32.xlu1 %v5342_v59, %s4277_s25  ;;  %2674 = vrot.lane.b32.xlu0 %v5335_v55, %s4278_s26 }
 0x245   :  { %2676 = vrot.lane.b32.xlu1 %v5342_v59, %s4278_s26  ;;  %2649 = vrot.lane.b32.xlu0 %v5335_v55, %s4279_s27 }
 0x246   :  { %v2558_v18 = vpop.f32.mrf.mxu1 }
 0x247   :  { %v5360_v1 = vadd.f32 %v2558_v18, %v2506_v0 }
 0x248   :  { %v2560_v47 = vpop.f32.mrf.mxu1 }
 0x249   :  { %2651 = vrot.lane.b32.xlu1 %v5342_v59, %s4279_s27  ;;  %2624 = vrot.lane.b32.xlu0 %v5335_v55, %s4280_s28  ;;  %v2561_v9 = vadd.f32 %v2560_v47, %v2508_v7 }
 0x24a   :  { %v2562_v36 = vpop.f32.mrf.mxu1 }
 0x24b   :  { %v5366_v56 = vadd.f32 %v2562_v36, %v2510_v5  ;;  %v3888_v8 = vpack.c.bf16 %v2561_v9, %v5360_v1 }
 0x24c   :  { %v2564_v12 = vpop.f32.mrf.mxu1 }
 0x24d   :  { %2626 = vrot.lane.b32.xlu1 %v5342_v59, %s4280_s28  ;;  %2594 = vrot.lane.b32.xlu0 %v5335_v55, %s4281_s29  ;;  %v4251_v13 = vpack.c.bf16 %v5366_v56, %v5360_v1  ;;  %v2565_v14 = vadd.f32 %v2564_v12, %v2512_v2 }
 0x24f   :  { %v3889_v15 = vpack.c.bf16 %v2565_v14, %v5366_v56 }
 0x251   :  { %2596 = vrot.lane.b32.xlu1 %v5342_v59, %s4281_s29  ;;  %2949 = vrot.lane.b32.xlu0 %v5335_v55, %s4282_s30 }
 0x255   :  { %2951 = vrot.lane.b32.xlu1 %v5342_v59, %s4282_s30  ;;  %2924 = vrot.lane.b32.xlu0 %v5335_v55, %s4283_s10 }
 0x259   :  { %2926 = vrot.lane.b32.xlu1 %v5342_v59, %s4283_s10  ;;  %2899 = vrot.lane.b32.xlu0 %v5335_v55, %s4284_s11 }
 0x25d   :  { %2901 = vrot.lane.b32.xlu1 %v5342_v59, %s4284_s11  ;;  %2874 = vrot.lane.b32.xlu0 %v5335_v55, %s4285_s2 }
 0x261   :  { %2876 = vrot.lane.b32.xlu1 %v5342_v59, %s4285_s2  ;;  %2849 = vrot.lane.b32.xlu0 %v5335_v55, %s4286_s12 }
 0x265   :  { %2851 = vrot.lane.b32.xlu1 %v5342_v59, %s4286_s12  ;;  %2824 = vrot.lane.b32.xlu0 %v5335_v55, %s4287_s13 }
 0x269   :  { %2826 = vrot.lane.b32.xlu1 %v5342_v59, %s4287_s13  ;;  %2799 = vrot.lane.b32.xlu0 %v5335_v55, %s4288_s14 }
 0x26d   :  { %2801 = vrot.lane.b32.xlu1 %v5342_v59, %s4288_s14  ;;  %2762 = vrot.lane.b32.xlu0 %v3888_v8, %s4275_s3 }
 0x271   :  { %2737 = vrot.lane.b32.xlu0 %v3888_v8, %s4276_s24  ;;  %2764 = vrot.lane.b32.xlu1 %v3889_v15, %s4275_s3 }
 0x275   :  { %2712 = vrot.lane.b32.xlu0 %v3888_v8, %s4277_s25  ;;  %2739 = vrot.lane.b32.xlu1 %v3889_v15, %s4276_s24 }
 0x279   :  { %2687 = vrot.lane.b32.xlu0 %v3888_v8, %s4278_s26  ;;  %2714 = vrot.lane.b32.xlu1 %v3889_v15, %s4277_s25 }
 0x27d   :  { %2662 = vrot.lane.b32.xlu0 %v3888_v8, %s4279_s27  ;;  %2689 = vrot.lane.b32.xlu1 %v3889_v15, %s4278_s26 }
 0x281   :  { %2637 = vrot.lane.b32.xlu0 %v3888_v8, %s4280_s28  ;;  %2664 = vrot.lane.b32.xlu1 %v3889_v15, %s4279_s27  ;;  %s4290_s27 = smov [#allocation4]  }
 0x285   :  { %2612 = vrot.lane.b32.xlu0 %v3888_v8, %s4281_s29  ;;  %2639 = vrot.lane.b32.xlu1 %v3889_v15, %s4280_s28  ;;  %s3414_s28 = sshll.u32 %s4290_s27, 4  ;;  %s3415_s28 = int_to_ptr.vmem [resolvable:$true] %s3414_s28 }
 0x286   :  { %p4257_p1 = scmp.lt.s32.totalorder %s3415_s28, %s3415_s28 }
 0x289   :  { %2774 = vrot.lane.b32.xlu0 %v5335_v55, %s4289_s15  ;;  %2614 = vrot.lane.b32.xlu1 %v3889_v15, %s4281_s29 }
 0x28d   :  { %2962 = vrot.lane.b32.xlu0 %v3888_v8, %s4282_s30  ;;  %2776 = vrot.lane.b32.xlu1 %v5342_v59, %s4289_s15 }
 0x291   :  { %2937 = vrot.lane.b32.xlu0 %v3888_v8, %s4283_s10  ;;  %2964 = vrot.lane.b32.xlu1 %v3889_v15, %s4282_s30 }
 0x295   :  { %2912 = vrot.lane.b32.xlu0 %v3888_v8, %s4284_s11  ;;  %2939 = vrot.lane.b32.xlu1 %v3889_v15, %s4283_s10 }
 0x299   :  { %2887 = vrot.lane.b32.xlu0 %v3888_v8, %s4285_s2  ;;  %2914 = vrot.lane.b32.xlu1 %v3889_v15, %s4284_s11 }
 0x29d   :  { %2862 = vrot.lane.b32.xlu0 %v3888_v8, %s4286_s12  ;;  %2889 = vrot.lane.b32.xlu1 %v3889_v15, %s4285_s2 }
 0x2a1   :  { %2837 = vrot.lane.b32.xlu0 %v3888_v8, %s4287_s13  ;;  %2864 = vrot.lane.b32.xlu1 %v3889_v15, %s4286_s12 }
 0x2a5   :  { %2812 = vrot.lane.b32.xlu0 %v3888_v8, %s4288_s14  ;;  %2839 = vrot.lane.b32.xlu1 %v3889_v15, %s4287_s13 }
 0x2a7   :  { %v2750_v19 = vpop.permute.xlu0 %2749 }
 0x2a8   :  { %v2753_v60 = vrot.slane %v2750_v19, 4 }
 0x2a9   :  { %2787 = vrot.lane.b32.xlu0 %v3888_v8, %s4289_s15  ;;  %2814 = vrot.lane.b32.xlu1 %v3889_v15, %s4288_s14 }
 0x2aa   :  { %v2756_v11 = vsel %vm2755_vm0, %v2750_v19, %v2753_v60 }
 0x2ab   :  { %2760 = vst [vmem:[#allocation3 + $0x70] sm:$0xf] %v2756_v11  ;;  %v2752_v20 = vpop.permute.xlu1 %2751  ;;  %v2725_v21 = vpop.permute.xlu0 %2724 }
 0x2ac   :  { %v2754_v17 = vrot.slane %v2752_v20, 4  ;;  %v2728_v22 = vrot.slane %v2725_v21, 4 }
 0x2ad   :  { %3012 = vperm.xlu0 %3934, %v3008_v3   ;;  %2789 = vrot.lane.b32.xlu1 %v3889_v15, %s4289_s15 }
 0x2ae   :  { %v2757_v23 = vsel %vm2755_vm0, %v2752_v20, %v2754_v17  ;;  %v2731_v24 = vsel %vm2730_vm1, %v2725_v21, %v2728_v22 }
 0x2af   :  { %2761 = vst [vmem:[#allocation3 + $0x78] sm:$0xf] %v2757_v23  ;;  %2735 = vst [vmem:[#allocation3 + $0x60] sm:$0xf] %v2731_v24  ;;  %v2727_v25 = vpop.permute.xlu1 %2726  ;;  %v2700_v10 = vpop.permute.xlu0 %2699 }
 0x2b0   :  { %v2729_v26 = vrot.slane %v2727_v25, 4  ;;  %v2703_v27 = vrot.slane %v2700_v10, 4 }
 0x2b1   :  { %3017 = vperm.xlu1 %3935, %v3009_v57  }
 0x2b2   :  { %v2732_v28 = vsel %vm2730_vm1, %v2727_v25, %v2729_v26  ;;  %v2706_v29 = vsel %vm2705_vm2, %v2700_v10, %v2703_v27 }
 0x2b3   :  { %2736 = vst [vmem:[#allocation3 + $0x68] sm:$0xf] %v2732_v28  ;;  %2710 = vst [vmem:[#allocation3 + $0x50] sm:$0xf] %v2706_v29  ;;  %v2702_v30 = vpop.permute.xlu1 %2701  ;;  %v2675_v34 = vpop.permute.xlu0 %2674 }
 0x2b4   :  { %v2704_v35 = vrot.slane %v2702_v30, 4  ;;  %v2678_v39 = vrot.slane %v2675_v34, 4 }
 0x2b6   :  { %v2707_v32 = vsel %vm2705_vm2, %v2702_v30, %v2704_v35  ;;  %v2681_v40 = vsel %vm2680_vm3, %v2675_v34, %v2678_v39 }
 0x2b7   :  { %2711 = vst [vmem:[#allocation3 + $0x58] sm:$0xf] %v2707_v32  ;;  %2685 = vst [vmem:[#allocation3 + $0x40] sm:$0xf] %v2681_v40  ;;  %v2677_v51 = vpop.permute.xlu1 %2676  ;;  %v2650_v52 = vpop.permute.xlu0 %2649 }
 0x2b8   :  { %v2679_v44 = vrot.slane %v2677_v51, 4  ;;  %v2653_v45 = vrot.slane %v2650_v52, 4 }
 0x2ba   :  { %v2682_v46 = vsel %vm2680_vm3, %v2677_v51, %v2679_v44  ;;  %v2656_v48 = vsel %vm2655_vm4, %v2650_v52, %v2653_v45 }
 0x2bb   :  { %2686 = vst [vmem:[#allocation3 + $0x48] sm:$0xf] %v2682_v46  ;;  %2660 = vst [vmem:[#allocation3 + $0x30] sm:$0xf] %v2656_v48  ;;  %v2652_v50 = vpop.permute.xlu1 %2651  ;;  %v2625_v53 = vpop.permute.xlu0 %2624 }
 0x2bc   :  { %v2654_v54 = vrot.slane %v2652_v50, 4  ;;  %v2628_v49 = vrot.slane %v2625_v53, 4 }
 0x2be   :  { %v2657_v55 = vsel %vm2655_vm4, %v2652_v50, %v2654_v54  ;;  %v2631_v43 = vsel %vm2630_vm5, %v2625_v53, %v2628_v49 }
 0x2bf   :  { %2661 = vst [vmem:[#allocation3 + $0x38] sm:$0xf] %v2657_v55  ;;  %2635 = vst [vmem:[#allocation3 + $0x20] sm:$0xf] %v2631_v43  ;;  %v2627_v42 = vpop.permute.xlu1 %2626  ;;  %v2595_v59 = vpop.permute.xlu0 %2594 }
 0x2c0   :  { %v2629_v33 = vrot.slane %v2627_v42, 4  ;;  %v2598_v61 = vrot.slane %v2595_v59, 4 }
 0x2c2   :  { %v2632_v38 = vsel %vm2630_vm5, %v2627_v42, %v2629_v33  ;;  %v2601_v62 = vsel %vm2600_vm6, %v2595_v59, %v2598_v61 }
 0x2c3   :  { %2636 = vst [vmem:[#allocation3 + $0x28] sm:$0xf] %v2632_v38  ;;  %2605 = vst [vmem:[#allocation3 + $0x10] sm:$0xf] %v2601_v62  ;;  %v2597_v0 = vpop.permute.xlu1 %2596  ;;  %v2950_v18 = vpop.permute.xlu0 %2949 }
 0x2c4   :  { %v2599_v4 = vrot.slane %v2597_v0, 4  ;;  %v2953_v47 = vrot.slane %v2950_v18, 4 }
 0x2c6   :  { %v2602_v5 = vsel %vm2600_vm6, %v2597_v0, %v2599_v4  ;;  %v2956_v36 = vsel %vm2955_vm7, %v2950_v18, %v2953_v47 }
 0x2c7   :  { %2606 = vst [vmem:[#allocation3 + $0x18] sm:$0xf] %v2602_v5  ;;  %2960 = vst [vmem:[#allocation3 + $0xf0] sm:$0xf] %v2956_v36  ;;  %v2952_v31 = vpop.permute.xlu1 %2951  ;;  %v2925_v6 = vpop.permute.xlu0 %2924 }
 0x2c8   :  { %v2954_v7 = vrot.slane %v2952_v31, 4  ;;  %v2928_v9 = vrot.slane %v2925_v6, 4 }
 0x2ca   :  { %v2957_v37 = vsel %vm2955_vm7, %v2952_v31, %v2954_v7  ;;  %v2931_v12 = vsel %vm2930_vm8, %v2925_v6, %v2928_v9  ;;  %v4130_v7 = vld [vmem:[#allocation3 + $0x70] ss:$8 sps:$4 sm:$0xff]  }
 0x2cb   :  { %2961 = vst [vmem:[#allocation3 + $0xf8] sm:$0xf] %v2957_v37  ;;  %2935 = vst [vmem:[#allocation3 + $0xe0] sm:$0xf] %v2931_v12  ;;  %v2927_v2 = vpop.permute.xlu1 %2926  ;;  %v2900_v8 = vpop.permute.xlu0 %2899 }
 0x2cc   :  { %v2929_v14 = vrot.slane %v2927_v2, 4  ;;  %v2903_v15 = vrot.slane %v2900_v8, 4 }
 0x2ce   :  { %v2932_v19 = vsel %vm2930_vm8, %v2927_v2, %v2929_v14  ;;  %v2906_v60 = vsel %vm2905_vm9, %v2900_v8, %v2903_v15 }
 0x2cf   :  { %2936 = vst [vmem:[#allocation3 + $0xe8] sm:$0xf] %v2932_v19  ;;  %2910 = vst [vmem:[#allocation3 + $0xd0] sm:$0xf] %v2906_v60  ;;  %v2902_v11 = vpop.permute.xlu1 %2901  ;;  %v2875_v3 = vpop.permute.xlu0 %2874  ;;  %v4133_v19 = vld [vmem:[#allocation3 + $0x60] ss:$8 sps:$4 sm:$0xff]  }
 0x2d0   :  { %v2904_v20 = vrot.slane %v2902_v11, 4  ;;  %v2878_v21 = vrot.slane %v2875_v3, 4 }
 0x2d2   :  { %v2907_v17 = vsel %vm2905_vm9, %v2902_v11, %v2904_v20  ;;  %v2881_v22 = vsel %vm2880_vm10, %v2875_v3, %v2878_v21 }
 0x2d3   :  { %2911 = vst [vmem:[#allocation3 + $0xd8] sm:$0xf] %v2907_v17  ;;  %2885 = vst [vmem:[#allocation3 + $0xc0] sm:$0xf] %v2881_v22  ;;  %v2877_v63 = vpop.permute.xlu1 %2876  ;;  %v2850_v23 = vpop.permute.xlu0 %2849 }
 0x2d4   :  { %v2879_v24 = vrot.slane %v2877_v63, 4  ;;  %v2853_v57 = vrot.slane %v2850_v23, 4 }
 0x2d6   :  { %v2882_v25 = vsel %vm2880_vm10, %v2877_v63, %v2879_v24  ;;  %v2856_v10 = vsel %vm2855_vm11, %v2850_v23, %v2853_v57  ;;  %v4136_v63 = vld [vmem:[#allocation3 + $0x50] ss:$8 sps:$4 sm:$0xff]   ;;  %v4154_v16 = vld [vmem:[#allocation3 + $0xe0] ss:$8 sps:$4 sm:$0xff]  }
 0x2d7   :  { %2886 = vst [vmem:[#allocation3 + $0xc8] sm:$0xf] %v2882_v25  ;;  %2860 = vst [vmem:[#allocation3 + $0xb0] sm:$0xf] %v2856_v10  ;;  %v2852_v26 = vpop.permute.xlu1 %2851  ;;  %v2825_v27 = vpop.permute.xlu0 %2824 }
 0x2d8   :  { %v2854_v28 = vrot.slane %v2852_v26, 4  ;;  %v2828_v29 = vrot.slane %v2825_v27, 4 }
 0x2da   :  { %v2857_v30 = vsel %vm2855_vm11, %v2852_v26, %v2854_v28  ;;  %v2831_v34 = vsel %vm2830_vm12, %v2825_v27, %v2828_v29  ;;  %v4139_v28 = vld [vmem:[#allocation3 + $0x40] ss:$8 sps:$4 sm:$0xff]  }
 0x2db   :  { %2861 = vst [vmem:[#allocation3 + $0xb8] sm:$0xf] %v2857_v30  ;;  %2835 = vst [vmem:[#allocation3 + $0xa0] sm:$0xf] %v2831_v34  ;;  %v2827_v35 = vpop.permute.xlu1 %2826  ;;  %v2800_v39 = vpop.permute.xlu0 %2799 }
 0x2dc   :  { %v2829_v32 = vrot.slane %v2827_v35, 4  ;;  %v2803_v40 = vrot.slane %v2800_v39, 4 }
 0x2de   :  { %v2832_v51 = vsel %vm2830_vm12, %v2827_v35, %v2829_v32  ;;  %v2806_v52 = vsel %vm2805_vm13, %v2800_v39, %v2803_v40 }
 0x2df   :  { %2836 = vst [vmem:[#allocation3 + $0xa8] sm:$0xf] %v2832_v51  ;;  %2810 = vst [vmem:[#allocation3 + $0x90] sm:$0xf] %v2806_v52  ;;  %v2802_v44 = vpop.permute.xlu1 %2801  ;;  %v2763_v45 = vpop.permute.xlu0 %2762  ;;  %v4142_v51 = vld [vmem:[#allocation3 + $0x30] ss:$8 sps:$4 sm:$0xff]  }
 0x2e0   :  { %v2804_v46 = vrot.slane %v2802_v44, 4  ;;  %v2766_v48 = vrot.slane %v2763_v45, 4 }
 0x2e2   :  { %v2807_v50 = vsel %vm2805_vm13, %v2802_v44, %v2804_v46  ;;  %v2768_v53 = vsel %vm2755_vm0, %v2763_v45, %v2766_v48 }
 0x2e3   :  { %2811 = vst [vmem:[#allocation3 + $0x98] sm:$0xf] %v2807_v50  ;;  %2772 = vst [vmem:[#allocation3 + $0x74] sm:$0xf] %v2768_v53  ;;  %v2738_v54 = vpop.permute.xlu0 %2737  ;;  %v2765_v49 = vpop.permute.xlu1 %2764 }
 0x2e4   :  { %v2741_v55 = vrot.slane %v2738_v54, 4  ;;  %v2767_v43 = vrot.slane %v2765_v49, 4 }
 0x2e6   :  { %v2743_v42 = vsel %vm2730_vm1, %v2738_v54, %v2741_v55  ;;  %v2769_v59 = vsel %vm2755_vm0, %v2765_v49, %v2767_v43  ;;  %v4145_v54 = vld [vmem:[#allocation3 + $0x20] ss:$8 sps:$4 sm:$0xff]  }
 0x2e7   :  { %2747 = vst [vmem:[#allocation3 + $0x64] sm:$0xf] %v2743_v42  ;;  %2773 = vst [vmem:[#allocation3 + $0x7c] sm:$0xf] %v2769_v59  ;;  %v2713_v33 = vpop.permute.xlu0 %2712  ;;  %v2740_v61 = vpop.permute.xlu1 %2739 }
 0x2e8   :  { %v2716_v38 = vrot.slane %v2713_v33, 4  ;;  %v2742_v62 = vrot.slane %v2740_v61, 4 }
 0x2ea   :  { %v2718_v0 = vsel %vm2705_vm2, %v2713_v33, %v2716_v38  ;;  %v2744_v18 = vsel %vm2730_vm1, %v2740_v61, %v2742_v62  ;;  %v4148_v38 = vld [vmem:[#allocation3 + $0x10] ss:$8 sps:$4 sm:$0xff]  }
 0x2eb   :  { %2722 = vst [vmem:[#allocation3 + $0x54] sm:$0xf] %v2718_v0  ;;  %2748 = vst [vmem:[#allocation3 + $0x6c] sm:$0xf] %v2744_v18  ;;  %v2688_v4 = vpop.permute.xlu0 %2687  ;;  %v2715_v47 = vpop.permute.xlu1 %2714 }
 0x2ec   :  { %v2691_v5 = vrot.slane %v2688_v4, 4  ;;  %v2717_v36 = vrot.slane %v2715_v47, 4 }
 0x2ee   :  { %v2693_v31 = vsel %vm2680_vm3, %v2688_v4, %v2691_v5  ;;  %v2719_v6 = vsel %vm2705_vm2, %v2715_v47, %v2717_v36  ;;  %v4132_v9 = vld [vmem:[#allocation3 + $0x74] ss:$8 sps:$4 sm:$0xff]  }
 0x2ef   :  { %2697 = vst [vmem:[#allocation3 + $0x44] sm:$0xf] %v2693_v31  ;;  %2723 = vst [vmem:[#allocation3 + $0x5c] sm:$0xf] %v2719_v6  ;;  %v2663_v37 = vpop.permute.xlu0 %2662  ;;  %v2690_v12 = vpop.permute.xlu1 %2689  ;;  %3190 = vmatprep.subr.bf16.mxu0 %v4132_v9 }
 0x2f0   :  { %v2666_v2 = vrot.slane %v2663_v37, 4  ;;  %v2692_v8 = vrot.slane %v2690_v12, 4  ;;  %3191 = vmatpush1.bf16.msra.mxu0 %v4130_v7 }
 0x2f2   :  { %v2668_v14 = vsel %vm2655_vm4, %v2663_v37, %v2666_v2  ;;  %v2694_v15 = vsel %vm2680_vm3, %v2690_v12, %v2692_v8  ;;  %v4135_v60 = vld [vmem:[#allocation3 + $0x64] ss:$8 sps:$4 sm:$0xff]   ;;  %v4151_v2 = vld [vmem:[#allocation3 + $0xf0] ss:$8 sps:$4 sm:$0xff]  }
 0x2f3   :  { %2672 = vst [vmem:[#allocation3 + $0x34] sm:$0xf] %v2668_v14  ;;  %2698 = vst [vmem:[#allocation3 + $0x4c] sm:$0xf] %v2694_v15  ;;  %v2638_v11 = vpop.permute.xlu0 %2637  ;;  %v2665_v3 = vpop.permute.xlu1 %2664  ;;  %3192 = vmatprep.subr.bf16.mxu0 %v4135_v60 }
 0x2f4   :  { %v2641_v20 = vrot.slane %v2638_v11, 4  ;;  %v2667_v21 = vrot.slane %v2665_v3, 4  ;;  %3193 = vmatpush1.bf16.msra.mxu0 %v4133_v19 }
 0x2f6   :  { %v2643_v17 = vsel %vm2630_vm5, %v2638_v11, %v2641_v20  ;;  %v2669_v22 = vsel %vm2655_vm4, %v2665_v3, %v2667_v21  ;;  %v4138_v23 = vld [vmem:[#allocation3 + $0x54] ss:$8 sps:$4 sm:$0xff]  }
 0x2f7   :  { %2647 = vst [vmem:[#allocation3 + $0x24] sm:$0xf] %v2643_v17  ;;  %2673 = vst [vmem:[#allocation3 + $0x3c] sm:$0xf] %v2669_v22  ;;  %v2613_v24 = vpop.permute.xlu0 %2612  ;;  %v2640_v57 = vpop.permute.xlu1 %2639  ;;  %3194 = vmatprep.subr.bf16.mxu0 %v4138_v23  ;;  %v4157_v17 = vld [vmem:[#allocation3 + $0xd0] ss:$8 sps:$4 sm:$0xff]  }
 0x2f8   :  { %v2616_v25 = vrot.slane %v2613_v24, 4  ;;  %v2642_v10 = vrot.slane %v2640_v57, 4  ;;  %3195 = vmatpush1.bf16.msra.mxu0 %v4136_v63 }
 0x2fa   :  { %v2618_v26 = vsel %vm2600_vm6, %v2613_v24, %v2616_v25  ;;  %v2644_v27 = vsel %vm2630_vm5, %v2640_v57, %v2642_v10  ;;  %v4141_v29 = vld [vmem:[#allocation3 + $0x44] ss:$8 sps:$4 sm:$0xff]  }
 0x2fb   :  { %2622 = vst [vmem:[#allocation3 + $0x14] sm:$0xf] %v2618_v26  ;;  %2648 = vst [vmem:[#allocation3 + $0x2c] sm:$0xf] %v2644_v27  ;;  %v2775_v30 = vpop.permute.xlu0 %2774  ;;  %v2615_v34 = vpop.permute.xlu1 %2614  ;;  %3196 = vmatprep.subr.bf16.mxu0 %v4141_v29  ;;  %v4160_v26 = vld [vmem:[#allocation3 + $0xc0] ss:$8 sps:$4 sm:$0xff]  }
 0x2fc   :  { %v2778_v35 = vrot.slane %v2775_v30, 4  ;;  %v2617_v39 = vrot.slane %v2615_v34, 4  ;;  %3197 = vmatpush1.bf16.msra.mxu0 %v4139_v28 }
 0x2fe   :  { %v2781_v32 = vsel %vm2780_vm14, %v2775_v30, %v2778_v35  ;;  %v2619_v40 = vsel %vm2600_vm6, %v2615_v34, %v2617_v39  ;;  %v4144_v52 = vld [vmem:[#allocation3 + $0x34] ss:$8 sps:$4 sm:$0xff]  }
 0x2ff   :  { %2785 = vst [vmem:[#allocation3 + $0x80] sm:$0xf] %v2781_v32  ;;  %2623 = vst [vmem:[#allocation3 + $0x1c] sm:$0xf] %v2619_v40  ;;  %v2963_v44 = vpop.permute.xlu0 %2962  ;;  %v2777_v45 = vpop.permute.xlu1 %2776  ;;  %3198 = vmatprep.subr.bf16.mxu0 %v4144_v52  ;;  %v4163_v32 = vld [vmem:[#allocation3 + $0xb0] ss:$8 sps:$4 sm:$0xff]  }
 0x300   :  { %v2966_v46 = vrot.slane %v2963_v44, 4  ;;  %v2779_v48 = vrot.slane %v2777_v45, 4  ;;  %3199 = vmatpush1.bf16.msra.mxu0 %v4142_v51 }
 0x302   :  { %v2968_v50 = vsel %vm2955_vm7, %v2963_v44, %v2966_v46  ;;  %v2782_v53 = vsel %vm2780_vm14, %v2777_v45, %v2779_v48  ;;  %v4147_v49 = vld [vmem:[#allocation3 + $0x24] ss:$8 sps:$4 sm:$0xff]   ;;  %v4166_v45 = vld [vmem:[#allocation3 + $0xa0] ss:$8 sps:$4 sm:$0xff]   ;;  %v4169_v48 = vld [vmem:[#allocation3 + $0x90] ss:$8 sps:$4 sm:$0xff]  }
 0x303   :  { %2972 = vst [vmem:[#allocation3 + $0xf4] sm:$0xf] %v2968_v50  ;;  %2786 = vst [vmem:[#allocation3 + $0x88] sm:$0xf] %v2782_v53  ;;  %v2938_v55 = vpop.permute.xlu0 %2937  ;;  %v2965_v43 = vpop.permute.xlu1 %2964  ;;  %3200 = vmatprep.subr.bf16.mxu0 %v4147_v49  ;;  %v4175_v49 = vld [vmem:[%s5585_s4] ss:$8 sps:$4 sm:$0xff]  }
 0x304   :  { %v2941_v42 = vrot.slane %v2938_v55, 4  ;;  %v2967_v59 = vrot.slane %v2965_v43, 4  ;;  %3201 = vmatpush1.bf16.msra.mxu0 %v4145_v54 }
 0x306   :  { %v2943_v33 = vsel %vm2930_vm8, %v2938_v55, %v2941_v42  ;;  %v2969_v61 = vsel %vm2955_vm7, %v2965_v43, %v2967_v59  ;;  %v4150_v62 = vld [vmem:[#allocation3 + $0x14] ss:$8 sps:$4 sm:$0xff]  }
 0x307   :  { %2947 = vst [vmem:[#allocation3 + $0xe4] sm:$0xf] %v2943_v33  ;;  %2973 = vst [vmem:[#allocation3 + $0xfc] sm:$0xf] %v2969_v61  ;;  %v2913_v0 = vpop.permute.xlu0 %2912  ;;  %v2940_v18 = vpop.permute.xlu1 %2939  ;;  %3202 = vmatprep.subr.bf16.mxu0 %v4150_v62 }
 0x308   :  { %v2916_v4 = vrot.slane %v2913_v0, 4  ;;  %v2942_v47 = vrot.slane %v2940_v18, 4  ;;  %3203 = vmatpush1.bf16.msra.mxu0 %v4148_v38 }
 0x309   :  { %3204 = vmatprep.subr.bf16.mxu0 %v4251_v13 }
 0x30a   :  { %v2918_v5 = vsel %vm2905_vm9, %v2913_v0, %v2916_v4  ;;  %v2944_v36 = vsel %vm2930_vm8, %v2940_v18, %v2942_v47  ;;  %v4172_v53 = vld [vmem:[#allocation3 + $0x80] ss:$8 sps:$4 sm:$0xff]  }
 0x30b   :  { %2922 = vst [vmem:[#allocation3 + $0xd4] sm:$0xf] %v2918_v5  ;;  %2948 = vst [vmem:[#allocation3 + $0xec] sm:$0xf] %v2944_v36  ;;  %v2888_v31 = vpop.permute.xlu0 %2887  ;;  %v2915_v6 = vpop.permute.xlu1 %2914 }
 0x30c   :  { %v2891_v7 = vrot.slane %v2888_v31, 4  ;;  %v2917_v9 = vrot.slane %v2915_v6, 4  ;;  %3205 = vmatpush1.bf16.msra.mxu0 %v4250_v41 }
 0x30e   :  { %v2893_v37 = vsel %vm2880_vm10, %v2888_v31, %v2891_v7  ;;  %v2919_v12 = vsel %vm2905_vm9, %v2915_v6, %v2917_v9  ;;  %v4153_v8 = vld [vmem:[#allocation3 + $0xf4] ss:$8 sps:$4 sm:$0xff]  }
 0x30f   :  { %2897 = vst [vmem:[#allocation3 + $0xc4] sm:$0xf] %v2893_v37  ;;  %2923 = vst [vmem:[#allocation3 + $0xdc] sm:$0xf] %v2919_v12  ;;  %v2863_v1 = vpop.permute.xlu0 %2862  ;;  %v2890_v56 = vpop.permute.xlu1 %2889  ;;  %3206 = vmatprep.subr.bf16.mxu0 %v4153_v8  ;;  %v3258_v8 = vld [vmem:[%s5587_s6] sm:$0xff] }
 0x310   :  { %v2866_v13 = vrot.slane %v2863_v1, 4  ;;  %v2892_v14 = vrot.slane %v2890_v56, 4  ;;  %3207 = vmatpush2.bf16.msra.mxu0 %v4151_v2  ;;  %v3854_v2 = vld [vmem:[%s5587_s6 + $0x10] sm:$0xff] }
 0x312   :  { %v2868_v15 = vsel %vm2855_vm11, %v2863_v1, %v2866_v13  ;;  %v2894_v19 = vsel %vm2880_vm10, %v2890_v56, %v2892_v14  ;;  %v4156_v58 = vld [vmem:[#allocation3 + $0xe4] ss:$8 sps:$4 sm:$0xff]  }
 0x313   :  { %2872 = vst [vmem:[#allocation3 + $0xb4] sm:$0xf] %v2868_v15  ;;  %2898 = vst [vmem:[#allocation3 + $0xcc] sm:$0xf] %v2894_v19  ;;  %v2838_v41 = vpop.permute.xlu0 %2837  ;;  %v2865_v60 = vpop.permute.xlu1 %2864  ;;  %3208 = vmatprep.subr.bf16.mxu0 %v4156_v58 }
 0x314   :  { %v2841_v11 = vrot.slane %v2838_v41, 4  ;;  %v2867_v3 = vrot.slane %v2865_v60, 4  ;;  %3209 = vmatpush2.bf16.msra.mxu0 %v4154_v16 }
 0x316   :  { %v2843_v20 = vsel %vm2830_vm12, %v2838_v41, %v2841_v11  ;;  %v2869_v21 = vsel %vm2855_vm11, %v2865_v60, %v2867_v3  ;;  %v4159_v22 = vld [vmem:[#allocation3 + $0xd4] ss:$8 sps:$4 sm:$0xff]   ;;  %v3856_v41 = vld [vmem:[%s5587_s6 + $0x20] sm:$0xff] }
 0x317   :  { %2847 = vst [vmem:[#allocation3 + $0xa4] sm:$0xf] %v2843_v20  ;;  %2873 = vst [vmem:[#allocation3 + $0xbc] sm:$0xf] %v2869_v21  ;;  %v2813_v63 = vpop.permute.xlu0 %2812  ;;  %v2840_v23 = vpop.permute.xlu1 %2839  ;;  %3210 = vmatprep.subr.bf16.mxu0 %v4159_v22  ;;  %v3855_v20 = vld [vmem:[%s5587_s6 + $0x18] sm:$0xff]  ;;  %v3857_v22 = vld [vmem:[%s5587_s6 + $0x28] sm:$0xff] }
 0x318   :  { %v2816_v24 = vrot.slane %v2813_v63, 4  ;;  %v2842_v57 = vrot.slane %v2840_v23, 4  ;;  %3211 = vmatpush2.bf16.msra.mxu0 %v4157_v17 }
 0x31a   :  { %v2818_v25 = vsel %vm2805_vm13, %v2813_v63, %v2816_v24  ;;  %v2844_v10 = vsel %vm2830_vm12, %v2840_v23, %v2842_v57  ;;  %v4162_v27 = vld [vmem:[#allocation3 + $0xc4] ss:$8 sps:$4 sm:$0xff]  }
 0x31b   :  { %2822 = vst [vmem:[#allocation3 + $0x94] sm:$0xf] %v2818_v25  ;;  %2848 = vst [vmem:[#allocation3 + $0xac] sm:$0xf] %v2844_v10  ;;  %v2788_v28 = vpop.permute.xlu0 %2787  ;;  %v2815_v29 = vpop.permute.xlu1 %2814  ;;  %3212 = vmatprep.subr.bf16.mxu0 %v4162_v27  ;;  %v3859_v25 = vld [vmem:[%s5587_s6 + $0x38] sm:$0xff]  ;;  %v3259_v10 = vld [vmem:[%s5587_s6 + $0x8] sm:$0xff] }
 0x31c   :  { %v2791_v30 = vrot.slane %v2788_v28, 4  ;;  %v2817_v34 = vrot.slane %v2815_v29, 4  ;;  %3213 = vmatpush2.bf16.msra.mxu0 %v4160_v26 }
 0x31e   :  { %v2793_v35 = vsel %vm2780_vm14, %v2788_v28, %v2791_v30  ;;  %v2819_v39 = vsel %vm2805_vm13, %v2815_v29, %v2817_v34  ;;  %v4165_v40 = vld [vmem:[#allocation3 + $0xb4] ss:$8 sps:$4 sm:$0xff]  }
 0x31f   :  { %2797 = vst [vmem:[#allocation3 + $0x84] sm:$0xf] %v2793_v35  ;;  %2823 = vst [vmem:[#allocation3 + $0x9c] sm:$0xf] %v2819_v39  ;;  %v2790_v51 = vpop.permute.xlu1 %2789  ;;  %3214 = vmatprep.subr.bf16.mxu0 %v4165_v40  ;;  %v3858_v29 = vld [vmem:[%s5587_s6 + $0x30] sm:$0xff] }
 0x320   :  { %v2792_v52 = vrot.slane %v2790_v51, 4  ;;  %3215 = vmatpush2.bf16.msra.mxu0 %v4163_v32 }
 0x322   :  { %v2794_v44 = vsel %vm2780_vm14, %v2790_v51, %v2792_v52  ;;  %v4168_v46 = vld [vmem:[#allocation3 + $0xa4] ss:$8 sps:$4 sm:$0xff]  }
 0x323   :  { %2798 = vst [vmem:[#allocation3 + $0x8c] sm:$0xf] %v2794_v44  ;;  %3216 = vmatprep.subr.bf16.mxu0 %v4168_v46 }
 0x324   :  { %3217 = vmatpush2.bf16.msra.mxu0 %v4166_v45 }
 0x326   :  { %v4171_v50 = vld [vmem:[#allocation3 + $0x94] ss:$8 sps:$4 sm:$0xff]  }
 0x327   :  { %3218 = vmatprep.subr.bf16.mxu0 %v4171_v50 }
 0x328   :  { %3219 = vmatpush2.bf16.msra.mxu0 %v4169_v48  ;;  %v3013_v55 = vpop.permute.xlu0 %3012 }
 0x32a   :  { %v4174_v54 = vld [vmem:[#allocation3 + $0x84] ss:$8 sps:$4 sm:$0xff]  }
 0x32b   :  { %3220 = vmatprep.subr.bf16.mxu0 %v4174_v54 }
 0x32c   :  { %3221 = vmatpush2.bf16.msra.mxu0 %v4172_v53  ;;  %v3018_v38 = vpop.permute.xlu1 %3017 }
 0x32f   :  { %3223 = vmatmul.mubr.bf16.vlgmr.msra.gmra.mxu0 %v4175_v49 }
 0x3ef   :  { %v3224_v43 = vpop.f32.mrf.mxu0 }
 0x3f0   :  { %v3225_v42 = vadd.f32 %v3224_v43, %v3013_v55 }
 0x3f1   :  { %v3226_v59 = vpop.f32.mrf.mxu0 }
 0x3f2   :  { %v3237_v33 = vmin.f32 %v3225_v42, 0.0  ;;  %v3227_v61 = vadd.f32 %v3226_v59, %v3013_v55  ;;  %vm3233_vm15 = vcmp.gt.f32.partialorder %v3225_v42, 0.0 }
 0x3f3   :  { %v3228_v62 = vpop.f32.mrf.mxu0 }
 0x3f4   :  { %v3241_v0 = vmul.f32 1.442695, %v3237_v33  ;;  %v3238_v18 = vmin.f32 %v3227_v61, 0.0  ;;  %v3229_v4 = vadd.f32 %v3228_v62, %v3018_v38  ;;  %vm3234_vm0 = vcmp.gt.f32.partialorder %v3227_v61, 0.0 }
 0x3f5   :  { %v3230_v47 = vpop.f32.mrf.mxu0 }
 0x3f6   :  { %4242 = vpow2.f32 %v3241_v0  ;;  %v3243_v5 = vmul.f32 1.442695, %v3238_v18  ;;  %v3239_v36 = vmin.f32 %v3229_v4, 0.0  ;;  %v3231_v6 = vadd.f32 %v3230_v47, %v3018_v38 }
 0x3f7   :  { %vm3235_vm1 = vcmp.gt.f32.partialorder %v3229_v4, 0.0 }
 0x3f8   :  { %4244 = vpow2.f32 %v3243_v5  ;;  %v3245_v31 = vmul.f32 1.442695, %v3239_v36  ;;  %v3240_v7 = vmin.f32 %v3231_v6, 0.0  ;;  %vm3236_vm2 = vcmp.gt.f32.partialorder %v3231_v6, 0.0 }
 0x3fa   :  { %4246 = vpow2.f32 %v3245_v31  ;;  %v3247_v9 = vmul.f32 1.442695, %v3240_v7 }
 0x3fc   :  { %4248 = vpow2.f32 %v3247_v9 }
 0x403   :  { %v4243_v37 = vpop.eup %4242 }
 0x404   :  { %v3850_v12 = vadd.f32 -1.0, %v4243_v37 }
 0x405   :  { %v4245_v1 = vpop.eup %4244 }
 0x406   :  { %v3253_v56 = vsel %vm3233_vm15, %v3225_v42, %v3850_v12  ;;  %v3851_v13 = vadd.f32 -1.0, %v4245_v1 }
 0x407   :  { %v4247_v14 = vpop.eup %4246  ;;  %v3279_v15 = vmul.f32 %v3854_v2, %v3253_v56  ;;  %v3260_v19 = vmul.f32 %v3258_v8, %v3253_v56  ;;  %v3298_v60 = vmul.f32 %v3856_v41, %v3253_v56  ;;  %v3317_v34 = vmul.f32 %v3858_v29, %v3253_v56 }
 0x408   :  { %v3254_v16 = vsel %vm3234_vm0, %v3227_v61, %v3851_v13  ;;  %v3852_v58 = vadd.f32 -1.0, %v4247_v14 }
 0x409   :  { %3281 = vadd.xlane.f32.xlu1 %v3279_v15  ;;  %3262 = vadd.xlane.f32.xlu0 %v3260_v19  ;;  %v3337_v11 = vmul.f32 %v3258_v8, %v3254_v16  ;;  %v3355_v21 = vmul.f32 %v3854_v2, %v3254_v16  ;;  %v4249_v63 = vpop.eup %4248  ;;  %v3373_v23 = vmul.f32 %v3856_v41, %v3254_v16  ;;  %v3273_v41 = vld [vmem:[%s5588_s7] sm:$0x1] }
 0x40a   :  { %v3255_v3 = vsel %vm3235_vm1, %v3229_v4, %v3852_v58  ;;  %v3853_v57 = vadd.f32 -1.0, %v4249_v63  ;;  %v3391_v39 = vmul.f32 %v3858_v29, %v3254_v16 }
 0x40b   :  { %v3280_v17 = vmul.f32 %v3855_v20, %v3255_v3  ;;  %v3299_v24 = vmul.f32 %v3857_v22, %v3255_v3  ;;  %v3318_v26 = vmul.f32 %v3859_v25, %v3255_v3  ;;  %v3261_v27 = vmul.f32 %v3259_v10, %v3255_v3 }
 0x40c   :  { %v3256_v28 = vsel %vm3236_vm2, %v3231_v6, %v3853_v57 }
 0x40d   :  { %3300 = vadd.xlane.f32.xlu1 %v3298_v60  ;;  %3339 = vadd.xlane.f32.xlu0 %v3337_v11  ;;  %v3338_v30 = vmul.f32 %v3259_v10, %v3256_v28  ;;  %v3356_v35 = vmul.f32 %v3855_v20, %v3256_v28  ;;  %v3374_v32 = vmul.f32 %v3857_v22, %v3256_v28  ;;  %v3292_v22 = vld [vmem:[%s5588_s7 + $0x1] sm:$0x1] }
 0x40e   :  { %v3392_v40 = vmul.f32 %v3859_v25, %v3256_v28 }
 0x411   :  { %3357 = vadd.xlane.f32.xlu1 %v3355_v21  ;;  %3283 = vadd.xlane.f32.xlu0 %v3280_v17 }
 0x415   :  { %3375 = vadd.xlane.f32.xlu1 %v3373_v23  ;;  %3302 = vadd.xlane.f32.xlu0 %v3299_v24 }
 0x419   :  { %3321 = vadd.xlane.f32.xlu0 %v3318_v26  ;;  %3264 = vadd.xlane.f32.xlu1 %v3261_v27  ;;  %v3257_v26 = vld [vmem:[%s5589_s8] sm:$0x1] }
 0x41d   :  { %3341 = vadd.xlane.f32.xlu0 %v3338_v30  ;;  %3319 = vadd.xlane.f32.xlu1 %v3317_v34 }
 0x421   :  { %3359 = vadd.xlane.f32.xlu0 %v3356_v35  ;;  %3393 = vadd.xlane.f32.xlu1 %v3391_v39 }
 0x425   :  { %3377 = vadd.xlane.f32.xlu0 %v3374_v32  ;;  %v3311_v32 = vld [vmem:[%s5588_s7 + $0x2] sm:$0x1] }
 0x429   :  { %3395 = vadd.xlane.f32.xlu0 %v3392_v40 }
 0x492   :  { %v3263_v51 = vpop.xlane.xlu0 %3262  ;;  %v3282_v52 = vpop.xlane.xlu1 %3281 }
 0x496   :  { %v3340_v44 = vpop.xlane.xlu0 %3339  ;;  %v3301_v45 = vpop.xlane.xlu1 %3300 }
 0x49a   :  { %v3284_v46 = vpop.xlane.xlu0 %3283  ;;  %v3358_v48 = vpop.xlane.xlu1 %3357 }
 0x49b   :  { %v3285_v50 = vadd.f32 %v3284_v46, %v3282_v52 }
 0x49d   :  { %v3286_v53 = vrot.slane %v3285_v50, 4 }
 0x49e   :  { %v3303_v54 = vpop.xlane.xlu0 %3302  ;;  %v3376_v49 = vpop.xlane.xlu1 %3375 }
 0x49f   :  { %v3304_v55 = vadd.f32 %v3303_v54, %v3301_v45  ;;  %v3287_v43 = vadd.f32 %v3286_v53, %v3285_v50  ;;  %v3330_v50 = vld [vmem:[%s5588_s7 + $0x3] sm:$0x1]  ;;  %v3350_v53 = vld [vmem:[%s5588_s7] sm:$0x1] }
 0x4a1   :  { %v3305_v42 = vrot.slane %v3304_v55, 4  ;;  %v3288_v62 = vrot.slane %v3287_v43, 2 }
 0x4a2   :  { %v3322_v59 = vpop.xlane.xlu0 %3321  ;;  %v3265_v33 = vpop.xlane.xlu1 %3264 }
 0x4a3   :  { %v3306_v61 = vadd.f32 %v3305_v42, %v3304_v55  ;;  %v3266_v38 = vadd.f32 %v3265_v33, %v3263_v51  ;;  %v3289_v31 = vadd.f32 %v3288_v62, %v3287_v43 }
 0x4a5   :  { %v3267_v0 = vrot.slane %v3266_v38, 4  ;;  %v3307_v18 = vrot.slane %v3306_v61, 2  ;;  %v3290_v13 = vrot.slane %v3289_v31, 1 }
 0x4a6   :  { %v3342_v4 = vpop.xlane.xlu0 %3341  ;;  %v3320_v47 = vpop.xlane.xlu1 %3319 }
 0x4a7   :  { %v3268_v5 = vadd.f32 %v3267_v0, %v3266_v38  ;;  %v3343_v36 = vadd.f32 %v3342_v4, %v3340_v44  ;;  %v3323_v6 = vadd.f32 %v3322_v59, %v3320_v47  ;;  %v3308_v37 = vadd.f32 %v3307_v18, %v3306_v61  ;;  %v3368_v59 = vld [vmem:[%s5588_s7 + $0x1] sm:$0x1]  ;;  %v3334_v4 = vld [vmem:[%s5589_s8] sm:$0x1]  ;;  %v3386_v47 = vld [vmem:[%s5588_s7 + $0x2] sm:$0x1] }
 0x4a8   :  { %v3291_v63 = vadd.f32 %v3290_v13, %v3289_v31  ;;  %s4252_s8 = scalar_lea.vmem %s3415_s28, 32 }
 0x4a9   :  { %v3269_v7 = vrot.slane %v3268_v5, 2  ;;  %v3344_v9 = vrot.slane %v3343_v36, 4  ;;  %v3324_v12 = vrot.slane %v3323_v6, 4  ;;  %v3309_v58 = vrot.slane %v3308_v37, 1  ;;  %p4253_p0 = scmp.ne.s32.totalorder %s3415_s28, %s4252_s8  ;;  %p4258_p2 = scmp.lt.s32.totalorder %s4252_s8, %s4252_s8 }
 0x4aa   :  { %v3360_v2 = vpop.xlane.xlu0 %3359  ;;  %v3394_v29 = vpop.xlane.xlu1 %3393  ;;  %v3293_v40 = vmul.f32 %v3292_v22, %v3291_v63 }
 0x4ab   :  { %v3270_v8 = vadd.f32 %v3269_v7, %v3268_v5  ;;  %v3345_v1 = vadd.f32 %v3344_v9, %v3343_v36  ;;  %v3361_v56 = vadd.f32 %v3360_v2, %v3358_v48  ;;  %v3325_v14 = vadd.f32 %v3324_v12, %v3323_v6  ;;  %p4259_p3 = por %p4258_p2, %p4257_p1 }
 0x4ac   :  { %v3310_v27 = vadd.f32 %v3309_v58, %v3308_v37  ;;  %v3404_v37 = vld [vmem:[%s5588_s7 + $0x3] sm:$0x1] }
 0x4ad   :  { %v3271_v15 = vrot.slane %v3270_v8, 1  ;;  %v3346_v19 = vrot.slane %v3345_v1, 2  ;;  %v3362_v16 = vrot.slane %v3361_v56, 4  ;;  %v3326_v60 = vrot.slane %v3325_v14, 2  ;;  %p4260_p4 = pnand %p4259_p3, %p4253_p0 }
 0x4ae   :  { %v3378_v11 = vpop.xlane.xlu0 %3377 }
 0x4af   :  { %v3272_v3 = vadd.f32 %v3271_v15, %v3270_v8  ;;  %v3347_v20 = vadd.f32 %v3346_v19, %v3345_v1  ;;  %v3363_v21 = vadd.f32 %v3362_v16, %v3361_v56  ;;  %v3379_v17 = vadd.f32 %v3378_v11, %v3376_v49 }
 0x4b0   :  { %v3327_v23 = vadd.f32 %v3326_v60, %v3325_v14  ;;  %v3312_v49 = vmul.f32 %v3311_v32, %v3310_v27 }
 0x4b1   :  { %v3274_v24 = vmul.f32 %v3273_v41, %v3272_v3  ;;  %v3348_v57 = vrot.slane %v3347_v20, 1  ;;  %v3364_v25 = vrot.slane %v3363_v21, 2  ;;  %v3380_v10 = vrot.slane %v3379_v17, 4 }
 0x4b2   :  { %v3328_v28 = vrot.slane %v3327_v23, 1  ;;  %v3396_v30 = vpop.xlane.xlu0 %3395 }
 0x4b3   :  { %v3365_v34 = vadd.f32 %v3364_v25, %v3363_v21  ;;  %v3381_v35 = vadd.f32 %v3380_v10, %v3379_v17  ;;  %v3397_v39 = vadd.f32 %v3396_v30, %v3394_v29  ;;  %v3275_v52 = vadd.f32 %v3274_v24, %v3257_v26 }
 0x4b4   :  { %v3329_v51 = vadd.f32 %v3328_v28, %v3327_v23  ;;  %v3349_v44 = vadd.f32 %v3348_v57, %v3347_v20 }
 0x4b5   :  { %v3366_v45 = vrot.slane %v3365_v34, 1  ;;  %v3382_v46 = vrot.slane %v3381_v35, 2  ;;  %v3398_v48 = vrot.slane %v3397_v39, 4  ;;  %v3294_v54 = vadd.f32 %v3293_v40, %v3275_v52 }
 0x4b6   :  { %v3331_v61 = vmul.f32 %v3330_v50, %v3329_v51  ;;  %v3351_v38 = vmul.f32 %v3350_v53, %v3349_v44 }
 0x4b7   :  { %v3367_v55 = vadd.f32 %v3366_v45, %v3365_v34  ;;  %v3383_v43 = vadd.f32 %v3382_v46, %v3381_v35  ;;  %v3399_v42 = vadd.f32 %v3398_v48, %v3397_v39  ;;  %v3313_v33 = vadd.f32 %v3312_v49, %v3294_v54 }
 0x4b8   :  { %v3352_v7 = vadd.f32 %v3351_v38, %v3334_v4 }
 0x4b9   :  { %v3384_v62 = vrot.slane %v3383_v43, 1  ;;  %v3400_v0 = vrot.slane %v3399_v42, 2  ;;  %v3332_v18 = vadd.f32 %v3331_v61, %v3313_v33  ;;  %v3369_v5 = vmul.f32 %v3368_v59, %v3367_v55 }
 0x4bb   :  { %v3385_v36 = vadd.f32 %v3384_v62, %v3383_v43  ;;  %v3401_v31 = vadd.f32 %v3400_v0, %v3399_v42  ;;  %3333 = vst [vmem:[#allocation4] sm:$0x1] %v3332_v18  ;;  %v3370_v2 = vadd.f32 %v3369_v5, %v3352_v7 }
 0x4bd   :  { %v3402_v6 = vrot.slane %v3401_v31, 1  ;;  %v3387_v9 = vmul.f32 %v3386_v47, %v3385_v36 }
 0x4bf   :  { %v3403_v12 = vadd.f32 %v3402_v6, %v3401_v31  ;;  %v3388_v8 = vadd.f32 %v3387_v9, %v3370_v2 }
 0x4c1   :  { %v3405_v1 = vmul.f32 %v3404_v37, %v3403_v12 }
 0x4c3   :  { %v3406_v56 = vadd.f32 %v3405_v1, %v3388_v8 }
 0x4c5   :  { %3407 = vst [vmem:[#allocation4 + $0x1] sm:$0x1] %v3406_v56 }
 0x4c6   :  { %4263 = shalt.err (!%p4260_p4)
}
 0x4c7   :  { %3417 = dma.vmem_to_hbm [thread:$0]  %s3415_s28, 32, %s5590_s9, [#allocation5]  }
 0x4c8   :  { %4272 = dma.done.wait [#allocation5], 32  }
 0x4c9   :  { %4273 = vsyncadd [#allocation5], 4294967264 }
 0x4ca   :  { %3421 = vsyncpa [#allocation5], 1 }

</bundles_post_ra>
